<compile_context>
chip_gen: v5e
topology: v5e:2x2
jax: 0.10.0
libtpu: 0.0.40
codegen_flags: <defaults>
</compile_context>

<pallas_src>
import functools

import jax
import jax.numpy as jnp
from jax.experimental import pallas as pl
from jax.experimental.pallas import tpu as pltpu

EPS = 1e-5


# ----------------------------------------------------------------------------
# Hardware query helpers
# ----------------------------------------------------------------------------
def _tpu_hw_info():
    """Returns (vmem_capacity_bytes, is_megacore) with safe fallbacks."""
    kind = ""
    try:
        kind = jax.devices()[0].device_kind.lower()
    except Exception:
        pass
    is_v7 = ("v7" in kind) or ("7x" in kind)
    megacore = is_v7 or ("v4" in kind) or ("v5p" in kind)
    vmem_cap = 64 * 1024 * 1024 if is_v7 else 128 * 1024 * 1024
    try:
        vmem_cap = int(pltpu.get_tpu_info().vmem_capacity_bytes)
    except Exception:
        pass
    if is_v7:
        vmem_cap = min(vmem_cap, 64 * 1024 * 1024)  # 64 MiB physical per TC
    return vmem_cap, megacore


# ----------------------------------------------------------------------------
# Kernels
# ----------------------------------------------------------------------------
def _bn_fused_kernel(x_ref, g_ref, b_ref, o_ref, *, inv_count, eps):
    """Single-pass BN: the whole (N, c_blk, HW) slab is resident in VMEM."""
    x = x_ref[...].astype(jnp.float32)                      # (N, c_blk, HW)
    # Reduce over HW (lanes) then N (leading dim); both exact, no masking
    # needed since the block covers the full N and HW extents.
    s = jnp.sum(x, axis=2, keepdims=True)                   # (N, c_blk, 1)
    s = jnp.sum(s, axis=0, keepdims=True)                   # (1, c_blk, 1)
    mean = s * inv_count
    d = x - mean
    v = jnp.sum(d * d, axis=2, keepdims=True)
    v = jnp.sum(v, axis=0, keepdims=True) * inv_count       # biased variance
    scale = g_ref[...].astype(jnp.float32) * jax.lax.rsqrt(v + eps)
    o_ref[...] = (d * scale + b_ref[...].astype(jnp.float32)).astype(o_ref.dtype)


def _bn_stats_kernel(x_ref, sum_ref, sumsq_ref, *, hw, l_tile, ragged):
    """Pass 1 (large inputs): accumulate per-channel sum / sum-of-squares."""
    n = pl.program_id(1)
    t = pl.program_id(2)

    @pl.when((n == 0) & (t == 0))
    def _init():
        sum_ref[...] = jnp.zeros_like(sum_ref)
        sumsq_ref[...] = jnp.zeros_like(sumsq_ref)

    x = x_ref[...].astype(jnp.float32)                      # (c_blk, l_tile)
    if ragged:  # static gate: only emit the mask when HW % l_tile != 0
        lane = jax.lax.broadcasted_iota(jnp.int32, x.shape, 1)
        x = jnp.where(t * l_tile + lane < hw, x, 0.0)
    sum_ref[...] += jnp.sum(x, axis=1, keepdims=True)
    sumsq_ref[...] += jnp.sum(x * x, axis=1, keepdims=True)


def _bn_norm_kernel(x_ref, scale_ref, shift_ref, o_ref):
    """Pass 2 (large inputs): fused per-channel scale/shift."""
    x = x_ref[...].astype(jnp.float32)                      # (c_blk, l_tile)
    o_ref[...] = (x * scale_ref[...] + shift_ref[...]).astype(o_ref.dtype)


# ----------------------------------------------------------------------------
# Wrapper
# ----------------------------------------------------------------------------
def batchnorm2d_pallas(x_nchw, gamma, beta, *, eps=EPS, force_two_pass=False):
    """x_nchw: (N, C, H, W); gamma, beta: (C,). Training-mode BN forward."""
    N, C, H, W = x_nchw.shape
    HW = H * W
    x3 = x_nchw.reshape(N, C, HW)            # free reshape, NO transpose
    itemsize = jnp.dtype(x_nchw.dtype).itemsize
    g2 = gamma.reshape(C, 1).astype(jnp.float32)
    b2 = beta.reshape(C, 1).astype(jnp.float32)
    inv_count = 1.0 / float(N * HW)

    vmem_cap, megacore = _tpu_hw_info()
    budget = vmem_cap // 2                   # leave headroom for double buffers

    # Resident bytes per channel on the fused path: double-buffered in + out
    # blocks (input dtype) plus ~4x f32 temporaries inside the body.
    per_ch = N * HW * (4 * itemsize + 4 * 4)
    fused_max_c = budget // max(per_ch, 1)

    if (not force_two_pass) and fused_max_c >= min(C, 8):
        # -------- single-pass, fully-resident path (1 read + 1 write) --------
        c_blk = min(C, int(fused_max_c))
        if c_blk < C:
            c_blk = max(8, (c_blk // 8) * 8)
        num_c = pl.cdiv(C, c_blk)
        if megacore and C >= 16 and (num_c % 2 == 1):
            # Even channel-block count so the "parallel" axis splits cleanly
            # across 2 TensorCores (C=384 -> 2 blocks of 192).
            num_c = num_c + 1
            c_blk = max(8, ((-(-C // num_c) + 7) // 8) * 8)
            num_c = pl.cdiv(C, c_blk)

        blk_in = N * c_blk * HW * itemsize
        need = 4 * blk_in + 4 * N * c_blk * HW * 4
        vmem_limit = int(min(vmem_cap * 3 // 4,
                             max(32 * 1024 * 1024, 2 * need)))

        out3 = pl.pallas_call(
            functools.partial(_bn_fused_kernel, inv_count=inv_count,
                              eps=float(eps)),
            out_shape=jax.ShapeDtypeStruct((N, C, HW), x_nchw.dtype),
            grid_spec=pltpu.PrefetchScalarGridSpec(
                num_scalar_prefetch=0,
                grid=(num_c,),
                in_specs=[
                    pl.BlockSpec((N, c_blk, HW), lambda c: (0, c, 0)),
                    pl.BlockSpec((c_blk, 1), lambda c: (c, 0)),
                    pl.BlockSpec((c_blk, 1), lambda c: (c, 0)),
                ],
                out_specs=pl.BlockSpec((N, c_blk, HW), lambda c: (0, c, 0)),
            ),
            compiler_params=pltpu.CompilerParams(
                dimension_semantics=("parallel",),
                vmem_limit_bytes=vmem_limit,
            ),
        )(x3, g2, b2)
        return out3.reshape(N, C, H, W)

    # ---------- two-pass path for inputs that do not fit in VMEM ----------
    c_blk = min(C, 128)
    if c_blk < C:
        c_blk = max(8, (c_blk // 8) * 8)
    # Bigger tiles on 128 MiB-VMEM parts (v5e/v6e), smaller on v7x (64 MiB).
    target = 16 * 1024 * 1024 if vmem_cap >= 100 * 1024 * 1024 else 8 * 1024 * 1024
    max_lanes = max(128, (target // (itemsize * c_blk)) // 128 * 128)
    l_tile = HW if HW <= max_lanes else max_lanes
    if l_tile < HW:
        l_tile = max(128, (l_tile // 128) * 128)
    num_c = pl.cdiv(C, c_blk)
    num_t = pl.cdiv(HW, l_tile)
    ragged = (HW % l_tile) != 0

    blk_bytes = c_blk * l_tile * itemsize
    vmem_limit = int(min(vmem_cap * 3 // 4,
                         max(32 * 1024 * 1024, 6 * blk_bytes)))

    # Pass 1: per-channel sum / sum-of-squares (output stays resident over n,t).
    sum_c, sumsq_c = pl.pallas_call(
        functools.partial(_bn_stats_kernel, hw=HW, l_tile=l_tile, ragged=ragged),
        out_shape=(jax.ShapeDtypeStruct((C, 1), jnp.float32),
                   jax.ShapeDtypeStruct((C, 1), jnp.float32)),
        grid_spec=pltpu.PrefetchScalarGridSpec(
            num_scalar_prefetch=0,
            grid=(num_c, N, num_t),
            in_specs=[pl.BlockSpec((None, c_blk, l_tile),
                                   lambda c, n, t: (n, c, t))],
            out_specs=[pl.BlockSpec((c_blk, 1), lambda c, n, t: (c, 0)),
                       pl.BlockSpec((c_blk, 1), lambda c, n, t: (c, 0))],
        ),
        compiler_params=pltpu.CompilerParams(
            dimension_semantics=("parallel", "arbitrary", "arbitrary"),
            vmem_limit_bytes=vmem_limit,
        ),
    )(x3)

    # Finalize (tiny (C,) math, done by XLA): fold affine into scale/shift.
    mean = sum_c.reshape(C) * inv_count
    var = jnp.maximum(sumsq_c.reshape(C) * inv_count - mean * mean, 0.0)
    scale = gamma.astype(jnp.float32) * jax.lax.rsqrt(var + eps)
    shift = beta.astype(jnp.float32) - mean * scale
    scale2 = scale.reshape(C, 1)
    shift2 = shift.reshape(C, 1)

    # Pass 2: normalize (every output block written exactly once).
    out3 = pl.pallas_call(
        _bn_norm_kernel,
        out_shape=jax.ShapeDtypeStruct((N, C, HW), x_nchw.dtype),
        grid_spec=pltpu.PrefetchScalarGridSpec(
            num_scalar_prefetch=0,
            grid=(num_c, N, num_t),
            in_specs=[
                pl.BlockSpec((None, c_blk, l_tile), lambda c, n, t: (n, c, t)),
                pl.BlockSpec((c_blk, 1), lambda c, n, t: (c, 0)),
                pl.BlockSpec((c_blk, 1), lambda c, n, t: (c, 0)),
            ],
            out_specs=pl.BlockSpec((None, c_blk, l_tile),
                                   lambda c, n, t: (n, c, t)),
        ),
        compiler_params=pltpu.CompilerParams(
            dimension_semantics=("parallel", "parallel", "parallel"),
            vmem_limit_bytes=vmem_limit,
        ),
    )(x3, scale2, shift2)
    return out3.reshape(N, C, H, W)


# ----------------------------------------------------------------------------
# Reference & test
# ----------------------------------------------------------------------------
def _reference(x_nchw, gamma, beta, eps=EPS):
    mean = jnp.mean(x_nchw, axis=(0, 2, 3), keepdims=True)
    var = jnp.mean((x_nchw - mean) ** 2, axis=(0, 2, 3), keepdims=True)
    xn = (x_nchw - mean) * jax.lax.rsqrt(var + eps)
    return xn * gamma.reshape(1, -1, 1, 1) + beta.reshape(1, -1, 1, 1)


if __name__ == "__main__":
    key = jax.random.PRNGKey(0)
    kx, kg, kb = jax.random.split(key, 3)

    # Shapes from the original module: x72 = randn(1, 384, 14, 14).
    N, C, H, W = 1, 384, 14, 14
    x = jax.random.normal(kx, (N, C, H, W), dtype=jnp.float32)

    # PyTorch defaults are ones/zeros; use non-trivial values so the affine
    # path is exercised.
    gamma = 1.0 + 0.1 * jax.random.normal(kg, (C,), dtype=jnp.float32)
    beta = 0.1 * jax.random.normal(kb, (C,), dtype=jnp.float32)

    ref = _reference(x, gamma, beta)

    # Primary (single-pass, resident-in-VMEM) path — used for this workload.
    out = jax.block_until_ready(batchnorm2d_pallas(x, gamma, beta))
    assert out.shape == (N, C, H, W)
    assert jnp.max(jnp.abs(out - ref)) < 1e-4

    # Also exercise the two-pass large-input fallback once for correctness.
    out2 = jax.block_until_ready(
        batchnorm2d_pallas(x, gamma, beta, force_two_pass=True))
    assert jnp.max(jnp.abs(out2 - ref)) < 1e-4

    print("KERNEL_OK")
</pallas_src>

<mosaic_0001>
module attributes {stable_mosaic.version = 11 : i64} {
  func.func @_bn_fused_kernel(%arg0: i32, %arg1: memref<1x384x196xf32, #tpu.memory_space<vmem>>, %arg2: memref<384x1xf32, #tpu.memory_space<vmem>>, %arg3: memref<384x1xf32, #tpu.memory_space<vmem>>, %arg4: memref<1x384x196xf32, #tpu.memory_space<vmem>>) attributes {dimension_semantics = [#tpu.dimension_semantics<parallel>], iteration_bounds = array<i64: 1>, scalar_prefetch = 0 : i64, scratch_operands = 0 : i64, tpu.core_type = #tpu.core_type<tc>, window_params = [{transform_indices = @transform_0, window_bounds = array<i64: 1, 384, 196>}, {transform_indices = @transform_1, window_bounds = array<i64: 384, 1>}, {transform_indices = @transform_2, window_bounds = array<i64: 384, 1>}, {transform_indices = @transform_3, window_bounds = array<i64: 1, 384, 196>}]} {
    %c0 = arith.constant 0 : index
    %c0_0 = arith.constant 0 : index
    %c0_1 = arith.constant 0 : index
    %0 = vector.load %arg1[%c0, %c0_0, %c0_1] : memref<1x384x196xf32, #tpu.memory_space<vmem>>, vector<1x384x196xf32>
    %cst = arith.constant dense<0.000000e+00> : vector<1x384xf32>
    %1 = vector.multi_reduction <add>, %0, %cst [2] : vector<1x384x196xf32> to vector<1x384xf32>
    %2 = vector.shape_cast %1 : vector<1x384xf32> to vector<1x384x1xf32>
    %cst_2 = arith.constant dense<0.000000e+00> : vector<384x1xf32>
    %3 = vector.multi_reduction <add>, %2, %cst_2 [0] : vector<1x384x1xf32> to vector<384x1xf32>
    %4 = vector.shape_cast %3 : vector<384x1xf32> to vector<1x384x1xf32>
    %cst_3 = arith.constant 0.00510204071 : f32
    %5 = vector.broadcast %cst_3 : f32 to vector<1x384x1xf32>
    %6 = arith.mulf %4, %5 : vector<1x384x1xf32>
    %7 = vector.broadcast %6 : vector<1x384x1xf32> to vector<1x384x196xf32>
    %8 = arith.subf %0, %7 : vector<1x384x196xf32>
    %9 = arith.mulf %8, %8 : vector<1x384x196xf32>
    %cst_4 = arith.constant dense<0.000000e+00> : vector<1x384xf32>
    %10 = vector.multi_reduction <add>, %9, %cst_4 [2] : vector<1x384x196xf32> to vector<1x384xf32>
    %11 = vector.shape_cast %10 : vector<1x384xf32> to vector<1x384x1xf32>
    %cst_5 = arith.constant dense<0.000000e+00> : vector<384x1xf32>
    %12 = vector.multi_reduction <add>, %11, %cst_5 [0] : vector<1x384x1xf32> to vector<384x1xf32>
    %13 = vector.shape_cast %12 : vector<384x1xf32> to vector<1x384x1xf32>
    %cst_6 = arith.constant 0.00510204071 : f32
    %14 = vector.broadcast %cst_6 : f32 to vector<1x384x1xf32>
    %15 = arith.mulf %13, %14 : vector<1x384x1xf32>
    %c0_7 = arith.constant 0 : index
    %c0_8 = arith.constant 0 : index
    %16 = vector.load %arg2[%c0_7, %c0_8] : memref<384x1xf32, #tpu.memory_space<vmem>>, vector<384x1xf32>
    %cst_9 = arith.constant 9.99999974E-6 : f32
    %17 = vector.broadcast %cst_9 : f32 to vector<1x384x1xf32>
    %18 = arith.addf %15, %17 : vector<1x384x1xf32>
    %19 = math.rsqrt %18 : vector<1x384x1xf32>
    %20 = vector.shape_cast %16 : vector<384x1xf32> to vector<1x384x1xf32>
    %21 = arith.mulf %20, %19 : vector<1x384x1xf32>
    %22 = vector.broadcast %21 : vector<1x384x1xf32> to vector<1x384x196xf32>
    %23 = arith.mulf %8, %22 : vector<1x384x196xf32>
    %c0_10 = arith.constant 0 : index
    %c0_11 = arith.constant 0 : index
    %24 = vector.load %arg3[%c0_10, %c0_11] : memref<384x1xf32, #tpu.memory_space<vmem>>, vector<384x1xf32>
    %25 = vector.shape_cast %24 : vector<384x1xf32> to vector<1x384x1xf32>
    %26 = vector.broadcast %25 : vector<1x384x1xf32> to vector<1x384x196xf32>
    %27 = arith.addf %23, %26 : vector<1x384x196xf32>
    %c0_12 = arith.constant 0 : index
    %c0_13 = arith.constant 0 : index
    %c0_14 = arith.constant 0 : index
    %28 = vector.load %arg4[%c0_12, %c0_13, %c0_14] : memref<1x384x196xf32, #tpu.memory_space<vmem>>, vector<1x384x196xf32>
    tpu.vector_store %arg4[%c0_12, %c0_13, %c0_14], %27 {strides = array<i32>} : memref<1x384x196xf32, #tpu.memory_space<vmem>>, vector<1x384x196xf32>,
    return
  }
  func.func @transform_0(%arg0: i32) -> (i32, i32, i32) {
    %c0_i32 = arith.constant 0 : i32
    %c0_i32_0 = arith.constant 0 : i32
    %c0_i32_1 = arith.constant 0 : i32
    return %c0_i32, %arg0, %c0_i32_0 : i32, i32, i32
  }
  func.func @transform_1(%arg0: i32) -> (i32, i32) {
    %c0_i32 = arith.constant 0 : i32
    %c0_i32_0 = arith.constant 0 : i32
    return %arg0, %c0_i32 : i32, i32
  }
  func.func @transform_2(%arg0: i32) -> (i32, i32) {
    %c0_i32 = arith.constant 0 : i32
    %c0_i32_0 = arith.constant 0 : i32
    return %arg0, %c0_i32 : i32, i32
  }
  func.func @transform_3(%arg0: i32) -> (i32, i32, i32) {
    %c0_i32 = arith.constant 0 : i32
    %c0_i32_0 = arith.constant 0 : i32
    %c0_i32_1 = arith.constant 0 : i32
    return %c0_i32, %arg0, %c0_i32_0 : i32, i32, i32
  }
}

</mosaic_0001>

<bundles_post_ra>
// kernel: tpu_custom_call.1
= control target key start
LH: loop header
LB: loop body
LE: loop exit
PB: predicated region body
PF: predicated region fallthrough
CT: control target
= control target key end

     0   :  { %vm110_vm0 = vcmask 556032   ;;  %s5410_s0 = inlined_call_operand.vmem [shape: f32[1,384,196], index: 0, kind: input, shape index: {}]   ;;  %s5411_s1 = inlined_call_operand.vmem [shape: f32[384,1], index: 1, kind: input, shape index: {}]   ;;  %s5412_s2 = inlined_call_operand.vmem [shape: f32[384,1], index: 2, kind: input, shape index: {}]   ;;  %s5413_s3 = inlined_call_operand.vmem [shape: f32[1,384,196], index: 3, kind: output, shape index: {}]  }
   0x1   :  { %v2447_v0 = vld [vmem:[%s5410_s0 + $0x40] sm:$0xff]  ;;  %v2452_v1 = vld [vmem:[%s5410_s0 + $0x48] sm:$0xff]  ;;  %v2484_v10 = vld [vmem:[%s5410_s0 + $0x58] sm:$0xff] }
   0x2   :  { %v2457_v2 = vld [vmem:[%s5410_s0] sm:$0xff]  ;;  %v127_v3 = vsel %vm110_vm0, %v2452_v1, 0.0  ;;  %v2464_v4 = vld [vmem:[%s5410_s0 + $0x8] sm:$0xff]  ;;  %v2491_v13 = vld [vmem:[%s5410_s0 + $0x18] sm:$0xff]  ;;  %v131_v16 = vsel %vm110_vm0, %v2484_v10, 0.0 }
   0x3   :  { %v2469_v5 = vld [vmem:[%s5410_s0 + $0x20] sm:$0xff]  ;;  %v2474_v6 = vld [vmem:[%s5410_s0 + $0x28] sm:$0xff]  ;;  %v128_v7 = vadd.f32 %v127_v3, %v2447_v0  ;;  %v111_v8 = vsel %vm110_vm0, %v2464_v4, 0.0  ;;  %v2496_v14 = vld [vmem:[%s5410_s0 + $0x38] sm:$0xff]  ;;  %v115_v18 = vsel %vm110_vm0, %v2491_v13, 0.0 }
   0x4   :  { %v119_v9 = vsel %vm110_vm0, %v2474_v6, 0.0  ;;  %v112_v11 = vadd.f32 %v111_v8, %v2457_v2  ;;  %v2501_v15 = vld [vmem:[%s5410_s0 + $0x50] sm:$0xff]  ;;  %v123_v20 = vsel %vm110_vm0, %v2496_v14, 0.0  ;;  %v2525_v24 = vld [vmem:[%s5410_s0 + $0x88] sm:$0xff]  ;;  %v2535_v26 = vld [vmem:[%s5410_s0 + $0x78] sm:$0xff] }
   0x5   :  { %v120_v12 = vadd.f32 %v119_v9, %v2469_v5  ;;  %129 = vadd.xlane.f32.xlu2 %v128_v7  ;;  %v2508_v17 = vld [vmem:[%s5410_s0 + $0x10] sm:$0xff]  ;;  %v132_v21 = vadd.f32 %v131_v16, %v2501_v15  ;;  %v2530_v25 = vld [vmem:[%s5410_s0 + $0x68] sm:$0xff]  ;;  %v2540_v27 = vld [vmem:[%s5410_s0 + $0x80] sm:$0xff]  ;;  %v143_v28 = vsel %vm110_vm0, %v2525_v24, 0.0  ;;  %v139_v32 = vsel %vm110_vm0, %v2535_v26, 0.0 }
   0x6   :  { %113 = vadd.xlane.f32.xlu0 %v112_v11  ;;  %v2515_v19 = vld [vmem:[%s5410_s0 + $0x30] sm:$0xff]  ;;  %v116_v22 = vadd.f32 %v115_v18, %v2508_v17  ;;  %v2547_v29 = vld [vmem:[%s5410_s0 + $0x60] sm:$0xff]  ;;  %v135_v30 = vsel %vm110_vm0, %v2530_v25, 0.0  ;;  %v144_v33 = vadd.f32 %v143_v28, %v2540_v27  ;;  %v2564_v36 = vld [vmem:[%s5410_s0 + $0xb8] sm:$0xff] }
   0x7   :  { %121 = vadd.xlane.f32.xlu1 %v120_v12  ;;  %v124_v23 = vadd.f32 %v123_v20, %v2515_v19  ;;  %v2554_v31 = vld [vmem:[%s5410_s0 + $0x70] sm:$0xff]  ;;  %v136_v34 = vadd.f32 %v135_v30, %v2547_v29  ;;  %v2569_v37 = vld [vmem:[%s5410_s0 + $0x98] sm:$0xff]  ;;  %v2574_v38 = vld [vmem:[%s5410_s0 + $0xa8] sm:$0xff]  ;;  %v155_v40 = vsel %vm110_vm0, %v2564_v36, 0.0 }
   0x8   :  { %v140_v35 = vadd.f32 %v139_v32, %v2554_v31  ;;  %v2579_v39 = vld [vmem:[%s5410_s0 + $0xb0] sm:$0xff]  ;;  %v147_v42 = vsel %vm110_vm0, %v2569_v37, 0.0  ;;  %v2593_v43 = vld [vmem:[%s5410_s0 + $0xa0] sm:$0xff]  ;;  %v151_v44 = vsel %vm110_vm0, %v2574_v38, 0.0  ;;  %v2603_v48 = vld [vmem:[%s5410_s0 + $0xe8] sm:$0xff] }
   0x9   :  { %v2586_v41 = vld [vmem:[%s5410_s0 + $0x90] sm:$0xff]  ;;  %v156_v45 = vadd.f32 %v155_v40, %v2579_v39  ;;  %v152_v47 = vadd.f32 %v151_v44, %v2593_v43  ;;  %v2608_v49 = vld [vmem:[%s5410_s0 + $0xc8] sm:$0xff]  ;;  %v2613_v50 = vld [vmem:[%s5410_s0 + $0xd8] sm:$0xff]  ;;  %v167_v52 = vsel %vm110_vm0, %v2603_v48, 0.0 }
   0xa   :  { %v148_v46 = vadd.f32 %v147_v42, %v2586_v41  ;;  %v2618_v51 = vld [vmem:[%s5410_s0 + $0xe0] sm:$0xff]  ;;  %v159_v54 = vsel %vm110_vm0, %v2608_v49, 0.0  ;;  %v2632_v55 = vld [vmem:[%s5410_s0 + $0xd0] sm:$0xff]  ;;  %v163_v56 = vsel %vm110_vm0, %v2613_v50, 0.0  ;;  %v2642_v60 = vld [vmem:[%s5410_s0 + $0x118] sm:$0xff] }
   0xb   :  { %v2625_v53 = vld [vmem:[%s5410_s0 + $0xc0] sm:$0xff]  ;;  %v168_v57 = vadd.f32 %v167_v52, %v2618_v51  ;;  %v164_v59 = vadd.f32 %v163_v56, %v2632_v55  ;;  %v2647_v61 = vld [vmem:[%s5410_s0 + $0xf8] sm:$0xff]  ;;  %v2652_v62 = vld [vmem:[%s5410_s0 + $0x108] sm:$0xff]  ;;  %v179_v3 = vsel %vm110_vm0, %v2642_v60, 0.0 }
   0xc   :  { %v160_v58 = vadd.f32 %v159_v54, %v2625_v53  ;;  %v2657_v63 = vld [vmem:[%s5410_s0 + $0x110] sm:$0xff]  ;;  %v171_v8 = vsel %vm110_vm0, %v2647_v61, 0.0  ;;  %v2671_v9 = vld [vmem:[%s5410_s0 + $0x100] sm:$0xff]  ;;  %v175_v11 = vsel %vm110_vm0, %v2652_v62, 0.0  ;;  %v2681_v20 = vld [vmem:[%s5410_s0 + $0x148] sm:$0xff] }
   0xd   :  { %133 = vadd.xlane.f32.xlu2 %v132_v21  ;;  %v2664_v7 = vld [vmem:[%s5410_s0 + $0xf0] sm:$0xff]  ;;  %v180_v12 = vadd.f32 %v179_v3, %v2657_v63  ;;  %v176_v18 = vadd.f32 %v175_v11, %v2671_v9  ;;  %v2686_v21 = vld [vmem:[%s5410_s0 + $0x128] sm:$0xff]  ;;  %v191_v28 = vsel %vm110_vm0, %v2681_v20, 0.0  ;;  %v2703_v30 = vld [vmem:[%s5410_s0 + $0x120] sm:$0xff] }
   0xe   :  { %117 = vadd.xlane.f32.xlu0 %v116_v22  ;;  %v172_v16 = vadd.f32 %v171_v8, %v2664_v7  ;;  %v2691_v22 = vld [vmem:[%s5410_s0 + $0x138] sm:$0xff]  ;;  %v183_v32 = vsel %vm110_vm0, %v2686_v21, 0.0  ;;  %v2742_v54 = vld [vmem:[%s5410_s0 + $0x150] sm:$0xff]  ;;  %v2759_v11 = vld [vmem:[%s5410_s0 + $0x1a8] sm:$0xff] }
   0xf   :  { %125 = vadd.xlane.f32.xlu1 %v124_v23  ;;  %v2696_v23 = vld [vmem:[%s5410_s0 + $0x140] sm:$0xff]  ;;  %v184_v40 = vadd.f32 %v183_v32, %v2703_v30  ;;  %v2720_v44 = vld [vmem:[%s5410_s0 + $0x178] sm:$0xff]  ;;  %5550 = vst [vmem:[#allocation4_spill] sm:$0xff] %v2759_v11 }
  0x10   :  { %v203_v52 = vsel %vm110_vm0, %v2720_v44, 0.0  ;;  %v2781_v32 = vld [vmem:[%s5410_s0 + $0x180] sm:$0xff] }
  0x11   :  { %5554 = vst [vmem:[#allocation8_spill] sm:$0xff] %v2781_v32 }
  0x15   :  { %145 = vadd.xlane.f32.xlu2 %v144_v33  ;;  %v2710_v33 = vld [vmem:[%s5410_s0 + $0x130] sm:$0xff] }
  0x16   :  { %137 = vadd.xlane.f32.xlu0 %v136_v34  ;;  %v187_v34 = vsel %vm110_vm0, %v2691_v22, 0.0 }
  0x17   :  { %141 = vadd.xlane.f32.xlu1 %v140_v35  ;;  %v192_v35 = vadd.f32 %v191_v28, %v2696_v23  ;;  %v188_v42 = vadd.f32 %v187_v34, %v2710_v33  ;;  %v215_v28 = vsel %vm110_vm0, %v2759_v11, 0.0 }
  0x1d   :  { %157 = vadd.xlane.f32.xlu2 %v156_v45  ;;  %v2725_v45 = vld [vmem:[%s5410_s0 + $0x158] sm:$0xff] }
  0x1e   :  { %149 = vadd.xlane.f32.xlu0 %v148_v46  ;;  %v2730_v46 = vld [vmem:[%s5410_s0 + $0x168] sm:$0xff]  ;;  %v195_v56 = vsel %vm110_vm0, %v2725_v45, 0.0 }
  0x1f   :  { %153 = vadd.xlane.f32.xlu1 %v152_v47  ;;  %5548 = vst [vmem:[#allocation2_spill] sm:$0xff] %v2730_v46  ;;  %v2735_v47 = vld [vmem:[%s5410_s0 + $0x170] sm:$0xff]  ;;  %v196_v3 = vadd.f32 %v195_v56, %v2742_v54 }
  0x25   :  { %169 = vadd.xlane.f32.xlu2 %v168_v57  ;;  %v2749_v57 = vld [vmem:[%s5410_s0 + $0x160] sm:$0xff] }
  0x26   :  { %161 = vadd.xlane.f32.xlu0 %v160_v58  ;;  %5549 = vst [vmem:[#allocation3_spill] sm:$0xff] %v2749_v57  ;;  %v199_v58 = vsel %vm110_vm0, %v2730_v46, 0.0 }
  0x27   :  { %165 = vadd.xlane.f32.xlu1 %v164_v59  ;;  %v204_v59 = vadd.f32 %v203_v52, %v2735_v47  ;;  %v200_v8 = vadd.f32 %v199_v58, %v2749_v57  ;;  %v2798_v58 = vld [vmem:[%s5410_s0 + $0x1d8] sm:$0xff] }
  0x28   :  { %5556 = vst [vmem:[#allocation10_spill] sm:$0xff] %v2798_v58 }
  0x2d   :  { %181 = vadd.xlane.f32.xlu2 %v180_v12  ;;  %v2764_v12 = vld [vmem:[%s5410_s0 + $0x188] sm:$0xff] }
  0x2e   :  { %173 = vadd.xlane.f32.xlu0 %v172_v16  ;;  %5551 = vst [vmem:[#allocation5_spill] sm:$0xff] %v2764_v12  ;;  %v2769_v16 = vld [vmem:[%s5410_s0 + $0x198] sm:$0xff]  ;;  %v207_v34 = vsel %vm110_vm0, %v2764_v12, 0.0 }
  0x2f   :  { %177 = vadd.xlane.f32.xlu1 %v176_v18  ;;  %5552 = vst [vmem:[#allocation6_spill] sm:$0xff] %v2769_v16  ;;  %v2774_v18 = vld [vmem:[%s5410_s0 + $0x1a0] sm:$0xff]  ;;  %v208_v52 = vadd.f32 %v207_v34, %v2781_v32  ;;  %v2820_v34 = vld [vmem:[%s5410_s0 + $0x1b0] sm:$0xff] }
  0x30   :  { %5553 = vst [vmem:[#allocation7_spill] sm:$0xff] %v2774_v18 }
  0x31   :  { %5560 = vst [vmem:[#allocation14_spill] sm:$0xff] %v2820_v34 }
  0x35   :  { %193 = vadd.xlane.f32.xlu2 %v192_v35  ;;  %v2788_v35 = vld [vmem:[%s5410_s0 + $0x190] sm:$0xff] }
  0x36   :  { %185 = vadd.xlane.f32.xlu0 %v184_v40  ;;  %5555 = vst [vmem:[#allocation9_spill] sm:$0xff] %v2788_v35  ;;  %v211_v40 = vsel %vm110_vm0, %v2769_v16, 0.0  ;;  %v2837_v16 = vld [vmem:[%s5410_s0 + $0x208] sm:$0xff] }
  0x37   :  { %189 = vadd.xlane.f32.xlu1 %v188_v42  ;;  %v216_v42 = vadd.f32 %v215_v28, %v2774_v18  ;;  %v212_v56 = vadd.f32 %v211_v40, %v2788_v35  ;;  %v227_v28 = vsel %vm110_vm0, %v2798_v58, 0.0  ;;  %5562 = vst [vmem:[#allocation16_spill] sm:$0xff] %v2837_v16 }
  0x3d   :  { %205 = vadd.xlane.f32.xlu2 %v204_v59  ;;  %v2803_v59 = vld [vmem:[%s5410_s0 + $0x1b8] sm:$0xff] }
  0x3e   :  { %197 = vadd.xlane.f32.xlu0 %v196_v3  ;;  %5557 = vst [vmem:[#allocation11_spill] sm:$0xff] %v2803_v59  ;;  %v2808_v3 = vld [vmem:[%s5410_s0 + $0x1c8] sm:$0xff]  ;;  %v219_v40 = vsel %vm110_vm0, %v2803_v59, 0.0 }
  0x3f   :  { %201 = vadd.xlane.f32.xlu1 %v200_v8  ;;  %5558 = vst [vmem:[#allocation12_spill] sm:$0xff] %v2808_v3  ;;  %v2813_v8 = vld [vmem:[%s5410_s0 + $0x1d0] sm:$0xff]  ;;  %v220_v58 = vadd.f32 %v219_v40, %v2820_v34  ;;  %v2842_v59 = vld [vmem:[%s5410_s0 + $0x1e8] sm:$0xff]  ;;  %v239_v40 = vsel %vm110_vm0, %v2837_v16, 0.0 }
  0x40   :  { %5559 = vst [vmem:[#allocation13_spill] sm:$0xff] %v2813_v8 }
  0x41   :  { %5563 = vst [vmem:[#allocation17_spill] sm:$0xff] %v2842_v59 }
  0x45   :  { %217 = vadd.xlane.f32.xlu2 %v216_v42  ;;  %v2827_v42 = vld [vmem:[%s5410_s0 + $0x1c0] sm:$0xff] }
  0x46   :  { %209 = vadd.xlane.f32.xlu0 %v208_v52  ;;  %5561 = vst [vmem:[#allocation15_spill] sm:$0xff] %v2827_v42  ;;  %v223_v52 = vsel %vm110_vm0, %v2808_v3, 0.0  ;;  %v2847_v3 = vld [vmem:[%s5410_s0 + $0x1f8] sm:$0xff] }
  0x47   :  { %213 = vadd.xlane.f32.xlu1 %v212_v56  ;;  %v228_v56 = vadd.f32 %v227_v28, %v2813_v8  ;;  %v224_v35 = vadd.f32 %v223_v52, %v2827_v42  ;;  %5564 = vst [vmem:[#allocation18_spill] sm:$0xff] %v2847_v3  ;;  %v2852_v28 = vld [vmem:[%s5410_s0 + $0x200] sm:$0xff]  ;;  %v231_v42 = vsel %vm110_vm0, %v2842_v59, 0.0  ;;  %v2876_v8 = vld [vmem:[%s5410_s0 + $0x238] sm:$0xff] }
  0x48   :  { %5565 = vst [vmem:[#allocation19_spill] sm:$0xff] %v2852_v28  ;;  %v2859_v52 = vld [vmem:[%s5410_s0 + $0x1e0] sm:$0xff]  ;;  %v2881_v59 = vld [vmem:[%s5410_s0 + $0x218] sm:$0xff] }
  0x49   :  { %5566 = vst [vmem:[#allocation20_spill] sm:$0xff] %v2859_v52  ;;  %v232_v16 = vadd.f32 %v231_v42, %v2859_v52  ;;  %v2891_v42 = vld [vmem:[%s5410_s0 + $0x230] sm:$0xff] }
  0x4a   :  { %5568 = vst [vmem:[#allocation22_spill] sm:$0xff] %v2876_v8 }
  0x4b   :  { %5569 = vst [vmem:[#allocation23_spill] sm:$0xff] %v2881_v59 }
  0x4c   :  { %5571 = vst [vmem:[#allocation25_spill] sm:$0xff] %v2891_v42 }
  0x4d   :  { %229 = vadd.xlane.f32.xlu2 %v228_v56  ;;  %v240_v56 = vadd.f32 %v239_v40, %v2852_v28  ;;  %v251_v40 = vsel %vm110_vm0, %v2876_v8, 0.0  ;;  %v2915_v28 = vld [vmem:[%s5410_s0 + $0x268] sm:$0xff] }
  0x4e   :  { %221 = vadd.xlane.f32.xlu0 %v220_v58  ;;  %v235_v58 = vsel %vm110_vm0, %v2847_v3, 0.0  ;;  %v2886_v3 = vld [vmem:[%s5410_s0 + $0x228] sm:$0xff]  ;;  %5574 = vst [vmem:[#allocation28_spill] sm:$0xff] %v2915_v28 }
  0x4f   :  { %225 = vadd.xlane.f32.xlu1 %v224_v35  ;;  %v2866_v35 = vld [vmem:[%s5410_s0 + $0x1f0] sm:$0xff]  ;;  %5570 = vst [vmem:[#allocation24_spill] sm:$0xff] %v2886_v3 }
  0x50   :  { %5567 = vst [vmem:[#allocation21_spill] sm:$0xff] %v2866_v35  ;;  %v236_v34 = vadd.f32 %v235_v58, %v2866_v35  ;;  %v2898_v58 = vld [vmem:[%s5410_s0 + $0x210] sm:$0xff]  ;;  %v243_v35 = vsel %vm110_vm0, %v2881_v59, 0.0  ;;  %v2920_v59 = vld [vmem:[%s5410_s0 + $0x248] sm:$0xff] }
  0x51   :  { %5572 = vst [vmem:[#allocation26_spill] sm:$0xff] %v2898_v58  ;;  %v244_v8 = vadd.f32 %v243_v35, %v2898_v58  ;;  %v2930_v35 = vld [vmem:[%s5410_s0 + $0x260] sm:$0xff] }
  0x52   :  { %5575 = vst [vmem:[#allocation29_spill] sm:$0xff] %v2920_v59 }
  0x53   :  { %5577 = vst [vmem:[#allocation31_spill] sm:$0xff] %v2930_v35 }
  0x55   :  { %241 = vadd.xlane.f32.xlu2 %v240_v56  ;;  %v252_v56 = vadd.f32 %v251_v40, %v2891_v42  ;;  %v263_v40 = vsel %vm110_vm0, %v2915_v28, 0.0  ;;  %v2954_v42 = vld [vmem:[%s5410_s0 + $0x298] sm:$0xff] }
  0x56   :  { %233 = vadd.xlane.f32.xlu0 %v232_v16  ;;  %v2905_v16 = vld [vmem:[%s5410_s0 + $0x220] sm:$0xff]  ;;  %5580 = vst [vmem:[#allocation34_spill] sm:$0xff] %v2954_v42 }
  0x57   :  { %237 = vadd.xlane.f32.xlu1 %v236_v34  ;;  %5573 = vst [vmem:[#allocation27_spill] sm:$0xff] %v2905_v16  ;;  %v247_v34 = vsel %vm110_vm0, %v2886_v3, 0.0  ;;  %v2925_v3 = vld [vmem:[%s5410_s0 + $0x258] sm:$0xff] }
  0x58   :  { %v248_v52 = vadd.f32 %v247_v34, %v2905_v16  ;;  %5576 = vst [vmem:[#allocation30_spill] sm:$0xff] %v2925_v3  ;;  %v2937_v34 = vld [vmem:[%s5410_s0 + $0x240] sm:$0xff]  ;;  %v255_v16 = vsel %vm110_vm0, %v2920_v59, 0.0  ;;  %v2959_v59 = vld [vmem:[%s5410_s0 + $0x278] sm:$0xff] }
  0x59   :  { %5578 = vst [vmem:[#allocation32_spill] sm:$0xff] %v2937_v34  ;;  %v256_v28 = vadd.f32 %v255_v16, %v2937_v34  ;;  %v2969_v16 = vld [vmem:[%s5410_s0 + $0x290] sm:$0xff] }
  0x5a   :  { %5581 = vst [vmem:[#allocation35_spill] sm:$0xff] %v2959_v59 }
  0x5b   :  { %5583 = vst [vmem:[#allocation37_spill] sm:$0xff] %v2969_v16 }
  0x5d   :  { %253 = vadd.xlane.f32.xlu2 %v252_v56  ;;  %v264_v56 = vadd.f32 %v263_v40, %v2930_v35  ;;  %v275_v40 = vsel %vm110_vm0, %v2954_v42, 0.0  ;;  %v2993_v35 = vld [vmem:[%s5410_s0 + $0x2c8] sm:$0xff] }
  0x5e   :  { %245 = vadd.xlane.f32.xlu0 %v244_v8  ;;  %v2944_v8 = vld [vmem:[%s5410_s0 + $0x250] sm:$0xff]  ;;  %5586 = vst [vmem:[#allocation40_spill] sm:$0xff] %v2993_v35 }
  0x5f   :  { %249 = vadd.xlane.f32.xlu1 %v248_v52  ;;  %5579 = vst [vmem:[#allocation33_spill] sm:$0xff] %v2944_v8  ;;  %v259_v52 = vsel %vm110_vm0, %v2925_v3, 0.0  ;;  %v2964_v3 = vld [vmem:[%s5410_s0 + $0x288] sm:$0xff] }
  0x60   :  { %v260_v58 = vadd.f32 %v259_v52, %v2944_v8  ;;  %5582 = vst [vmem:[#allocation36_spill] sm:$0xff] %v2964_v3  ;;  %v2976_v52 = vld [vmem:[%s5410_s0 + $0x270] sm:$0xff]  ;;  %v267_v8 = vsel %vm110_vm0, %v2959_v59, 0.0  ;;  %v2998_v59 = vld [vmem:[%s5410_s0 + $0x2a8] sm:$0xff] }
  0x61   :  { %5584 = vst [vmem:[#allocation38_spill] sm:$0xff] %v2976_v52  ;;  %v268_v42 = vadd.f32 %v267_v8, %v2976_v52  ;;  %v3008_v8 = vld [vmem:[%s5410_s0 + $0x2c0] sm:$0xff] }
  0x62   :  { %5587 = vst [vmem:[#allocation41_spill] sm:$0xff] %v2998_v59 }
  0x63   :  { %5589 = vst [vmem:[#allocation43_spill] sm:$0xff] %v3008_v8 }
  0x65   :  { %265 = vadd.xlane.f32.xlu2 %v264_v56  ;;  %v276_v56 = vadd.f32 %v275_v40, %v2969_v16  ;;  %v287_v40 = vsel %vm110_vm0, %v2993_v35, 0.0  ;;  %v3032_v16 = vld [vmem:[%s5410_s0 + $0x2f8] sm:$0xff] }
  0x66   :  { %257 = vadd.xlane.f32.xlu0 %v256_v28  ;;  %v2983_v28 = vld [vmem:[%s5410_s0 + $0x280] sm:$0xff]  ;;  %5592 = vst [vmem:[#allocation46_spill] sm:$0xff] %v3032_v16 }
  0x67   :  { %261 = vadd.xlane.f32.xlu1 %v260_v58  ;;  %5585 = vst [vmem:[#allocation39_spill] sm:$0xff] %v2983_v28  ;;  %v271_v58 = vsel %vm110_vm0, %v2964_v3, 0.0  ;;  %v3003_v3 = vld [vmem:[%s5410_s0 + $0x2b8] sm:$0xff] }
  0x68   :  { %v272_v34 = vadd.f32 %v271_v58, %v2983_v28  ;;  %5588 = vst [vmem:[#allocation42_spill] sm:$0xff] %v3003_v3  ;;  %v3015_v58 = vld [vmem:[%s5410_s0 + $0x2a0] sm:$0xff]  ;;  %v279_v28 = vsel %vm110_vm0, %v2998_v59, 0.0  ;;  %v3037_v59 = vld [vmem:[%s5410_s0 + $0x2d8] sm:$0xff] }
  0x69   :  { %5590 = vst [vmem:[#allocation44_spill] sm:$0xff] %v3015_v58  ;;  %v280_v35 = vadd.f32 %v279_v28, %v3015_v58  ;;  %v3047_v28 = vld [vmem:[%s5410_s0 + $0x2f0] sm:$0xff] }
  0x6a   :  { %5593 = vst [vmem:[#allocation47_spill] sm:$0xff] %v3037_v59 }
  0x6d   :  { %277 = vadd.xlane.f32.xlu2 %v276_v56  ;;  %v288_v56 = vadd.f32 %v287_v40, %v3008_v8  ;;  %v299_v40 = vsel %vm110_vm0, %v3032_v16, 0.0 }
  0x6e   :  { %269 = vadd.xlane.f32.xlu0 %v268_v42  ;;  %v3022_v42 = vld [vmem:[%s5410_s0 + $0x2b0] sm:$0xff]  ;;  %v300_v16 = vadd.f32 %v299_v40, %v3047_v28 }
  0x6f   :  { %273 = vadd.xlane.f32.xlu1 %v272_v34  ;;  %5591 = vst [vmem:[#allocation45_spill] sm:$0xff] %v3022_v42  ;;  %v283_v34 = vsel %vm110_vm0, %v3003_v3, 0.0  ;;  %v3042_v3 = vld [vmem:[%s5410_s0 + $0x2e8] sm:$0xff] }
  0x70   :  { %v284_v52 = vadd.f32 %v283_v34, %v3022_v42  ;;  %5594 = vst [vmem:[#allocation48_spill] sm:$0xff] %v3042_v3  ;;  %v3054_v34 = vld [vmem:[%s5410_s0 + $0x2d0] sm:$0xff]  ;;  %v291_v42 = vsel %vm110_vm0, %v3037_v59, 0.0 }
  0x71   :  { %v292_v11 = vadd.f32 %v291_v42, %v3054_v34 }
  0x75   :  { %289 = vadd.xlane.f32.xlu2 %v288_v56 }
  0x76   :  { %281 = vadd.xlane.f32.xlu0 %v280_v35  ;;  %v3061_v35 = vld [vmem:[%s5410_s0 + $0x2e0] sm:$0xff] }
  0x77   :  { %285 = vadd.xlane.f32.xlu1 %v284_v52  ;;  %v295_v52 = vsel %vm110_vm0, %v3042_v3, 0.0 }
  0x78   :  { %v130_v56 = vpop.xlane.xlu2 %129  ;;  %v296_v18 = vadd.f32 %v295_v52, %v3061_v35 }
  0x79   :  { %v114_v58 = vpop.xlane.xlu0 %113 }
  0x7a   :  { %v122_v8 = vpop.xlane.xlu1 %121  ;;  %v351_v12 = vmul.f32 0.0051020407, %v114_v58 }
  0x7b   :  { %v353_v32 = vmul.f32 0.0051020407, %v122_v8 }
  0x7c   :  { %v3069_v59 = vsub.f32 %v2457_v2, %v351_v12  ;;  %v3072_v57 = vsub.f32 %v2464_v4, %v351_v12 }
  0x7d   :  { %v3075_v46 = vsub.f32 %v2469_v5, %v353_v32  ;;  %v3078_v3 = vsub.f32 %v2474_v6, %v353_v32  ;;  %301 = vadd.xlane.f32.xlu2 %v300_v16  ;;  %v355_v6 = vmul.f32 0.0051020407, %v130_v56 }
  0x7e   :  { %5595 = vst [vmem:[#allocation49_spill] sm:$0xff] %v3069_v59  ;;  %293 = vadd.xlane.f32.xlu0 %v292_v11  ;;  %v495_v2 = vmul.f32 %v3069_v59, %v3069_v59  ;;  %v496_v4 = vmul.f32 %v3072_v57, %v3072_v57 }
  0x7f   :  { %5596 = vst [vmem:[#allocation50_spill] sm:$0xff] %v3072_v57  ;;  %297 = vadd.xlane.f32.xlu1 %v296_v18  ;;  %v499_v8 = vmul.f32 %v3075_v46, %v3075_v46  ;;  %v500_v58 = vmul.f32 %v3078_v3, %v3078_v3 }
  0x80   :  { %5597 = vst [vmem:[#allocation51_spill] sm:$0xff] %v3075_v46  ;;  %v134_v5 = vpop.xlane.xlu2 %133  ;;  %v591_v42 = vsel %vm110_vm0, %v496_v4, 0.0  ;;  %v3109_v4 = vsub.f32 %v2452_v1, %v355_v6 }
  0x81   :  { %5598 = vst [vmem:[#allocation52_spill] sm:$0xff] %v3078_v3  ;;  %v599_v12 = vsel %vm110_vm0, %v500_v58, 0.0  ;;  %v356_v32 = vmul.f32 0.0051020407, %v134_v5  ;;  %v118_v16 = vpop.xlane.xlu0 %117  ;;  %v592_v46 = vadd.f32 %v591_v42, %v495_v2 }
  0x82   :  { %v126_v11 = vpop.xlane.xlu1 %125  ;;  %v600_v18 = vadd.f32 %v599_v12, %v499_v8  ;;  %v352_v40 = vmul.f32 0.0051020407, %v118_v16 }
  0x83   :  { %v354_v52 = vmul.f32 0.0051020407, %v126_v11  ;;  %v3091_v3 = vsub.f32 %v2501_v15, %v356_v32  ;;  %v3094_v59 = vsub.f32 %v2484_v10, %v356_v32 }
  0x84   :  { %v3097_v57 = vsub.f32 %v2508_v17, %v352_v40  ;;  %v3100_v56 = vsub.f32 %v2491_v13, %v352_v40 }
  0x85   :  { %v3103_v58 = vsub.f32 %v2515_v19, %v354_v52  ;;  %v3106_v8 = vsub.f32 %v2496_v14, %v354_v52  ;;  %601 = vadd.xlane.f32.xlu2 %v600_v18  ;;  %v505_v10 = vmul.f32 %v3091_v3, %v3091_v3  ;;  %v506_v15 = vmul.f32 %v3094_v59, %v3094_v59 }
  0x86   :  { %593 = vadd.xlane.f32.xlu0 %v592_v46  ;;  %v497_v13 = vmul.f32 %v3097_v57, %v3097_v57  ;;  %v498_v17 = vmul.f32 %v3100_v56, %v3100_v56  ;;  %v3127_v46 = vsub.f32 %v2447_v0, %v355_v6 }
  0x87   :  { %5599 = vst [vmem:[#allocation53_spill] sm:$0xff] %v3103_v58  ;;  %v501_v14 = vmul.f32 %v3103_v58, %v3103_v58  ;;  %v502_v1 = vmul.f32 %v3106_v8, %v3106_v8  ;;  %v611_v19 = vsel %vm110_vm0, %v506_v15, 0.0 }
  0x88   :  { %5600 = vst [vmem:[#allocation54_spill] sm:$0xff] %v3106_v8  ;;  %v146_v2 = vpop.xlane.xlu2 %145  ;;  %v595_v5 = vsel %vm110_vm0, %v498_v17, 0.0  ;;  %v612_v42 = vadd.f32 %v611_v19, %v505_v10  ;;  %v504_v8 = vmul.f32 %v3109_v4, %v3109_v4  ;;  %v503_v10 = vmul.f32 %v3127_v46, %v3127_v46 }
  0x89   :  { %v603_v12 = vsel %vm110_vm0, %v502_v1, 0.0  ;;  %v359_v32 = vmul.f32 0.0051020407, %v146_v2  ;;  %v138_v16 = vpop.xlane.xlu0 %137  ;;  %v596_v11 = vadd.f32 %v595_v5, %v497_v13 }
  0x8a   :  { %v142_v18 = vpop.xlane.xlu1 %141  ;;  %v357_v40 = vmul.f32 0.0051020407, %v138_v16  ;;  %v604_v58 = vadd.f32 %v603_v12, %v501_v14 }
  0x8b   :  { %v358_v52 = vmul.f32 0.0051020407, %v142_v18  ;;  %v3132_v15 = vsub.f32 %v2540_v27, %v359_v32  ;;  %v3135_v17 = vsub.f32 %v2525_v24, %v359_v32  ;;  %597 = vadd.xlane.f32.xlu1 %v596_v11 }
  0x8c   :  { %v3138_v0 = vsub.f32 %v2547_v29, %v357_v40  ;;  %v3141_v6 = vsub.f32 %v2530_v25, %v357_v40  ;;  %v607_v29 = vsel %vm110_vm0, %v504_v8, 0.0 }
  0x8d   :  { %613 = vadd.xlane.f32.xlu2 %v612_v42  ;;  %v511_v13 = vmul.f32 %v3132_v15, %v3132_v15  ;;  %v512_v27 = vmul.f32 %v3135_v17, %v3135_v17  ;;  %v3150_v24 = vsub.f32 %v2535_v26, %v358_v52  ;;  %v3160_v5 = vsub.f32 %v2554_v31, %v358_v52 }
  0x8e   :  { %605 = vadd.xlane.f32.xlu0 %v604_v58  ;;  %v507_v25 = vmul.f32 %v3138_v0, %v3138_v0  ;;  %v508_v14 = vmul.f32 %v3141_v6, %v3141_v6  ;;  %v608_v32 = vadd.f32 %v607_v29, %v503_v10 }
  0x8f   :  { %v623_v1 = vsel %vm110_vm0, %v512_v27, 0.0  ;;  %v510_v42 = vmul.f32 %v3150_v24, %v3150_v24  ;;  %v509_v10 = vmul.f32 %v3160_v5, %v3160_v5 }
  0x90   :  { %v158_v19 = vpop.xlane.xlu2 %157  ;;  %v615_v2 = vsel %vm110_vm0, %v508_v14, 0.0  ;;  %v624_v16 = vadd.f32 %v623_v1, %v511_v13 }
  0x91   :  { %v362_v12 = vmul.f32 0.0051020407, %v158_v19  ;;  %v150_v26 = vpop.xlane.xlu0 %149  ;;  %v616_v18 = vadd.f32 %v615_v2, %v507_v25 }
  0x92   :  { %v154_v58 = vpop.xlane.xlu1 %153  ;;  %v360_v8 = vmul.f32 0.0051020407, %v150_v26 }
  0x93   :  { %v361_v11 = vmul.f32 0.0051020407, %v154_v58  ;;  %v3165_v40 = vsub.f32 %v2579_v39, %v362_v12  ;;  %v3168_v27 = vsub.f32 %v2564_v36, %v362_v12  ;;  %609 = vadd.xlane.f32.xlu1 %v608_v32 }
  0x94   :  { %v3171_v31 = vsub.f32 %v2586_v41, %v360_v8  ;;  %v3174_v52 = vsub.f32 %v2569_v37, %v360_v8  ;;  %v619_v41 = vsel %vm110_vm0, %v510_v42, 0.0 }
  0x95   :  { %625 = vadd.xlane.f32.xlu2 %v624_v16  ;;  %v517_v13 = vmul.f32 %v3165_v40, %v3165_v40  ;;  %v518_v39 = vmul.f32 %v3168_v27, %v3168_v27  ;;  %v3183_v36 = vsub.f32 %v2574_v38, %v361_v11  ;;  %v3193_v19 = vsub.f32 %v2593_v43, %v361_v11 }
  0x96   :  { %5601 = vst [vmem:[#allocation55_spill] sm:$0xff] %v3171_v31  ;;  %617 = vadd.xlane.f32.xlu0 %v616_v18  ;;  %v513_v37 = vmul.f32 %v3171_v31, %v3171_v31  ;;  %v514_v29 = vmul.f32 %v3174_v52, %v3174_v52  ;;  %v620_v12 = vadd.f32 %v619_v41, %v509_v10 }
  0x97   :  { %5602 = vst [vmem:[#allocation56_spill] sm:$0xff] %v3174_v52  ;;  %v635_v25 = vsel %vm110_vm0, %v518_v39, 0.0  ;;  %v516_v18 = vmul.f32 %v3183_v36, %v3183_v36  ;;  %v515_v10 = vmul.f32 %v3193_v19, %v3193_v19 }
  0x98   :  { %v170_v14 = vpop.xlane.xlu2 %169  ;;  %v627_v1 = vsel %vm110_vm0, %v514_v29, 0.0  ;;  %v636_v32 = vadd.f32 %v635_v25, %v517_v13 }
  0x99   :  { %v365_v2 = vmul.f32 0.0051020407, %v170_v14  ;;  %v162_v38 = vpop.xlane.xlu0 %161  ;;  %v628_v8 = vadd.f32 %v627_v1, %v513_v37 }
  0x9a   :  { %v166_v26 = vpop.xlane.xlu1 %165  ;;  %v363_v58 = vmul.f32 0.0051020407, %v162_v38 }
  0x9b   :  { %v364_v16 = vmul.f32 0.0051020407, %v166_v26  ;;  %v3198_v42 = vsub.f32 %v2618_v51, %v365_v2  ;;  %v3201_v39 = vsub.f32 %v2603_v48, %v365_v2  ;;  %621 = vadd.xlane.f32.xlu1 %v620_v12 }
  0x9c   :  { %v3204_v43 = vsub.f32 %v2625_v53, %v363_v58  ;;  %v3207_v11 = vsub.f32 %v2608_v49, %v363_v58  ;;  %v631_v53 = vsel %vm110_vm0, %v516_v18, 0.0 }
  0x9d   :  { %637 = vadd.xlane.f32.xlu2 %v636_v32  ;;  %v523_v13 = vmul.f32 %v3198_v42, %v3198_v42  ;;  %v524_v51 = vmul.f32 %v3201_v39, %v3201_v39  ;;  %v3216_v48 = vsub.f32 %v2613_v50, %v364_v16  ;;  %v3226_v14 = vsub.f32 %v2632_v55, %v364_v16 }
  0x9e   :  { %5603 = vst [vmem:[#allocation57_spill] sm:$0xff] %v3204_v43  ;;  %629 = vadd.xlane.f32.xlu0 %v628_v8  ;;  %v519_v49 = vmul.f32 %v3204_v43, %v3204_v43  ;;  %v520_v41 = vmul.f32 %v3207_v11, %v3207_v11  ;;  %v632_v2 = vadd.f32 %v631_v53, %v515_v10 }
  0x9f   :  { %5604 = vst [vmem:[#allocation58_spill] sm:$0xff] %v3207_v11  ;;  %v647_v37 = vsel %vm110_vm0, %v524_v51, 0.0  ;;  %v522_v8 = vmul.f32 %v3216_v48, %v3216_v48  ;;  %v521_v10 = vmul.f32 %v3226_v14, %v3226_v14 }
  0xa0   :  { %5605 = vst [vmem:[#allocation59_spill] sm:$0xff] %v3216_v48  ;;  %v182_v29 = vpop.xlane.xlu2 %181  ;;  %v639_v25 = vsel %vm110_vm0, %v520_v41, 0.0  ;;  %v648_v12 = vadd.f32 %v647_v37, %v523_v13 }
  0xa1   :  { %5606 = vst [vmem:[#allocation60_spill] sm:$0xff] %v3226_v14  ;;  %v368_v1 = vmul.f32 0.0051020407, %v182_v29  ;;  %v174_v50 = vpop.xlane.xlu0 %173  ;;  %v640_v58 = vadd.f32 %v639_v25, %v519_v49 }
  0xa2   :  { %v178_v38 = vpop.xlane.xlu1 %177  ;;  %v366_v26 = vmul.f32 0.0051020407, %v174_v50 }
  0xa3   :  { %v367_v32 = vmul.f32 0.0051020407, %v178_v38  ;;  %v3231_v18 = vsub.f32 %v2657_v63, %v368_v1  ;;  %v3234_v51 = vsub.f32 %v2642_v60, %v368_v1  ;;  %633 = vadd.xlane.f32.xlu1 %v632_v2 }
  0xa4   :  { %v3237_v55 = vsub.f32 %v2664_v7, %v366_v26  ;;  %v3240_v16 = vsub.f32 %v2647_v61, %v366_v26  ;;  %v643_v7 = vsel %vm110_vm0, %v522_v8, 0.0 }
  0xa5   :  { %5607 = vst [vmem:[#allocation61_spill] sm:$0xff] %v3234_v51  ;;  %649 = vadd.xlane.f32.xlu2 %v648_v12  ;;  %v529_v13 = vmul.f32 %v3231_v18, %v3231_v18  ;;  %v530_v63 = vmul.f32 %v3234_v51, %v3234_v51  ;;  %v3249_v60 = vsub.f32 %v2652_v62, %v367_v32 }
  0xa6   :  { %5608 = vst [vmem:[#allocation62_spill] sm:$0xff] %v3237_v55  ;;  %641 = vadd.xlane.f32.xlu0 %v640_v58  ;;  %v525_v61 = vmul.f32 %v3237_v55, %v3237_v55  ;;  %v526_v53 = vmul.f32 %v3240_v16, %v3240_v16  ;;  %v3259_v29 = vsub.f32 %v2671_v9, %v367_v32 }
  0xa7   :  { %5609 = vst [vmem:[#allocation63_spill] sm:$0xff] %v3240_v16  ;;  %v659_v49 = vsel %vm110_vm0, %v530_v63, 0.0  ;;  %v644_v1 = vadd.f32 %v643_v7, %v521_v10  ;;  %v528_v58 = vmul.f32 %v3249_v60, %v3249_v60 }
  0xa8   :  { %5610 = vst [vmem:[#allocation64_spill] sm:$0xff] %v3249_v60  ;;  %v194_v41 = vpop.xlane.xlu2 %193  ;;  %v651_v37 = vsel %vm110_vm0, %v526_v53, 0.0  ;;  %v660_v2 = vadd.f32 %v659_v49, %v529_v13  ;;  %v527_v10 = vmul.f32 %v3259_v29, %v3259_v29 }
  0xa9   :  { %5611 = vst [vmem:[#allocation65_spill] sm:$0xff] %v3259_v29  ;;  %v371_v25 = vmul.f32 0.0051020407, %v194_v41  ;;  %v186_v62 = vpop.xlane.xlu0 %185  ;;  %v652_v26 = vadd.f32 %v651_v37, %v525_v61 }
  0xaa   :  { %v190_v50 = vpop.xlane.xlu1 %189  ;;  %v369_v38 = vmul.f32 0.0051020407, %v186_v62 }
  0xab   :  { %v370_v12 = vmul.f32 0.0051020407, %v190_v50  ;;  %v3264_v8 = vsub.f32 %v2696_v23, %v371_v25  ;;  %v3267_v63 = vsub.f32 %v2681_v20, %v371_v25  ;;  %645 = vadd.xlane.f32.xlu1 %v644_v1 }
  0xac   :  { %v3270_v9 = vsub.f32 %v2703_v30, %v369_v38  ;;  %v3273_v32 = vsub.f32 %v2686_v21, %v369_v38  ;;  %v655_v30 = vsel %vm110_vm0, %v528_v58, 0.0 }
  0xad   :  { %5612 = vst [vmem:[#allocation66_spill] sm:$0xff] %v3264_v8  ;;  %661 = vadd.xlane.f32.xlu2 %v660_v2  ;;  %v535_v13 = vmul.f32 %v3264_v8, %v3264_v8  ;;  %v536_v23 = vmul.f32 %v3267_v63, %v3267_v63  ;;  %v3282_v20 = vsub.f32 %v2691_v22, %v370_v12 }
  0xae   :  { %5613 = vst [vmem:[#allocation67_spill] sm:$0xff] %v3267_v63  ;;  %653 = vadd.xlane.f32.xlu0 %v652_v26  ;;  %v531_v21 = vmul.f32 %v3270_v9, %v3270_v9  ;;  %v532_v7 = vmul.f32 %v3273_v32, %v3273_v32  ;;  %v3292_v41 = vsub.f32 %v2710_v33, %v370_v12 }
  0xaf   :  { %5614 = vst [vmem:[#allocation68_spill] sm:$0xff] %v3270_v9  ;;  %v671_v61 = vsel %vm110_vm0, %v536_v23, 0.0  ;;  %v656_v25 = vadd.f32 %v655_v30, %v527_v10  ;;  %v534_v26 = vmul.f32 %v3282_v20, %v3282_v20  ;;  %v5622_v30 = vld [vmem:[#allocation2_spill] sm:$0xff] }
  0xb0   :  { %5615 = vst [vmem:[#allocation69_spill] sm:$0xff] %v3273_v32  ;;  %v206_v53 = vpop.xlane.xlu2 %205  ;;  %v663_v49 = vsel %vm110_vm0, %v532_v7, 0.0  ;;  %v672_v1 = vadd.f32 %v671_v61, %v535_v13  ;;  %v533_v10 = vmul.f32 %v3292_v41, %v3292_v41 }
  0xb1   :  { %5616 = vst [vmem:[#allocation70_spill] sm:$0xff] %v3282_v20  ;;  %v374_v37 = vmul.f32 0.0051020407, %v206_v53  ;;  %v198_v22 = vpop.xlane.xlu0 %197  ;;  %v664_v38 = vadd.f32 %v663_v49, %v531_v21  ;;  %v5624_v49 = vld [vmem:[#allocation3_spill] sm:$0xff] }
  0xb2   :  { %5617 = vst [vmem:[#allocation71_spill] sm:$0xff] %v3292_v41  ;;  %v202_v62 = vpop.xlane.xlu1 %201  ;;  %v372_v50 = vmul.f32 0.0051020407, %v198_v22 }
  0xb3   :  { %v373_v2 = vmul.f32 0.0051020407, %v202_v62  ;;  %v3297_v58 = vsub.f32 %v2735_v47, %v374_v37  ;;  %v3300_v23 = vsub.f32 %v2720_v44, %v374_v37  ;;  %657 = vadd.xlane.f32.xlu1 %v656_v25 }
  0xb4   :  { %v3303_v33 = vsub.f32 %v2742_v54, %v372_v50  ;;  %v3306_v12 = vsub.f32 %v2725_v45, %v372_v50  ;;  %v667_v54 = vsel %vm110_vm0, %v534_v26, 0.0 }
  0xb5   :  { %5618 = vst [vmem:[#allocation72_spill] sm:$0xff] %v3297_v58  ;;  %673 = vadd.xlane.f32.xlu2 %v672_v1  ;;  %v541_v13 = vmul.f32 %v3297_v58, %v3297_v58  ;;  %v542_v47 = vmul.f32 %v3300_v23, %v3300_v23  ;;  %v3315_v44 = vsub.f32 %v5622_v30, %v373_v2 }
  0xb6   :  { %5619 = vst [vmem:[#allocation73_spill] sm:$0xff] %v3300_v23  ;;  %665 = vadd.xlane.f32.xlu0 %v664_v38  ;;  %v537_v45 = vmul.f32 %v3303_v33, %v3303_v33  ;;  %v538_v21 = vmul.f32 %v3306_v12, %v3306_v12  ;;  %v3325_v37 = vsub.f32 %v5624_v49, %v373_v2  ;;  %v5630_v2 = vld [vmem:[#allocation8_spill] sm:$0xff] }
  0xb7   :  { %5620 = vst [vmem:[#allocation74_spill] sm:$0xff] %v3303_v33  ;;  %v683_v7 = vsel %vm110_vm0, %v542_v47, 0.0  ;;  %v668_v62 = vadd.f32 %v667_v54, %v533_v10  ;;  %v540_v33 = vmul.f32 %v3315_v44, %v3315_v44  ;;  %v5628_v47 = vld [vmem:[#allocation4_spill] sm:$0xff] }
  0xb8   :  { %5621 = vst [vmem:[#allocation75_spill] sm:$0xff] %v3306_v12  ;;  %v218_v61 = vpop.xlane.xlu2 %217  ;;  %v675_v53 = vsel %vm110_vm0, %v538_v21, 0.0  ;;  %v684_v50 = vadd.f32 %v683_v7, %v541_v13  ;;  %v5626_v12 = vld [vmem:[#allocation7_spill] sm:$0xff]  ;;  %v539_v13 = vmul.f32 %v3325_v37, %v3325_v37 }
  0xb9   :  { %5623 = vst [vmem:[#allocation2_spill] sm:$0xff] %v3315_v44  ;;  %v377_v22 = vmul.f32 0.0051020407, %v218_v61  ;;  %v210_v25 = vpop.xlane.xlu0 %209  ;;  %v676_v30 = vadd.f32 %v675_v53, %v537_v45  ;;  %v5632_v61 = vld [vmem:[#allocation5_spill] sm:$0xff]  ;;  %v5634_v45 = vld [vmem:[#allocation6_spill] sm:$0xff]  ;;  %v679_v53 = vsel %vm110_vm0, %v540_v33, 0.0 }
  0xba   :  { %5625 = vst [vmem:[#allocation3_spill] sm:$0xff] %v3325_v37  ;;  %v214_v1 = vpop.xlane.xlu1 %213  ;;  %v375_v38 = vmul.f32 0.0051020407, %v210_v25 }
  0xbb   :  { %v376_v26 = vmul.f32 0.0051020407, %v214_v1  ;;  %v3330_v32 = vsub.f32 %v5626_v12, %v377_v22  ;;  %v3333_v9 = vsub.f32 %v5628_v47, %v377_v22  ;;  %669 = vadd.xlane.f32.xlu1 %v668_v62 }
  0xbc   :  { %v3336_v21 = vsub.f32 %v5630_v2, %v375_v38  ;;  %v3339_v10 = vsub.f32 %v5632_v61, %v375_v38  ;;  %v680_v61 = vadd.f32 %v679_v53, %v539_v13 }
  0xbd   :  { %5627 = vst [vmem:[#allocation7_spill] sm:$0xff] %v3330_v32  ;;  %685 = vadd.xlane.f32.xlu2 %v684_v50  ;;  %v547_v54 = vmul.f32 %v3330_v32, %v3330_v32  ;;  %v548_v12 = vmul.f32 %v3333_v9, %v3333_v9  ;;  %v3348_v7 = vsub.f32 %v5634_v45, %v376_v26  ;;  %v5636_v50 = vld [vmem:[#allocation9_spill] sm:$0xff] }
  0xbe   :  { %5629 = vst [vmem:[#allocation4_spill] sm:$0xff] %v3333_v9  ;;  %677 = vadd.xlane.f32.xlu0 %v676_v30  ;;  %v543_v49 = vmul.f32 %v3336_v21, %v3336_v21  ;;  %v544_v22 = vmul.f32 %v3339_v10, %v3339_v10  ;;  %v3358_v38 = vsub.f32 %v5636_v50, %v376_v26  ;;  %v5642_v26 = vld [vmem:[#allocation14_spill] sm:$0xff] }
  0xbf   :  { %5631 = vst [vmem:[#allocation8_spill] sm:$0xff] %v3336_v21  ;;  %v695_v25 = vsel %vm110_vm0, %v548_v12, 0.0  ;;  %v546_v21 = vmul.f32 %v3348_v7, %v3348_v7  ;;  %v5640_v12 = vld [vmem:[#allocation10_spill] sm:$0xff] }
  0xc0   :  { %5633 = vst [vmem:[#allocation5_spill] sm:$0xff] %v3339_v10  ;;  %v230_v62 = vpop.xlane.xlu2 %229  ;;  %v687_v1 = vsel %vm110_vm0, %v544_v22, 0.0  ;;  %v696_v45 = vadd.f32 %v695_v25, %v547_v54  ;;  %v5638_v10 = vld [vmem:[#allocation13_spill] sm:$0xff]  ;;  %v545_v54 = vmul.f32 %v3358_v38, %v3358_v38 }
  0xc1   :  { %5635 = vst [vmem:[#allocation6_spill] sm:$0xff] %v3348_v7  ;;  %v380_v47 = vmul.f32 0.0051020407, %v230_v62  ;;  %v222_v2 = vpop.xlane.xlu0 %221  ;;  %v688_v37 = vadd.f32 %v687_v1, %v543_v49  ;;  %v5644_v62 = vld [vmem:[#allocation11_spill] sm:$0xff]  ;;  %v5646_v49 = vld [vmem:[#allocation12_spill] sm:$0xff]  ;;  %v691_v1 = vsel %vm110_vm0, %v546_v21, 0.0 }
  0xc2   :  { %5637 = vst [vmem:[#allocation9_spill] sm:$0xff] %v3358_v38  ;;  %v226_v30 = vpop.xlane.xlu1 %225  ;;  %v378_v33 = vmul.f32 0.0051020407, %v222_v2 }
  0xc3   :  { %v379_v44 = vmul.f32 0.0051020407, %v226_v30  ;;  %v3363_v9 = vsub.f32 %v5638_v10, %v380_v47  ;;  %v3366_v20 = vsub.f32 %v5640_v12, %v380_v47  ;;  %681 = vadd.xlane.f32.xlu1 %v680_v61 }
  0xc4   :  { %v3369_v22 = vsub.f32 %v5642_v26, %v378_v33  ;;  %v3372_v13 = vsub.f32 %v5644_v62, %v378_v33  ;;  %v692_v62 = vadd.f32 %v691_v1, %v545_v54 }
  0xc5   :  { %5639 = vst [vmem:[#allocation13_spill] sm:$0xff] %v3363_v9  ;;  %697 = vadd.xlane.f32.xlu2 %v696_v45  ;;  %v553_v53 = vmul.f32 %v3363_v9, %v3363_v9  ;;  %v554_v10 = vmul.f32 %v3366_v20, %v3366_v20  ;;  %v3381_v25 = vsub.f32 %v5646_v49, %v379_v44  ;;  %v5648_v45 = vld [vmem:[#allocation15_spill] sm:$0xff] }
  0xc6   :  { %5641 = vst [vmem:[#allocation10_spill] sm:$0xff] %v3366_v20  ;;  %689 = vadd.xlane.f32.xlu0 %v688_v37  ;;  %v549_v50 = vmul.f32 %v3369_v22, %v3369_v22  ;;  %v550_v47 = vmul.f32 %v3372_v13, %v3372_v13  ;;  %v3391_v33 = vsub.f32 %v5648_v45, %v379_v44  ;;  %v5654_v44 = vld [vmem:[#allocation20_spill] sm:$0xff] }
  0xc7   :  { %5643 = vst [vmem:[#allocation14_spill] sm:$0xff] %v3369_v22  ;;  %v707_v2 = vsel %vm110_vm0, %v554_v10, 0.0  ;;  %v552_v22 = vmul.f32 %v3381_v25, %v3381_v25  ;;  %v5652_v10 = vld [vmem:[#allocation16_spill] sm:$0xff] }
  0xc8   :  { %5645 = vst [vmem:[#allocation11_spill] sm:$0xff] %v3372_v13  ;;  %v242_v61 = vpop.xlane.xlu2 %241  ;;  %v699_v30 = vsel %vm110_vm0, %v550_v47, 0.0  ;;  %v708_v49 = vadd.f32 %v707_v2, %v553_v53  ;;  %v5650_v13 = vld [vmem:[#allocation19_spill] sm:$0xff]  ;;  %v551_v53 = vmul.f32 %v3391_v33, %v3391_v33 }
  0xc9   :  { %5647 = vst [vmem:[#allocation12_spill] sm:$0xff] %v3381_v25  ;;  %v383_v12 = vmul.f32 0.0051020407, %v242_v61  ;;  %v234_v26 = vpop.xlane.xlu0 %233  ;;  %v700_v38 = vadd.f32 %v699_v30, %v549_v50  ;;  %v5656_v61 = vld [vmem:[#allocation17_spill] sm:$0xff]  ;;  %v5658_v50 = vld [vmem:[#allocation18_spill] sm:$0xff]  ;;  %v703_v30 = vsel %vm110_vm0, %v552_v22, 0.0 }
  0xca   :  { %5649 = vst [vmem:[#allocation15_spill] sm:$0xff] %v3391_v33  ;;  %v238_v37 = vpop.xlane.xlu1 %237  ;;  %v381_v21 = vmul.f32 0.0051020407, %v234_v26 }
  0xcb   :  { %v382_v7 = vmul.f32 0.0051020407, %v238_v37  ;;  %v3396_v20 = vsub.f32 %v5650_v13, %v383_v12  ;;  %v3399_v9 = vsub.f32 %v5652_v10, %v383_v12  ;;  %693 = vadd.xlane.f32.xlu1 %v692_v62 }
  0xcc   :  { %v3402_v47 = vsub.f32 %v5654_v44, %v381_v21  ;;  %v3405_v54 = vsub.f32 %v5656_v61, %v381_v21  ;;  %v704_v61 = vadd.f32 %v703_v30, %v551_v53 }
  0xcd   :  { %5651 = vst [vmem:[#allocation19_spill] sm:$0xff] %v3396_v20  ;;  %709 = vadd.xlane.f32.xlu2 %v708_v49  ;;  %v559_v1 = vmul.f32 %v3396_v20, %v3396_v20  ;;  %v560_v13 = vmul.f32 %v3399_v9, %v3399_v9  ;;  %v3414_v2 = vsub.f32 %v5658_v50, %v382_v7  ;;  %v5660_v49 = vld [vmem:[#allocation21_spill] sm:$0xff] }
  0xce   :  { %5653 = vst [vmem:[#allocation16_spill] sm:$0xff] %v3399_v9  ;;  %701 = vadd.xlane.f32.xlu0 %v700_v38  ;;  %v555_v45 = vmul.f32 %v3402_v47, %v3402_v47  ;;  %v556_v12 = vmul.f32 %v3405_v54, %v3405_v54  ;;  %v3424_v21 = vsub.f32 %v5660_v49, %v382_v7  ;;  %v5666_v7 = vld [vmem:[#allocation26_spill] sm:$0xff] }
  0xcf   :  { %5655 = vst [vmem:[#allocation20_spill] sm:$0xff] %v3402_v47  ;;  %v719_v26 = vsel %vm110_vm0, %v560_v13, 0.0  ;;  %v558_v47 = vmul.f32 %v3414_v2, %v3414_v2  ;;  %v5664_v13 = vld [vmem:[#allocation22_spill] sm:$0xff] }
  0xd0   :  { %5657 = vst [vmem:[#allocation17_spill] sm:$0xff] %v3405_v54  ;;  %v254_v62 = vpop.xlane.xlu2 %253  ;;  %v711_v37 = vsel %vm110_vm0, %v556_v12, 0.0  ;;  %v720_v50 = vadd.f32 %v719_v26, %v559_v1  ;;  %v5662_v54 = vld [vmem:[#allocation25_spill] sm:$0xff]  ;;  %v557_v1 = vmul.f32 %v3424_v21, %v3424_v21 }
  0xd1   :  { %5659 = vst [vmem:[#allocation18_spill] sm:$0xff] %v3414_v2  ;;  %v386_v10 = vmul.f32 0.0051020407, %v254_v62  ;;  %v246_v44 = vpop.xlane.xlu0 %245  ;;  %v712_v33 = vadd.f32 %v711_v37, %v555_v45  ;;  %v5668_v62 = vld [vmem:[#allocation23_spill] sm:$0xff]  ;;  %v5670_v45 = vld [vmem:[#allocation24_spill] sm:$0xff]  ;;  %v715_v37 = vsel %vm110_vm0, %v558_v47, 0.0 }
  0xd2   :  { %5661 = vst [vmem:[#allocation21_spill] sm:$0xff] %v3424_v21  ;;  %v250_v38 = vpop.xlane.xlu1 %249  ;;  %v384_v22 = vmul.f32 0.0051020407, %v246_v44 }
  0xd3   :  { %v385_v25 = vmul.f32 0.0051020407, %v250_v38  ;;  %v3429_v9 = vsub.f32 %v5662_v54, %v386_v10  ;;  %v3432_v20 = vsub.f32 %v5664_v13, %v386_v10  ;;  %705 = vadd.xlane.f32.xlu1 %v704_v61 }
  0xd4   :  { %v3435_v12 = vsub.f32 %v5666_v7, %v384_v22  ;;  %v3438_v53 = vsub.f32 %v5668_v62, %v384_v22  ;;  %v716_v62 = vadd.f32 %v715_v37, %v557_v1 }
  0xd5   :  { %5663 = vst [vmem:[#allocation25_spill] sm:$0xff] %v3429_v9  ;;  %721 = vadd.xlane.f32.xlu2 %v720_v50  ;;  %v565_v30 = vmul.f32 %v3429_v9, %v3429_v9  ;;  %v566_v54 = vmul.f32 %v3432_v20, %v3432_v20  ;;  %v3447_v26 = vsub.f32 %v5670_v45, %v385_v25  ;;  %v5672_v50 = vld [vmem:[#allocation27_spill] sm:$0xff] }
  0xd6   :  { %5665 = vst [vmem:[#allocation22_spill] sm:$0xff] %v3432_v20  ;;  %713 = vadd.xlane.f32.xlu0 %v712_v33  ;;  %v561_v49 = vmul.f32 %v3435_v12, %v3435_v12  ;;  %v562_v10 = vmul.f32 %v3438_v53, %v3438_v53  ;;  %v3457_v22 = vsub.f32 %v5672_v50, %v385_v25  ;;  %v5678_v25 = vld [vmem:[#allocation32_spill] sm:$0xff] }
  0xd7   :  { %5667 = vst [vmem:[#allocation26_spill] sm:$0xff] %v3435_v12  ;;  %v731_v44 = vsel %vm110_vm0, %v566_v54, 0.0  ;;  %v564_v12 = vmul.f32 %v3447_v26, %v3447_v26  ;;  %v5676_v54 = vld [vmem:[#allocation28_spill] sm:$0xff] }
  0xd8   :  { %5669 = vst [vmem:[#allocation23_spill] sm:$0xff] %v3438_v53  ;;  %v266_v61 = vpop.xlane.xlu2 %265  ;;  %v723_v38 = vsel %vm110_vm0, %v562_v10, 0.0  ;;  %v732_v45 = vadd.f32 %v731_v44, %v565_v30  ;;  %v5674_v53 = vld [vmem:[#allocation31_spill] sm:$0xff]  ;;  %v563_v30 = vmul.f32 %v3457_v22, %v3457_v22 }
  0xd9   :  { %5671 = vst [vmem:[#allocation24_spill] sm:$0xff] %v3447_v26  ;;  %v389_v13 = vmul.f32 0.0051020407, %v266_v61  ;;  %v258_v7 = vpop.xlane.xlu0 %257  ;;  %v724_v21 = vadd.f32 %v723_v38, %v561_v49  ;;  %v5680_v61 = vld [vmem:[#allocation29_spill] sm:$0xff]  ;;  %v5682_v49 = vld [vmem:[#allocation30_spill] sm:$0xff]  ;;  %v727_v38 = vsel %vm110_vm0, %v564_v12, 0.0 }
  0xda   :  { %5673 = vst [vmem:[#allocation27_spill] sm:$0xff] %v3457_v22  ;;  %v262_v33 = vpop.xlane.xlu1 %261  ;;  %v387_v47 = vmul.f32 0.0051020407, %v258_v7 }
  0xdb   :  { %v388_v2 = vmul.f32 0.0051020407, %v262_v33  ;;  %v3462_v20 = vsub.f32 %v5674_v53, %v389_v13  ;;  %v3465_v9 = vsub.f32 %v5676_v54, %v389_v13  ;;  %717 = vadd.xlane.f32.xlu1 %v716_v62 }
  0xdc   :  { %v3468_v10 = vsub.f32 %v5678_v25, %v387_v47  ;;  %v3471_v1 = vsub.f32 %v5680_v61, %v387_v47  ;;  %v728_v61 = vadd.f32 %v727_v38, %v563_v30 }
  0xdd   :  { %5675 = vst [vmem:[#allocation31_spill] sm:$0xff] %v3462_v20  ;;  %733 = vadd.xlane.f32.xlu2 %v732_v45  ;;  %v571_v37 = vmul.f32 %v3462_v20, %v3462_v20  ;;  %v572_v53 = vmul.f32 %v3465_v9, %v3465_v9  ;;  %v3480_v44 = vsub.f32 %v5682_v49, %v388_v2  ;;  %v5684_v45 = vld [vmem:[#allocation33_spill] sm:$0xff] }
  0xde   :  { %5677 = vst [vmem:[#allocation28_spill] sm:$0xff] %v3465_v9  ;;  %725 = vadd.xlane.f32.xlu0 %v724_v21  ;;  %v567_v50 = vmul.f32 %v3468_v10, %v3468_v10  ;;  %v568_v13 = vmul.f32 %v3471_v1, %v3471_v1  ;;  %v3490_v47 = vsub.f32 %v5684_v45, %v388_v2  ;;  %v5690_v2 = vld [vmem:[#allocation38_spill] sm:$0xff] }
  0xdf   :  { %5679 = vst [vmem:[#allocation32_spill] sm:$0xff] %v3468_v10  ;;  %v743_v7 = vsel %vm110_vm0, %v572_v53, 0.0  ;;  %v570_v10 = vmul.f32 %v3480_v44, %v3480_v44  ;;  %v5688_v53 = vld [vmem:[#allocation34_spill] sm:$0xff] }
  0xe0   :  { %5681 = vst [vmem:[#allocation29_spill] sm:$0xff] %v3471_v1  ;;  %v278_v62 = vpop.xlane.xlu2 %277  ;;  %v735_v33 = vsel %vm110_vm0, %v568_v13, 0.0  ;;  %v744_v49 = vadd.f32 %v743_v7, %v571_v37  ;;  %v5686_v1 = vld [vmem:[#allocation37_spill] sm:$0xff]  ;;  %v5694_v37 = vld [vmem:[#allocation36_spill] sm:$0xff] }
  0xe1   :  { %5683 = vst [vmem:[#allocation30_spill] sm:$0xff] %v3480_v44  ;;  %v392_v54 = vmul.f32 0.0051020407, %v278_v62  ;;  %v270_v25 = vpop.xlane.xlu0 %269  ;;  %v736_v22 = vadd.f32 %v735_v33, %v567_v50  ;;  %v5692_v62 = vld [vmem:[#allocation35_spill] sm:$0xff]  ;;  %v569_v50 = vmul.f32 %v3490_v47, %v3490_v47  ;;  %v739_v33 = vsel %vm110_vm0, %v570_v10, 0.0 }
  0xe2   :  { %5685 = vst [vmem:[#allocation33_spill] sm:$0xff] %v3490_v47  ;;  %v274_v21 = vpop.xlane.xlu1 %273  ;;  %v390_v12 = vmul.f32 0.0051020407, %v270_v25 }
  0xe3   :  { %v391_v26 = vmul.f32 0.0051020407, %v274_v21  ;;  %v3495_v9 = vsub.f32 %v5686_v1, %v392_v54  ;;  %v3498_v20 = vsub.f32 %v5688_v53, %v392_v54  ;;  %729 = vadd.xlane.f32.xlu1 %v728_v61  ;;  %v5696_v61 = vld [vmem:[#allocation39_spill] sm:$0xff] }
  0xe4   :  { %v3501_v13 = vsub.f32 %v5690_v2, %v390_v12  ;;  %v3504_v30 = vsub.f32 %v5692_v62, %v390_v12  ;;  %v740_v62 = vadd.f32 %v739_v33, %v569_v50 }
  0xe5   :  { %5687 = vst [vmem:[#allocation37_spill] sm:$0xff] %v3495_v9  ;;  %v3507_v38 = vsub.f32 %v5694_v37, %v391_v26  ;;  %745 = vadd.xlane.f32.xlu2 %v744_v49  ;;  %v577_v1 = vmul.f32 %v3495_v9, %v3495_v9  ;;  %v578_v7 = vmul.f32 %v3498_v20, %v3498_v20 }
  0xe6   :  { %5689 = vst [vmem:[#allocation34_spill] sm:$0xff] %v3498_v20  ;;  %737 = vadd.xlane.f32.xlu0 %v736_v22  ;;  %v573_v45 = vmul.f32 %v3501_v13, %v3501_v13  ;;  %v574_v54 = vmul.f32 %v3504_v30, %v3504_v30  ;;  %v3522_v21 = vsub.f32 %v5696_v61, %v391_v26  ;;  %v5702_v61 = vld [vmem:[#allocation44_spill] sm:$0xff] }
  0xe7   :  { %5691 = vst [vmem:[#allocation38_spill] sm:$0xff] %v3501_v13  ;;  %v755_v25 = vsel %vm110_vm0, %v578_v7, 0.0  ;;  %v576_v10 = vmul.f32 %v3507_v38, %v3507_v38  ;;  %v5700_v7 = vld [vmem:[#allocation40_spill] sm:$0xff] }
  0xe8   :  { %5693 = vst [vmem:[#allocation35_spill] sm:$0xff] %v3504_v30  ;;  %v290_v49 = vpop.xlane.xlu2 %289  ;;  %v747_v12 = vsel %vm110_vm0, %v574_v54, 0.0  ;;  %v756_v37 = vadd.f32 %v755_v25, %v577_v1  ;;  %v5698_v30 = vld [vmem:[#allocation43_spill] sm:$0xff]  ;;  %v575_v1 = vmul.f32 %v3522_v21, %v3522_v21  ;;  %v5706_v25 = vld [vmem:[#allocation42_spill] sm:$0xff] }
  0xe9   :  { %5695 = vst [vmem:[#allocation36_spill] sm:$0xff] %v3507_v38  ;;  %v395_v53 = vmul.f32 0.0051020407, %v290_v49  ;;  %v282_v2 = vpop.xlane.xlu0 %281  ;;  %v748_v47 = vadd.f32 %v747_v12, %v573_v45  ;;  %v5704_v49 = vld [vmem:[#allocation41_spill] sm:$0xff]  ;;  %v751_v33 = vsel %vm110_vm0, %v576_v10, 0.0 }
  0xea   :  { %5697 = vst [vmem:[#allocation39_spill] sm:$0xff] %v3522_v21  ;;  %v286_v22 = vpop.xlane.xlu1 %285  ;;  %v393_v13 = vmul.f32 0.0051020407, %v282_v2  ;;  %v5708_v10 = vld [vmem:[#allocation45_spill] sm:$0xff] }
  0xeb   :  { %v394_v44 = vmul.f32 0.0051020407, %v286_v22  ;;  %v3528_v20 = vsub.f32 %v5698_v30, %v395_v53  ;;  %v3531_v26 = vsub.f32 %v5700_v7, %v395_v53  ;;  %741 = vadd.xlane.f32.xlu1 %v740_v62  ;;  %v752_v22 = vadd.f32 %v751_v33, %v575_v1  ;;  %v5711_v33 = vld [vmem:[#allocation46_spill] sm:$0xff] }
  0xec   :  { %v3534_v54 = vsub.f32 %v5702_v61, %v393_v13  ;;  %v3537_v50 = vsub.f32 %v5704_v49, %v393_v13 }
  0xed   :  { %5699 = vst [vmem:[#allocation43_spill] sm:$0xff] %v3528_v20  ;;  %757 = vadd.xlane.f32.xlu2 %v756_v37  ;;  %v583_v30 = vmul.f32 %v3528_v20, %v3528_v20  ;;  %v584_v45 = vmul.f32 %v3531_v26, %v3531_v26  ;;  %v3547_v12 = vsub.f32 %v5706_v25, %v394_v44 }
  0xee   :  { %5701 = vst [vmem:[#allocation40_spill] sm:$0xff] %v3531_v26  ;;  %749 = vadd.xlane.f32.xlu0 %v748_v47  ;;  %v579_v13 = vmul.f32 %v3534_v54, %v3534_v54  ;;  %v580_v53 = vmul.f32 %v3537_v50, %v3537_v50  ;;  %v3556_v7 = vsub.f32 %v5708_v10, %v394_v44 }
  0xef   :  { %5703 = vst [vmem:[#allocation44_spill] sm:$0xff] %v3534_v54  ;;  %v767_v2 = vsel %vm110_vm0, %v584_v45, 0.0  ;;  %v582_v54 = vmul.f32 %v3547_v12, %v3547_v12 }
  0xf0   :  { %5705 = vst [vmem:[#allocation41_spill] sm:$0xff] %v3537_v50  ;;  %v302_v62 = vpop.xlane.xlu2 %301  ;;  %v759_v37 = vsel %vm110_vm0, %v580_v53, 0.0  ;;  %v768_v38 = vadd.f32 %v767_v2, %v583_v30  ;;  %v2423_v50 = vmov 0   ;;  %v5714_v30 = vld [vmem:[#allocation47_spill] sm:$0xff] }
  0xf1   :  { %5707 = vst [vmem:[#allocation42_spill] sm:$0xff] %v3547_v12  ;;  %v398_v61 = vmul.f32 0.0051020407, %v302_v62  ;;  %v294_v49 = vpop.xlane.xlu0 %293  ;;  %v760_v26 = vadd.f32 %v759_v37, %v579_v13  ;;  %2324 = vset.pattern.permute.xlu0 %v2423_v50  ;;  %2326 = vset.pattern.permute.xlu2 %v2423_v50  ;;  %v581_v13 = vmul.f32 %v3556_v7, %v3556_v7  ;;  %v5716_v62 = vld [vmem:[#allocation48_spill] sm:$0xff] }
  0xf2   :  { %5709 = vst [vmem:[#allocation45_spill] sm:$0xff] %v3556_v7  ;;  %v298_v25 = vpop.xlane.xlu1 %297  ;;  %v396_v47 = vmul.f32 0.0051020407, %v294_v49  ;;  %2325 = vset.pattern.permute.xlu1 %v2423_v50 }
  0xf3   :  { %v397_v21 = vmul.f32 0.0051020407, %v298_v25  ;;  %v3561_v1 = vsub.f32 %v3047_v28, %v398_v61  ;;  %v3564_v45 = vsub.f32 %v5711_v33, %v398_v61  ;;  %753 = vadd.xlane.f32.xlu1 %v752_v22 }
  0xf4   :  { %v3567_v44 = vsub.f32 %v3054_v34, %v396_v47  ;;  %v3570_v53 = vsub.f32 %v5714_v30, %v396_v47  ;;  %v763_v34 = vsel %vm110_vm0, %v582_v54, 0.0 }
  0xf5   :  { %5710 = vst [vmem:[#allocation76_spill] sm:$0xff] %v3561_v1  ;;  %769 = vadd.xlane.f32.xlu2 %v768_v38  ;;  %v589_v2 = vmul.f32 %v3561_v1, %v3561_v1  ;;  %v590_v28 = vmul.f32 %v3564_v45, %v3564_v45  ;;  %v3579_v37 = vsub.f32 %v5716_v62, %v397_v21 }
  0xf6   :  { %5712 = vst [vmem:[#allocation46_spill] sm:$0xff] %v3564_v45  ;;  %761 = vadd.xlane.f32.xlu0 %v760_v26  ;;  %v585_v22 = vmul.f32 %v3567_v44, %v3567_v44  ;;  %v586_v38 = vmul.f32 %v3570_v53, %v3570_v53  ;;  %v3589_v49 = vsub.f32 %v3061_v35, %v397_v21 }
  0xf7   :  { %5713 = vst [vmem:[#allocation77_spill] sm:$0xff] %v3567_v44  ;;  %v779_v50 = vsel %vm110_vm0, %v590_v28, 0.0  ;;  %v764_v33 = vadd.f32 %v763_v34, %v581_v13  ;;  %v588_v62 = vmul.f32 %v3579_v37, %v3579_v37 }
  0xf8   :  { %5715 = vst [vmem:[#allocation47_spill] sm:$0xff] %v3570_v53  ;;  %v602_v10 = vpop.xlane.xlu2 %601  ;;  %v771_v61 = vsel %vm110_vm0, %v586_v38, 0.0  ;;  %v780_v26 = vadd.f32 %v779_v50, %v589_v2  ;;  %v587_v35 = vmul.f32 %v3589_v49, %v3589_v49 }
  0xf9   :  { %5717 = vst [vmem:[#allocation48_spill] sm:$0xff] %v3579_v37  ;;  %v833_v25 = vmul.f32 0.0051020407, %v602_v10  ;;  %v594_v47 = vpop.xlane.xlu0 %593  ;;  %v772_v54 = vadd.f32 %v771_v61, %v585_v22  ;;  %v775_v13 = vsel %vm110_vm0, %v588_v62, 0.0 }
  0xfa   :  { %5718 = vst [vmem:[#allocation78_spill] sm:$0xff] %v3589_v49  ;;  %v831_v30 = vmul.f32 0.0051020407, %v594_v47  ;;  %v776_v38 = vadd.f32 %v775_v13, %v587_v35 }
  0xfb   :  { %v3593_v44 = vadd.f32 1e-05, %v833_v25  ;;  %765 = vadd.xlane.f32.xlu1 %v764_v33 }
  0xfc   :  { %v927_v53 = vadd.f32 1e-05, %v831_v30 }
  0xfd   :  { %2327 = vrsqrt.f32 %v3593_v44  ;;  %781 = vadd.xlane.f32.xlu2 %v780_v26  ;;  %vm1001_vm5 = vweird.f32 %v3593_v44 }
  0xfe   :  { %2329 = vrsqrt.f32 %v927_v53  ;;  %v598_v21 = vpop.xlane.xlu1 %597  ;;  %773 = vadd.xlane.f32.xlu0 %v772_v54  ;;  %vm981_vm2 = vweird.f32 %v927_v53 }
  0xff   :  { %v832_v2 = vmul.f32 0.0051020407, %v598_v21 }
 0x100   :  { %v614_v28 = vpop.xlane.xlu2 %613 }
 0x101   :  { %v3599_v34 = vadd.f32 1e-05, %v832_v2  ;;  %v606_v22 = vpop.xlane.xlu0 %605  ;;  %v836_v26 = vmul.f32 0.0051020407, %v614_v28 }
 0x102   :  { %v834_v50 = vmul.f32 0.0051020407, %v606_v22 }
 0x103   :  { %v3601_v10 = vpop.eup %2327  ;;  %2331 = vrsqrt.f32 %v3599_v34  ;;  %777 = vadd.xlane.f32.xlu1 %v776_v38  ;;  %v3616_v22 = vadd.f32 1e-05, %v836_v26  ;;  %vm991_vm9 = vweird.f32 %v3599_v34 }
 0x104   :  { %v3604_v61 = vpop.eup %2329  ;;  %v996_v25 = vmul.f32 %v3601_v10, %v3593_v44  ;;  %v3608_v47 = vadd.f32 1e-05, %v834_v50  ;;  %vm1002_vm3 = vweird.f32 %v3601_v10 }
 0x105   :  { %v976_v33 = vmul.f32 %v3604_v61, %v927_v53  ;;  %vm982_vm1 = vweird.f32 %v3604_v61  ;;  %vm1003_vm6 = vmor %vm1001_vm5, %vm1002_vm3  ;;  %vm1031_vm13 = vweird.f32 %v3616_v22 }
 0x106   :  { %2333 = vrsqrt.f32 %v3608_v47  ;;  %v610_v30 = vpop.xlane.xlu1 %609  ;;  %v997_v54 = vmul.f32 %v3601_v10, %v996_v25  ;;  %vm3643_vm4 = vmor %vm981_vm2, %vm982_vm1  ;;  %vm1011_vm11 = vweird.f32 %v3608_v47 }
 0x107   :  { %v977_v62 = vmul.f32 %v3604_v61, %v976_v33  ;;  %v835_v35 = vmul.f32 0.0051020407, %v610_v30 }
 0x108   :  { %v626_v21 = vpop.xlane.xlu2 %625  ;;  %v998_v37 = vmul.f32 0.5, %v997_v54 }
 0x109   :  { %v3614_v13 = vpop.eup %2331  ;;  %v978_v2 = vmul.f32 0.5, %v977_v62  ;;  %v3618_v38 = vadd.f32 1e-05, %v835_v35  ;;  %v618_v50 = vpop.xlane.xlu0 %617  ;;  %v839_v33 = vmul.f32 0.0051020407, %v626_v21 }
 0x10a   :  { %v986_v28 = vmul.f32 %v3614_v13, %v3599_v34  ;;  %v837_v26 = vmul.f32 0.0051020407, %v618_v50  ;;  %v999_v12 = vsub.f32 1.5, %v998_v37  ;;  %vm992_vm7 = vweird.f32 %v3614_v13  ;;  %v882_v34 = vld [vmem:[%s5411_s1 + $0x18] sm:$0xff] }
 0x10b   :  { %2335 = vrsqrt.f32 %v3618_v38  ;;  %v979_v25 = vsub.f32 1.5, %v978_v2  ;;  %v3631_v54 = vadd.f32 1e-05, %v839_v33  ;;  %vm3692_vm10 = vmor %vm991_vm9, %vm992_vm7  ;;  %vm1021_vm1 = vweird.f32 %v3618_v38 }
 0x10c   :  { %v3623_v49 = vpop.eup %2333  ;;  %2337 = vrsqrt.f32 %v3616_v22  ;;  %v987_v62 = vmul.f32 %v3614_v13, %v986_v28  ;;  %v3636_v20 = vadd.f32 1e-05, %v837_v26  ;;  %v881_v26 = vld [vmem:[%s5411_s1 + $0x10] sm:$0xff] }
 0x10d   :  { %v1006_v30 = vmul.f32 %v3623_v49, %v3608_v47  ;;  %v980_v21 = vmul.f32 %v3604_v61, %v979_v25  ;;  %vm1012_vm8 = vweird.f32 %v3623_v49 }
 0x10e   :  { %v622_v35 = vpop.xlane.xlu1 %621  ;;  %v988_v28 = vmul.f32 0.5, %v987_v62  ;;  %vm1013_vm12 = vmor %vm1011_vm11, %vm1012_vm8  ;;  %vm1041_vm2 = vweird.f32 %v3636_v20 }
 0x10f   :  { %v1007_v7 = vmul.f32 %v3623_v49, %v1006_v30  ;;  %v838_v45 = vmul.f32 0.0051020407, %v622_v35  ;;  %v984_v30 = vsel %vm3643_vm4, %v3604_v61, %v980_v21 }
 0x110   :  { %v638_v1 = vpop.xlane.xlu2 %637 }
 0x111   :  { %v3634_v2 = vpop.eup %2335  ;;  %v3638_v9 = vadd.f32 1e-05, %v838_v45  ;;  %v630_v50 = vpop.xlane.xlu0 %629  ;;  %v1008_v37 = vmul.f32 0.5, %v1007_v7  ;;  %v1000_v45 = vmul.f32 %v3601_v10, %v999_v12  ;;  %v879_v7 = vld [vmem:[%s5411_s1] sm:$0xff]  ;;  %v989_v12 = vsub.f32 1.5, %v988_v28 }
 0x112   :  { %v3640_v41 = vpop.eup %2337  ;;  %v1016_v25 = vmul.f32 %v3634_v2, %v3618_v38  ;;  %v840_v53 = vmul.f32 0.0051020407, %v630_v50  ;;  %v842_v50 = vmul.f32 0.0051020407, %v638_v1  ;;  %v1455_v33 = vmul.f32 %v984_v30, %v879_v7 }
 0x113   :  { %2339 = vrsqrt.f32 %v3638_v9  ;;  %v1026_v62 = vmul.f32 %v3640_v41, %v3616_v22  ;;  %v1009_v35 = vsub.f32 1.5, %v1008_v37  ;;  %v1004_v61 = vsel %vm1003_vm6, %v3601_v10, %v1000_v45 }
 0x114   :  { %2341 = vrsqrt.f32 %v3631_v54  ;;  %v1017_v16 = vmul.f32 %v3634_v2, %v1016_v25  ;;  %v3667_v21 = vadd.f32 1e-05, %v840_v53  ;;  %v1457_v55 = vmul.f32 %v1004_v61, %v881_v26  ;;  %1505 = vperm.xlu0 %2324, %v1455_v33  }
 0x115   :  { %2343 = vrsqrt.f32 %v3636_v20  ;;  %v1027_v25 = vmul.f32 %v3640_v41, %v1026_v62  ;;  %v3680_v10 = vadd.f32 1e-05, %v842_v50  ;;  %v990_v7 = vmul.f32 %v3614_v13, %v989_v12 }
 0x116   :  { %v634_v32 = vpop.xlane.xlu1 %633  ;;  %1515 = vperm.xlu2 %2326, %v1457_v55   ;;  %v1018_v53 = vmul.f32 0.5, %v1017_v16  ;;  %v1010_v30 = vmul.f32 %v3623_v49, %v1009_v35  ;;  %v880_v16 = vld [vmem:[%s5411_s1 + $0x8] sm:$0xff]  ;;  %vm1022_vm14 = vweird.f32 %v3634_v2  ;;  %vm1032_vm15 = vweird.f32 %v3640_v41 }
 0x117   :  { %v841_v44 = vmul.f32 0.0051020407, %v634_v32  ;;  %v1028_v12 = vmul.f32 0.5, %v1027_v25  ;;  %v994_v61 = vsel %vm3692_vm10, %v3614_v13, %v990_v7  ;;  %vm1051_vm3 = vweird.f32 %v3638_v9  ;;  %vm1023_vm4 = vmor %vm1021_vm1, %vm1022_vm14 }
 0x118   :  { %v650_v23 = vpop.xlane.xlu2 %649  ;;  %v1019_v33 = vsub.f32 1.5, %v1018_v53  ;;  %v1456_v58 = vmul.f32 %v994_v61, %v880_v16  ;;  %vm1061_vm6 = vweird.f32 %v3631_v54  ;;  %vm3758_vm7 = vmor %vm1031_vm13, %vm1032_vm15  ;;  %vm1071_vm11 = vweird.f32 %v3667_v21 }
 0x119   :  { %v3669_v60 = vpop.eup %2339  ;;  %v3672_v28 = vadd.f32 1e-05, %v841_v44  ;;  %v642_v37 = vpop.xlane.xlu0 %641  ;;  %v845_v25 = vmul.f32 0.0051020407, %v650_v23  ;;  %v1029_v8 = vsub.f32 1.5, %v1028_v12  ;;  %vm1091_vm14 = vweird.f32 %v3680_v10 }
 0x11a   :  { %v3674_v1 = vpop.eup %2341  ;;  %v1046_v32 = vmul.f32 %v3669_v60, %v3638_v9  ;;  %v843_v47 = vmul.f32 0.0051020407, %v642_v37  ;;  %v1020_v7 = vmul.f32 %v3634_v2, %v1019_v33  ;;  %vm1052_vm5 = vweird.f32 %v3669_v60 }
 0x11b   :  { %v3682_v45 = vpop.eup %2343  ;;  %2345 = vrsqrt.f32 %v3672_v28  ;;  %v1056_v55 = vmul.f32 %v3674_v1, %v3631_v54  ;;  %v3734_v62 = vadd.f32 1e-05, %v845_v25  ;;  %vm1053_vm8 = vmor %vm1051_vm3, %vm1052_vm5  ;;  %vm1062_vm9 = vweird.f32 %v3674_v1 }
 0x11c   :  { %v1047_v26 = vmul.f32 %v3669_v60, %v1046_v32  ;;  %2347 = vrsqrt.f32 %v3667_v21  ;;  %v1036_v35 = vmul.f32 %v3682_v45, %v3636_v20  ;;  %v1014_v32 = vsel %vm1013_vm12, %v3623_v49, %v1010_v30  ;;  %1510 = vperm.xlu1 %2325, %v1456_v58  }
 0x11d   :  { %2349 = vrsqrt.f32 %v3680_v10  ;;  %v1458_v11 = vmul.f32 %v1014_v32, %v882_v34  ;;  %v1057_v48 = vmul.f32 %v3674_v1, %v1056_v55  ;;  %v3723_v49 = vadd.f32 1e-05, %v843_v47  ;;  %v883_v55 = vld [vmem:[%s5411_s1 + $0x20] sm:$0xff] }
 0x11e   :  { %v646_v50 = vpop.xlane.xlu1 %645  ;;  %v1048_v29 = vmul.f32 0.5, %v1047_v26  ;;  %v1037_v13 = vmul.f32 %v3682_v45, %v1036_v35  ;;  %v1024_v34 = vsel %vm1023_vm4, %v3634_v2, %v1020_v7  ;;  %v884_v35 = vld [vmem:[%s5411_s1 + $0x28] sm:$0xff]  ;;  %v1030_v47 = vmul.f32 %v3640_v41, %v1029_v8 }
 0x11f   :  { %v844_v44 = vmul.f32 0.0051020407, %v646_v50  ;;  %1520 = vperm.xlu2 %2326, %v1458_v11   ;;  %v3736_v58 = vmul.f32 0.5, %v1057_v48  ;;  %v1459_v2 = vmul.f32 %v1024_v34, %v883_v55  ;;  %vm1042_vm10 = vweird.f32 %v3682_v45 }
 0x120   :  { %v662_v43 = vpop.xlane.xlu2 %661  ;;  %v1049_v26 = vsub.f32 1.5, %v1048_v29  ;;  %v1038_v16 = vmul.f32 0.5, %v1037_v13  ;;  %v1034_v22 = vsel %vm3758_vm7, %v3640_v41, %v1030_v47  ;;  %v886_v13 = vld [vmem:[%s5411_s1 + $0x38] sm:$0xff]  ;;  %vm1081_vm12 = vweird.f32 %v3672_v28  ;;  %vm1043_vm13 = vmor %vm1041_vm2, %vm1042_vm10 }
 0x121   :  { %v3714_v63 = vpop.eup %2345  ;;  %v3717_v14 = vadd.f32 1e-05, %v844_v44  ;;  %v654_v37 = vpop.xlane.xlu0 %653  ;;  %v848_v25 = vmul.f32 0.0051020407, %v662_v43  ;;  %v1059_v41 = vsub.f32 1.5, %v3736_v58  ;;  %vm3831_vm2 = vmor %vm1061_vm6, %vm1062_vm9  ;;  %vm1101_vm6 = vweird.f32 %v3723_v49 }
 0x122   :  { %v3719_v53 = vpop.eup %2347  ;;  %v1076_v23 = vmul.f32 %v3714_v63, %v3672_v28  ;;  %v846_v29 = vmul.f32 0.0051020407, %v654_v37  ;;  %v1050_v61 = vmul.f32 %v3669_v60, %v1049_v26  ;;  %v1039_v7 = vsub.f32 1.5, %v1038_v16 }
 0x123   :  { %2351 = vrsqrt.f32 %v3717_v14  ;;  %v3730_v30 = vpop.eup %2349  ;;  %v1066_v11 = vmul.f32 %v3719_v53, %v3667_v21  ;;  %v3795_v58 = vadd.f32 1e-05, %v848_v25  ;;  %vm1072_vm15 = vweird.f32 %v3719_v53 }
 0x124   :  { %2353 = vrsqrt.f32 %v3723_v49  ;;  %v1077_v38 = vmul.f32 %v3714_v63, %v1076_v23  ;;  %v1086_v33 = vmul.f32 %v3730_v30, %v3680_v10  ;;  %v3783_v26 = vadd.f32 1e-05, %v846_v29  ;;  %1525 = vperm.xlu1 %2325, %v1459_v2   ;;  %vm3867_vm5 = vmor %vm1071_vm11, %vm1072_vm15 }
 0x125   :  { %2355 = vrsqrt.f32 %v3734_v62  ;;  %v1067_v8 = vmul.f32 %v3719_v53, %v1066_v11  ;;  %v1460_v11 = vmul.f32 %v1034_v22, %v884_v35  ;;  %v885_v35 = vld [vmem:[%s5411_s1 + $0x30] sm:$0xff]  ;;  %v1040_v47 = vmul.f32 %v3682_v45, %v1039_v7 }
 0x126   :  { %v658_v48 = vpop.xlane.xlu1 %657  ;;  %v1078_v55 = vmul.f32 0.5, %v1077_v38  ;;  %v1087_v9 = vmul.f32 %v3730_v30, %v1086_v33  ;;  %vm1082_vm1 = vweird.f32 %v3714_v63  ;;  %vm1092_vm3 = vweird.f32 %v3730_v30 }
 0x127   :  { %v847_v12 = vmul.f32 0.0051020407, %v658_v48  ;;  %v1054_v48 = vsel %vm1053_vm8, %v3669_v60, %v1050_v61  ;;  %1530 = vperm.xlu2 %2326, %v1460_v11   ;;  %v1068_v34 = vmul.f32 0.5, %v1067_v8  ;;  %v1044_v25 = vsel %vm1043_vm13, %v3682_v45, %v1040_v47  ;;  %vm1083_vm4 = vmor %vm1081_vm12, %vm1082_vm1 }
 0x128   :  { %v674_v44 = vpop.xlane.xlu2 %673  ;;  %v1462_v29 = vmul.f32 %v1054_v48, %v886_v13  ;;  %v1079_v33 = vsub.f32 1.5, %v1078_v55  ;;  %v3813_v8 = vmul.f32 0.5, %v1087_v9  ;;  %vm1121_vm8 = vweird.f32 %v3734_v62  ;;  %vm3897_vm10 = vmor %vm1091_vm14, %vm1092_vm3 }
 0x129   :  { %v3766_v32 = vpop.eup %2351  ;;  %v3769_v37 = vadd.f32 1e-05, %v847_v12  ;;  %v666_v23 = vpop.xlane.xlu0 %665  ;;  %v851_v12 = vmul.f32 0.0051020407, %v674_v44  ;;  %v1060_v44 = vmul.f32 %v3674_v1, %v1059_v41  ;;  %v1069_v20 = vsub.f32 1.5, %v1068_v34 }
 0x12a   :  { %v1106_v43 = vmul.f32 %v3766_v32, %v3717_v14  ;;  %v3788_v16 = vpop.eup %2353  ;;  %1540 = vperm.xlu0 %2324, %v1462_v29   ;;  %v849_v61 = vmul.f32 0.0051020407, %v666_v23  ;;  %v887_v23 = vld [vmem:[%s5411_s1 + $0x40] sm:$0xff]  ;;  %vm1112_vm7 = vweird.f32 %v3766_v32  ;;  %vm1111_vm9 = vweird.f32 %v3717_v14  ;;  %v890_v14 = vld [vmem:[%s5411_s1 + $0x58] sm:$0xff] }
 0x12b   :  { %2357 = vrsqrt.f32 %v3769_v37  ;;  %v3797_v38 = vpop.eup %2355  ;;  %v1096_v2 = vmul.f32 %v3788_v16, %v3723_v49  ;;  %v3836_v48 = vadd.f32 1e-05, %v851_v12  ;;  %v1064_v54 = vsel %vm3831_vm2, %v3674_v1, %v1060_v44  ;;  %vm3909_vm12 = vmor %vm1111_vm9, %vm1112_vm7 }
 0x12c   :  { %v1107_v60 = vmul.f32 %v3766_v32, %v1106_v43  ;;  %2359 = vrsqrt.f32 %v3783_v26  ;;  %v1116_v7 = vmul.f32 %v3797_v38, %v3734_v62  ;;  %v1461_v43 = vmul.f32 %v1044_v25, %v885_v35  ;;  %v889_v35 = vld [vmem:[%s5411_s1 + $0x50] sm:$0xff] }
 0x12d   :  { %2361 = vrsqrt.f32 %v3795_v58  ;;  %v1097_v29 = vmul.f32 %v3788_v16, %v1096_v2  ;;  %v3841_v34 = vadd.f32 1e-05, %v849_v61  ;;  %v1089_v12 = vsub.f32 1.5, %v3813_v8 }
 0x12e   :  { %v670_v50 = vpop.xlane.xlu1 %669  ;;  %v1108_v55 = vmul.f32 0.5, %v1107_v60  ;;  %1535 = vperm.xlu1 %2325, %v1461_v43   ;;  %v1080_v60 = vmul.f32 %v3714_v63, %v1079_v33  ;;  %v1463_v1 = vmul.f32 %v1064_v54, %v887_v23  ;;  %v1070_v61 = vmul.f32 %v3719_v53, %v1069_v20 }
 0x12f   :  { %v850_v22 = vmul.f32 0.0051020407, %v670_v50  ;;  %v1117_v28 = vmul.f32 %v3797_v38, %v1116_v7  ;;  %v1098_v20 = vmul.f32 0.5, %v1097_v29  ;;  %vm1122_vm11 = vweird.f32 %v3797_v38 }
 0x130   :  { %v3817_v13 = vpop.xlane.xlu2 %685  ;;  %v1084_v2 = vsel %vm1083_vm4, %v3714_v63, %v1080_v60  ;;  %v1109_v8 = vsub.f32 1.5, %v1108_v55  ;;  %1545 = vperm.xlu2 %2326, %v1463_v1   ;;  %v888_v63 = vld [vmem:[%s5411_s1 + $0x48] sm:$0xff]  ;;  %v1074_v7 = vsel %vm3867_vm5, %v3719_v53, %v1070_v61  ;;  %v1090_v1 = vmul.f32 %v3730_v30, %v1089_v12  ;;  %vm1123_vm5 = vmor %vm1121_vm8, %vm1122_vm11 }
 0x131   :  { %v678_v11 = vpop.xlane.xlu0 %677  ;;  %v3825_v41 = vpop.eup %2357  ;;  %v3838_v9 = vadd.f32 1e-05, %v850_v22  ;;  %v1465_v25 = vmul.f32 %v1084_v2, %v889_v35  ;;  %v1464_v55 = vmul.f32 %v1074_v7, %v888_v63  ;;  %v1118_v60 = vmul.f32 0.5, %v1117_v28  ;;  %v892_v12 = vld [vmem:[%s5411_s1 + $0x68] sm:$0xff] }
 0x132   :  { %v3850_v47 = vpop.eup %2359  ;;  %v1136_v50 = vmul.f32 %v3825_v41, %v3769_v37  ;;  %v852_v33 = vmul.f32 0.0051020407, %v678_v11  ;;  %v1099_v2 = vsub.f32 1.5, %v1098_v20  ;;  %vm1102_vm13 = vweird.f32 %v3788_v16 }
 0x133   :  { %2363 = vrsqrt.f32 %v3838_v9  ;;  %v1126_v21 = vmul.f32 %v3850_v47, %v3783_v26  ;;  %v3882_v43 = vpop.eup %2361  ;;  %1555 = vperm.xlu0 %2324, %v1465_v25   ;;  %v1094_v25 = vsel %vm3897_vm10, %v3730_v30, %v1090_v1  ;;  %vm1131_vm14 = vweird.f32 %v3783_v26  ;;  %vm1103_vm15 = vmor %vm1101_vm6, %vm1102_vm13 }
 0x134   :  { %2365 = vrsqrt.f32 %v3836_v48  ;;  %v3886_v23 = vadd.f32 1e-05, %v852_v33  ;;  %v1137_v45 = vmul.f32 %v3825_v41, %v1136_v50  ;;  %v1110_v50 = vmul.f32 %v3766_v32, %v1109_v8 }
 0x135   :  { %2367 = vrsqrt.f32 %v3841_v34  ;;  %v1146_v33 = vmul.f32 %v3882_v43, %v3795_v58  ;;  %v1127_v61 = vmul.f32 %v3850_v47, %v1126_v21  ;;  %v854_v8 = vmul.f32 0.0051020407, %v3817_v13 }
 0x136   :  { %v682_v22 = vpop.xlane.xlu1 %681  ;;  %1550 = vperm.xlu1 %2325, %v1464_v55   ;;  %2369 = vrsqrt.f32 %v3886_v23  ;;  %v1114_v63 = vsel %vm3909_vm12, %v3766_v32, %v1110_v50  ;;  %v1138_v20 = vmul.f32 0.5, %v1137_v45  ;;  %v1466_v7 = vmul.f32 %v1094_v25, %v890_v14  ;;  %v891_v50 = vld [vmem:[%s5411_s1 + $0x60] sm:$0xff] }
 0x137   :  { %v853_v29 = vmul.f32 0.0051020407, %v682_v22  ;;  %v1119_v13 = vsub.f32 1.5, %v1118_v60  ;;  %v1468_v55 = vmul.f32 %v1114_v63, %v892_v12  ;;  %v1128_v35 = vmul.f32 0.5, %v1127_v61 }
 0x138   :  { %v698_v11 = vpop.xlane.xlu2 %697  ;;  %1560 = vperm.xlu2 %2326, %v1466_v7   ;;  %v1100_v45 = vmul.f32 %v3788_v16, %v1099_v2  ;;  %v3944_v60 = vadd.f32 1e-05, %v854_v8  ;;  %vm1141_vm1 = vweird.f32 %v3769_v37  ;;  %vm1151_vm2 = vweird.f32 %v3795_v58 }
 0x139   :  { %v690_v54 = vpop.xlane.xlu0 %689  ;;  %v3891_v53 = vpop.eup %2363  ;;  %v3916_v44 = vadd.f32 1e-05, %v853_v29  ;;  %v1147_v29 = vmul.f32 %v3882_v43, %v1146_v33  ;;  %v857_v32 = vmul.f32 0.0051020407, %v698_v11  ;;  %v1139_v11 = vsub.f32 1.5, %v1138_v20 }
 0x13a   :  { %v3921_v28 = vpop.eup %2365  ;;  %v1166_v21 = vmul.f32 %v3891_v53, %v3838_v9  ;;  %v855_v61 = vmul.f32 0.0051020407, %v690_v54  ;;  %vm1132_vm3 = vweird.f32 %v3850_v47  ;;  %vm1142_vm4 = vweird.f32 %v3825_v41  ;;  %v893_v54 = vld [vmem:[%s5411_s1 + $0x70] sm:$0xff] }
 0x13b   :  { %v3931_v22 = vpop.eup %2367  ;;  %2371 = vrsqrt.f32 %v3916_v44  ;;  %v1176_v1 = vmul.f32 %v3921_v28, %v3836_v48  ;;  %1570 = vperm.xlu0 %2324, %v1468_v55   ;;  %v1104_v25 = vsel %vm1103_vm15, %v3788_v16, %v1100_v45  ;;  %v1129_v20 = vsub.f32 1.5, %v1128_v35  ;;  %vm1143_vm6 = vmor %vm1141_vm1, %vm1142_vm4 }
 0x13c   :  { %v1156_v14 = vmul.f32 %v3931_v22, %v3841_v34  ;;  %v1167_v2 = vmul.f32 %v3891_v53, %v1166_v21  ;;  %v3957_v8 = vpop.eup %2369  ;;  %v3967_v7 = vadd.f32 1e-05, %v857_v32  ;;  %v1467_v21 = vmul.f32 %v1104_v25, %v891_v50  ;;  %vm4004_vm8 = vmor %vm1131_vm14, %vm1132_vm3 }
 0x13d   :  { %v1120_v55 = vmul.f32 %v3797_v38, %v1119_v13  ;;  %v1148_v16 = vmul.f32 0.5, %v1147_v29  ;;  %2373 = vrsqrt.f32 %v3944_v60  ;;  %v3980_v32 = vadd.f32 1e-05, %v855_v61  ;;  %v895_v13 = vld [vmem:[%s5411_s1 + $0x80] sm:$0xff] }
 0x13e   :  { %v694_v30 = vpop.xlane.xlu1 %693  ;;  %v1157_v45 = vmul.f32 %v3931_v22, %v1156_v14  ;;  %v1168_v35 = vmul.f32 0.5, %v1167_v2  ;;  %1565 = vperm.xlu1 %2325, %v1467_v21   ;;  %v1140_v62 = vmul.f32 %v3825_v41, %v1139_v11  ;;  %v1186_v29 = vmul.f32 %v3957_v8, %v3886_v23 }
 0x13f   :  { %v856_v10 = vmul.f32 0.0051020407, %v694_v30  ;;  %v1177_v30 = vmul.f32 %v3921_v28, %v1176_v1  ;;  %v1124_v50 = vsel %vm1123_vm5, %v3797_v38, %v1120_v55  ;;  %v1130_v11 = vmul.f32 %v3850_v47, %v1129_v20 }
 0x140   :  { %v3949_v33 = vpop.xlane.xlu2 %709  ;;  %v1469_v38 = vmul.f32 %v1124_v50, %v893_v54  ;;  %v1149_v61 = vsub.f32 1.5, %v1148_v16  ;;  %vm1152_vm7 = vweird.f32 %v3882_v43  ;;  %v1158_v25 = vmul.f32 0.5, %v1157_v45 }
 0x141   :  { %v702_v12 = vpop.xlane.xlu0 %701  ;;  %v3963_v63 = vadd.f32 1e-05, %v856_v10  ;;  %v3965_v49 = vpop.eup %2371  ;;  %v1144_v10 = vsel %vm1143_vm6, %v3825_v41, %v1140_v62  ;;  %v894_v41 = vld [vmem:[%s5411_s1 + $0x78] sm:$0xff]  ;;  %v1169_v54 = vsub.f32 1.5, %v1168_v35  ;;  %v1134_v26 = vsel %vm4004_vm8, %v3850_v47, %v1130_v11  ;;  %vm4036_vm15 = vmor %vm1151_vm2, %vm1152_vm7 }
 0x142   :  { %v1196_v1 = vmul.f32 %v3965_v49, %v3916_v44  ;;  %1575 = vperm.xlu2 %2326, %v1469_v38   ;;  %v1471_v21 = vmul.f32 %v1144_v10, %v895_v13  ;;  %v858_v55 = vmul.f32 0.0051020407, %v702_v12  ;;  %v1178_v62 = vmul.f32 0.5, %v1177_v30  ;;  %v898_v10 = vld [vmem:[%s5411_s1 + $0x98] sm:$0xff] }
 0x143   :  { %2375 = vrsqrt.f32 %v3963_v63  ;;  %v4015_v50 = vpop.eup %2373  ;;  %vm1181_vm9 = vweird.f32 %v3836_v48  ;;  %vm1161_vm10 = vweird.f32 %v3841_v34  ;;  %vm1172_vm11 = vweird.f32 %v3891_v53 }
 0x144   :  { %2377 = vrsqrt.f32 %v3967_v7  ;;  %v1197_v45 = vmul.f32 %v3965_v49, %v1196_v1  ;;  %1585 = vperm.xlu0 %2324, %v1471_v21   ;;  %v1187_v12 = vmul.f32 %v3957_v8, %v1186_v29  ;;  %v1470_v35 = vmul.f32 %v1134_v26, %v894_v41 }
 0x145   :  { %2379 = vrsqrt.f32 %v3980_v32  ;;  %vm1182_vm12 = vweird.f32 %v3921_v28  ;;  %vm1162_vm13 = vweird.f32 %v3931_v22  ;;  %vm1171_vm14 = vweird.f32 %v3838_v9  ;;  %v896_v9 = vld [vmem:[%s5411_s1 + $0x88] sm:$0xff] }
 0x146   :  { %v706_v14 = vpop.xlane.xlu1 %705  ;;  %v860_v47 = vmul.f32 0.0051020407, %v3949_v33  ;;  %v1159_v29 = vsub.f32 1.5, %v1158_v25  ;;  %1580 = vperm.xlu1 %2325, %v1470_v35   ;;  %v1150_v33 = vmul.f32 %v3882_v43, %v1149_v61  ;;  %v1170_v58 = vmul.f32 %v3891_v53, %v1169_v54  ;;  %vm1173_vm1 = vmor %vm1171_vm14, %vm1172_vm11 }
 0x147   :  { %v859_v2 = vmul.f32 0.0051020407, %v706_v14  ;;  %v4040_v14 = vadd.f32 1e-05, %v858_v55  ;;  %v1179_v11 = vsub.f32 1.5, %v1178_v62  ;;  %v1198_v37 = vmul.f32 0.5, %v1197_v45  ;;  %vm4073_vm2 = vmor %vm1161_vm10, %vm1162_vm13 }
 0x148   :  { %v722_v20 = vpop.xlane.xlu2 %721  ;;  %v1188_v61 = vmul.f32 0.5, %v1187_v12  ;;  %v1154_v54 = vsel %vm4036_vm15, %v3882_v43, %v1150_v33  ;;  %v1174_v55 = vsel %vm1173_vm1, %v3891_v53, %v1170_v58  ;;  %v4065_v62 = vadd.f32 1e-05, %v860_v47  ;;  %vm4098_vm6 = vmor %vm1181_vm9, %vm1182_vm12 }
 0x149   :  { %v714_v16 = vpop.xlane.xlu0 %713  ;;  %v4019_v13 = vadd.f32 1e-05, %v859_v2  ;;  %v4024_v38 = vpop.eup %2375  ;;  %v1206_v2 = vmul.f32 %v4015_v50, %v3944_v60  ;;  %v1472_v45 = vmul.f32 %v1154_v54, %v896_v9  ;;  %v1474_v35 = vmul.f32 %v1174_v55, %v898_v10  ;;  %v901_v54 = vld [vmem:[%s5411_s1 + $0xb0] sm:$0xff] }
 0x14a   :  { %v4030_v30 = vpop.eup %2377  ;;  %v1226_v41 = vmul.f32 %v4024_v38, %v3963_v63  ;;  %v863_v12 = vmul.f32 0.0051020407, %v722_v20  ;;  %v1160_v31 = vmul.f32 %v3931_v22, %v1159_v29  ;;  %v1199_v53 = vsub.f32 1.5, %v1198_v37  ;;  %v897_v20 = vld [vmem:[%s5411_s1 + $0x90] sm:$0xff] }
 0x14b   :  { %2381 = vrsqrt.f32 %v4019_v13  ;;  %v4055_v21 = vpop.eup %2379  ;;  %v1236_v26 = vmul.f32 %v4030_v30, %v3967_v7  ;;  %1590 = vperm.xlu2 %2326, %v1472_v45   ;;  %v861_v1 = vmul.f32 0.0051020407, %v714_v16  ;;  %v1180_v29 = vmul.f32 %v3921_v28, %v1179_v11 }
 0x14c   :  { %2383 = vrsqrt.f32 %v4040_v14  ;;  %v1216_v47 = vmul.f32 %v4055_v21, %v3980_v32  ;;  %1600 = vperm.xlu0 %2324, %v1474_v35   ;;  %v1207_v34 = vmul.f32 %v4015_v50, %v1206_v2  ;;  %v1227_v33 = vmul.f32 %v4024_v38, %v1226_v41 }
 0x14d   :  { %v1164_v10 = vsel %vm4073_vm2, %v3931_v22, %v1160_v31  ;;  %vm1211_vm3 = vweird.f32 %v3944_v60  ;;  %v1189_v16 = vsub.f32 1.5, %v1188_v61  ;;  %vm1201_vm4 = vweird.f32 %v3916_v44 }
 0x14e   :  { %v718_v25 = vpop.xlane.xlu1 %717  ;;  %vm1202_vm5 = vweird.f32 %v3965_v49  ;;  %2385 = vrsqrt.f32 %v4065_v62  ;;  %v1237_v31 = vmul.f32 %v4030_v30, %v1236_v26  ;;  %v4103_v22 = vadd.f32 1e-05, %v863_v12 }
 0x14f   :  { %v862_v51 = vmul.f32 0.0051020407, %v718_v25  ;;  %v1473_v2 = vmul.f32 %v1164_v10, %v897_v20  ;;  %v899_v25 = vld [vmem:[%s5411_s1 + $0xa0] sm:$0xff]  ;;  %v1217_v61 = vmul.f32 %v4055_v21, %v1216_v47  ;;  %v4111_v41 = vadd.f32 1e-05, %v861_v1  ;;  %vm1203_vm8 = vmor %vm1201_vm4, %vm1202_vm5 }
 0x150   :  { %v734_v52 = vpop.xlane.xlu2 %733  ;;  %v1184_v48 = vsel %vm4098_vm6, %v3921_v28, %v1180_v29  ;;  %v1200_v55 = vmul.f32 %v3965_v49, %v1199_v53  ;;  %v1208_v45 = vmul.f32 0.5, %v1207_v34  ;;  %vm1191_vm7 = vweird.f32 %v3886_v23 }
 0x151   :  { %v726_v9 = vpop.xlane.xlu0 %725  ;;  %v4088_v58 = vpop.eup %2381  ;;  %v4105_v37 = vadd.f32 1e-05, %v862_v51  ;;  %v1228_v35 = vmul.f32 0.5, %v1227_v33  ;;  %1595 = vperm.xlu1 %2325, %v1473_v2   ;;  %vm1192_vm9 = vweird.f32 %v3957_v8  ;;  %v1475_v12 = vmul.f32 %v1184_v48, %v899_v25 }
 0x152   :  { %v4120_v26 = vpop.eup %2383  ;;  %v1256_v28 = vmul.f32 %v4088_v58, %v4019_v13  ;;  %v1204_v43 = vsel %vm1203_vm8, %v3965_v49, %v1200_v55  ;;  %vm1212_vm10 = vweird.f32 %v4015_v50  ;;  %v1190_v44 = vmul.f32 %v3957_v8, %v1189_v16  ;;  %v900_v49 = vld [vmem:[%s5411_s1 + $0xa8] sm:$0xff]  ;;  %vm1193_vm11 = vmor %vm1191_vm7, %vm1192_vm9 }
 0x153   :  { %2387 = vrsqrt.f32 %v4105_v37  ;;  %v1477_v47 = vmul.f32 %v1204_v43, %v901_v54  ;;  %v4137_v20 = vmul.f32 0.5, %v1237_v31  ;;  %v4139_v29 = vmul.f32 0.5, %v1217_v61  ;;  %1605 = vperm.xlu2 %2326, %v1475_v12   ;;  %vm4171_vm2 = vmor %vm1211_vm3, %vm1212_vm10  ;;  %v902_v12 = vld [vmem:[%s5411_s1 + $0xb8] sm:$0xff]  ;;  %v904_v43 = vld [vmem:[%s5411_s1 + $0xc8] sm:$0xff] }
 0x154   :  { %2389 = vrsqrt.f32 %v4103_v22  ;;  %v4135_v1 = vpop.eup %2385  ;;  %v1246_v34 = vmul.f32 %v4120_v26, %v4040_v14  ;;  %v1209_v33 = vsub.f32 1.5, %v1208_v45  ;;  %v1229_v10 = vsub.f32 1.5, %v1228_v35 }
 0x155   :  { %2391 = vrsqrt.f32 %v4111_v41  ;;  %v1257_v16 = vmul.f32 %v4088_v58, %v1256_v28  ;;  %1615 = vperm.xlu0 %2324, %v1477_v47   ;;  %v866_v11 = vmul.f32 0.0051020407, %v734_v52  ;;  %vm1241_vm12 = vweird.f32 %v3967_v7 }
 0x156   :  { %v730_v51 = vpop.xlane.xlu1 %729  ;;  %vm1221_vm13 = vweird.f32 %v3980_v32  ;;  %vm1231_vm14 = vweird.f32 %v3963_v63  ;;  %v864_v31 = vmul.f32 0.0051020407, %v726_v9  ;;  %v1194_v2 = vsel %vm1193_vm11, %v3957_v8, %v1190_v44  ;;  %v903_v8 = vld [vmem:[%s5411_s1 + $0xc0] sm:$0xff] }
 0x157   :  { %vm1242_vm15 = vweird.f32 %v4030_v30  ;;  %vm1232_vm1 = vweird.f32 %v4024_v38  ;;  %v1266_v23 = vmul.f32 %v4135_v1, %v4065_v62  ;;  %v1476_v61 = vmul.f32 %v1194_v2, %v900_v49 }
 0x158   :  { %v746_v53 = vpop.xlane.xlu2 %745  ;;  %v1239_v52 = vsub.f32 1.5, %v4137_v20  ;;  %v1219_v54 = vsub.f32 1.5, %v4139_v29  ;;  %v1247_v55 = vmul.f32 %v4120_v26, %v1246_v34  ;;  %v865_v9 = vmul.f32 0.0051020407, %v730_v51  ;;  %vm4192_vm4 = vmor %vm1231_vm14, %vm1232_vm1 }
 0x159   :  { %v738_v25 = vpop.xlane.xlu0 %737  ;;  %v4160_v48 = vpop.eup %2387  ;;  %v1258_v35 = vmul.f32 0.5, %v1257_v16  ;;  %v4175_v28 = vadd.f32 1e-05, %v866_v11  ;;  %1610 = vperm.xlu1 %2325, %v1476_v61   ;;  %v1210_v51 = vmul.f32 %v4015_v50, %v1209_v33  ;;  %v1230_v60 = vmul.f32 %v4024_v38, %v1229_v10  ;;  %vm4236_vm10 = vmor %vm1241_vm12, %vm1242_vm15 }
 0x15a   :  { %v4165_v45 = vpop.eup %2389  ;;  %vm1222_vm3 = vweird.f32 %v4055_v21  ;;  %v4196_v29 = vadd.f32 1e-05, %v864_v31  ;;  %v4198_v34 = vadd.f32 1e-05, %v865_v9  ;;  %v869_v49 = vmul.f32 0.0051020407, %v746_v53 }
 0x15b   :  { %v4185_v44 = vpop.eup %2391  ;;  %v1267_v10 = vmul.f32 %v4135_v1, %v1266_v23  ;;  %v1286_v16 = vmul.f32 %v4160_v48, %v4105_v37  ;;  %v1214_v11 = vsel %vm4171_vm2, %v4015_v50, %v1210_v51  ;;  %v1234_v63 = vsel %vm4192_vm4, %v4024_v38, %v1230_v60  ;;  %vm1223_vm7 = vmor %vm1221_vm13, %vm1222_vm3 }
 0x15c   :  { %v1248_v2 = vmul.f32 0.5, %v1247_v55  ;;  %v1296_v31 = vmul.f32 %v4165_v45, %v4103_v22  ;;  %2393 = vrsqrt.f32 %v4198_v34  ;;  %v1478_v53 = vmul.f32 %v1214_v11, %v902_v12 }
 0x15d   :  { %v1259_v61 = vsub.f32 1.5, %v1258_v35  ;;  %v1276_v23 = vmul.f32 %v4185_v44, %v4111_v41  ;;  %2395 = vrsqrt.f32 %v4175_v28  ;;  %v1480_v9 = vmul.f32 %v1234_v63, %v904_v43 }
 0x15e   :  { %v742_v47 = vpop.xlane.xlu1 %741  ;;  %vm1251_vm5 = vweird.f32 %v4040_v14  ;;  %vm1261_vm6 = vweird.f32 %v4019_v13  ;;  %2397 = vrsqrt.f32 %v4196_v29  ;;  %1620 = vperm.xlu2 %2326, %v1478_v53   ;;  %v4218_v50 = vadd.f32 1e-05, %v869_v49  ;;  %v905_v49 = vld [vmem:[%s5411_s1 + $0xd0] sm:$0xff]  ;;  %v907_v53 = vld [vmem:[%s5411_s1 + $0xe0] sm:$0xff] }
 0x15f   :  { %v1287_v38 = vmul.f32 %v4160_v48, %v1286_v16  ;;  %1630 = vperm.xlu0 %2324, %v1480_v9   ;;  %v867_v55 = vmul.f32 0.0051020407, %v738_v25  ;;  %v1220_v35 = vmul.f32 %v4055_v21, %v1219_v54  ;;  %v868_v12 = vmul.f32 0.0051020407, %v742_v47 }
 0x160   :  { %v758_v33 = vpop.xlane.xlu2 %757  ;;  %v1268_v51 = vmul.f32 0.5, %v1267_v10  ;;  %vm1271_vm8 = vweird.f32 %v4065_v62  ;;  %v1249_v43 = vsub.f32 1.5, %v1248_v2  ;;  %vm1262_vm9 = vweird.f32 %v4088_v58 }
 0x161   :  { %v1240_v25 = vmul.f32 %v4030_v30, %v1239_v52  ;;  %v750_v60 = vpop.xlane.xlu0 %749  ;;  %v1297_v32 = vmul.f32 %v4165_v45, %v1296_v31  ;;  %v1277_v47 = vmul.f32 %v4185_v44, %v1276_v23  ;;  %v1224_v20 = vsel %vm1223_vm7, %v4055_v21, %v1220_v35  ;;  %vm1263_vm13 = vmor %vm1261_vm6, %vm1262_vm9 }
 0x162   :  { %v1260_v52 = vmul.f32 %v4088_v58, %v1259_v61  ;;  %v4247_v10 = vpop.eup %2393  ;;  %2399 = vrsqrt.f32 %v4218_v50  ;;  %v1479_v7 = vmul.f32 %v1224_v20, %v903_v8  ;;  %v4250_v16 = vadd.f32 1e-05, %v868_v12 }
 0x163   :  { %v1244_v11 = vsel %vm4236_vm10, %v4030_v30, %v1240_v25  ;;  %v4257_v21 = vpop.eup %2395  ;;  %vm1272_vm11 = vweird.f32 %v4135_v1  ;;  %vm1252_vm12 = vweird.f32 %v4120_v26  ;;  %v1288_v2 = vmul.f32 0.5, %v1287_v38 }
 0x164   :  { %v4261_v31 = vadd.f32 1e-05, %v867_v55  ;;  %v4266_v23 = vpop.eup %2397  ;;  %v1316_v30 = vmul.f32 %v4247_v10, %v4198_v34  ;;  %1625 = vperm.xlu1 %2325, %v1479_v7   ;;  %2401 = vrsqrt.f32 %v4250_v16  ;;  %v1481_v9 = vmul.f32 %v1244_v11, %v905_v49  ;;  %vm4293_vm15 = vmor %vm1251_vm5, %vm1252_vm12  ;;  %v906_v49 = vld [vmem:[%s5411_s1 + $0xd8] sm:$0xff] }
 0x165   :  { %v872_v38 = vmul.f32 0.0051020407, %v758_v33  ;;  %v1269_v55 = vsub.f32 1.5, %v1268_v51  ;;  %v4275_v8 = vmul.f32 0.5, %v1297_v32  ;;  %v4277_v35 = vmul.f32 0.5, %v1277_v47  ;;  %vm1273_vm5 = vmor %vm1271_vm8, %vm1272_vm11 }
 0x166   :  { %v754_v61 = vpop.xlane.xlu1 %753  ;;  %v1264_v12 = vsel %vm1263_vm13, %v4088_v58, %v1260_v52  ;;  %v1326_v25 = vmul.f32 %v4257_v21, %v4175_v28  ;;  %1635 = vperm.xlu2 %2326, %v1481_v9   ;;  %v870_v54 = vmul.f32 0.0051020407, %v750_v60  ;;  %v1250_v20 = vmul.f32 %v4120_v26, %v1249_v43  ;;  %v908_v9 = vld [vmem:[%s5411_s1 + $0xe8] sm:$0xff] }
 0x167   :  { %v1483_v13 = vmul.f32 %v1264_v12, %v907_v53  ;;  %vm1281_vm14 = vweird.f32 %v4111_v41  ;;  %v1306_v33 = vmul.f32 %v4266_v23, %v4196_v29  ;;  %2403 = vrsqrt.f32 %v4261_v31 }
 0x168   :  { %v4255_v63 = vpop.xlane.xlu2 %769  ;;  %v871_v51 = vmul.f32 0.0051020407, %v754_v61  ;;  %v4287_v32 = vpop.eup %2399  ;;  %v1289_v60 = vsub.f32 1.5, %v1288_v2  ;;  %vm1291_vm1 = vweird.f32 %v4105_v37  ;;  %v1317_v43 = vmul.f32 %v4247_v10, %v1316_v30 }
 0x169   :  { %1645 = vperm.xlu0 %2324, %v1483_v13   ;;  %v4299_v47 = vadd.f32 1e-05, %v872_v38  ;;  %vm1301_vm2 = vweird.f32 %v4103_v22  ;;  %vm1302_vm3 = vweird.f32 %v4165_v45  ;;  %v4306_v14 = vadd.f32 1e-05, %v870_v54  ;;  %v762_v38 = vpop.xlane.xlu0 %761  ;;  %v910_v13 = vld [vmem:[%s5411_s1 + $0xf8] sm:$0xff] }
 0x16a   :  { %v1254_v52 = vsel %vm4293_vm15, %v4120_v26, %v1250_v20  ;;  %v4311_v7 = vadd.f32 1e-05, %v871_v51  ;;  %v1270_v11 = vmul.f32 %v4135_v1, %v1269_v55  ;;  %v4314_v2 = vpop.eup %2401  ;;  %v1299_v53 = vsub.f32 1.5, %v4275_v8 }
 0x16b   :  { %v1279_v61 = vsub.f32 1.5, %v4277_v35  ;;  %vm1292_vm4 = vweird.f32 %v4160_v48  ;;  %v1327_v30 = vmul.f32 %v4257_v21, %v1326_v25  ;;  %v1307_v55 = vmul.f32 %v4266_v23, %v1306_v33 }
 0x16c   :  { %v1356_v8 = vmul.f32 %v4287_v32, %v4218_v50  ;;  %v1482_v35 = vmul.f32 %v1254_v52, %v906_v49  ;;  %2405 = vrsqrt.f32 %v4311_v7  ;;  %v1318_v12 = vmul.f32 0.5, %v1317_v43  ;;  %vm1293_vm6 = vmor %vm1291_vm1, %vm1292_vm4 }
 0x16d   :  { %2407 = vrsqrt.f32 %v4299_v47  ;;  %v1274_v25 = vsel %vm1273_vm5, %v4135_v1, %v1270_v11  ;;  %v1290_v62 = vmul.f32 %v4160_v48, %v1289_v60  ;;  %v4339_v54 = vpop.eup %2403  ;;  %v1346_v20 = vmul.f32 %v4314_v2, %v4250_v16 }
 0x16e   :  { %2409 = vrsqrt.f32 %v4306_v14  ;;  %1640 = vperm.xlu1 %2325, %v1482_v35   ;;  %v1484_v1 = vmul.f32 %v1274_v25, %v908_v9  ;;  %v873_v33 = vmul.f32 0.0051020407, %v762_v38  ;;  %v766_v51 = vpop.xlane.xlu1 %765  ;;  %vm1282_vm7 = vweird.f32 %v4185_v44 }
 0x16f   :  { %v4349_v58 = vmul.f32 0.5, %v1327_v30  ;;  %vm1321_vm8 = vweird.f32 %v4198_v34  ;;  %v1294_v60 = vsel %vm1293_vm6, %v4160_v48, %v1290_v62  ;;  %v4353_v43 = vmul.f32 0.5, %v1307_v55  ;;  %vm1283_vm12 = vmor %vm1281_vm14, %vm1282_vm7 }
 0x170   :  { %v4323_v26 = vpop.xlane.xlu2 %781  ;;  %vm1311_vm9 = vweird.f32 %v4196_v29  ;;  %v1357_v37 = vmul.f32 %v4287_v32, %v1356_v8  ;;  %1650 = vperm.xlu2 %2326, %v1484_v1   ;;  %v1486_v49 = vmul.f32 %v1294_v60, %v910_v13  ;;  %v875_v52 = vmul.f32 0.0051020407, %v4255_v63  ;;  %v909_v63 = vld [vmem:[%s5411_s1 + $0xf0] sm:$0xff]  ;;  %vm4400_vm14 = vmor %vm1301_vm2, %vm1302_vm3 }
 0x171   :  { %v1336_v11 = vmul.f32 %v4339_v54, %v4261_v31  ;;  %v4360_v9 = vadd.f32 1e-05, %v873_v33  ;;  %v1280_v30 = vmul.f32 %v4185_v44, %v1279_v61  ;;  %v874_v38 = vmul.f32 0.0051020407, %v766_v51  ;;  %v911_v33 = vld [vmem:[%s5411_s1 + $0x100] sm:$0xff] }
 0x172   :  { %v4363_v35 = vpop.eup %2405  ;;  %vm1331_vm10 = vweird.f32 %v4175_v28  ;;  %vm1332_vm11 = vweird.f32 %v4257_v21  ;;  %v1319_v48 = vsub.f32 1.5, %v1318_v12  ;;  %v1347_v55 = vmul.f32 %v4314_v2, %v1346_v20  ;;  %1660 = vperm.xlu0 %2324, %v1486_v49  }
 0x173   :  { %v1300_v8 = vmul.f32 %v4165_v45, %v1299_v53  ;;  %v4372_v25 = vpop.eup %2407  ;;  %v1329_v61 = vsub.f32 1.5, %v4349_v58  ;;  %vm1312_vm13 = vweird.f32 %v4266_v23  ;;  %vm1322_vm15 = vweird.f32 %v4247_v10 }
 0x174   :  { %v1376_v12 = vmul.f32 %v4363_v35, %v4311_v7  ;;  %v4385_v62 = vpop.eup %2409  ;;  %v1309_v53 = vsub.f32 1.5, %v4353_v43  ;;  %v4388_v20 = vmul.f32 0.5, %v1357_v37  ;;  %v4390_v1 = vadd.f32 1e-05, %v875_v52  ;;  %v913_v52 = vld [vmem:[%s5411_s1 + $0x110] sm:$0xff]  ;;  %vm4421_vm1 = vmor %vm1321_vm8, %vm1322_vm15 }
 0x175   :  { %v1284_v41 = vsel %vm1283_vm12, %v4185_v44, %v1280_v30  ;;  %v1337_v58 = vmul.f32 %v4339_v54, %v1336_v11  ;;  %2411 = vrsqrt.f32 %v4360_v9  ;;  %v4406_v43 = vadd.f32 1e-05, %v874_v38  ;;  %v774_v44 = vpop.xlane.xlu0 %773  ;;  %vm1313_vm6 = vmor %vm1311_vm9, %vm1312_vm13 }
 0x176   :  { %v1485_v60 = vmul.f32 %v1284_v41, %v909_v63  ;;  %v1348_v37 = vmul.f32 0.5, %v1347_v55  ;;  %v1386_v49 = vmul.f32 %v4372_v25, %v4299_v47  ;;  %v1304_v22 = vsel %vm4400_vm14, %v4165_v45, %v1300_v8  ;;  %v778_v8 = vpop.xlane.xlu1 %777  ;;  %vm4466_vm8 = vmor %vm1331_vm10, %vm1332_vm11 }
 0x177   :  { %v1320_v11 = vmul.f32 %v4247_v10, %v1319_v48  ;;  %v1366_v38 = vmul.f32 %v4385_v62, %v4306_v14  ;;  %v1377_v55 = vmul.f32 %v4363_v35, %v1376_v12  ;;  %2413 = vrsqrt.f32 %v4406_v43 }
 0x178   :  { %v4383_v13 = vpop.permute.xlu2 %1515  ;;  %1655 = vperm.xlu1 %2325, %v1485_v60   ;;  %v1487_v45 = vmul.f32 %v1304_v22, %v911_v33  ;;  %vm1341_vm2 = vweird.f32 %v4261_v31  ;;  %2415 = vrsqrt.f32 %v4390_v1  ;;  %v878_v48 = vmul.f32 0.0051020407, %v4323_v26 }
 0x179   :  { %v1324_v34 = vsel %vm4421_vm1, %v4247_v10, %v1320_v11  ;;  %v876_v63 = vmul.f32 0.0051020407, %v774_v44  ;;  %vm1361_vm3 = vweird.f32 %v4218_v50  ;;  %v1338_v41 = vmul.f32 0.5, %v1337_v58  ;;  %v912_v10 = vld [vmem:[%s5411_s1 + $0x108] sm:$0xff] }
 0x17a   :  { %vm1342_vm4 = vweird.f32 %v4339_v54  ;;  %vm1351_vm5 = vweird.f32 %v4250_v16  ;;  %1665 = vperm.xlu2 %2326, %v1487_v45   ;;  %v1489_v12 = vmul.f32 %v1324_v34, %v913_v52  ;;  %v1359_v33 = vsub.f32 1.5, %v4388_v20 }
 0x17b   :  { %v1349_v51 = vsub.f32 1.5, %v1348_v37  ;;  %v4439_v60 = vadd.f32 1e-05, %v876_v63  ;;  %v1310_v26 = vmul.f32 %v4266_v23, %v1309_v53  ;;  %v4445_v44 = vpop.eup %2411  ;;  %v1387_v58 = vmul.f32 %v4372_v25, %v1386_v49  ;;  %v916_v63 = vld [vmem:[%s5411_s1 + $0x128] sm:$0xff]  ;;  %vm4513_vm12 = vmor %vm1341_vm2, %vm1342_vm4 }
 0x17c   :  { %v1367_v20 = vmul.f32 %v4385_v62, %v1366_v38  ;;  %v1378_v37 = vmul.f32 0.5, %v1377_v55  ;;  %1675 = vperm.xlu0 %2324, %v1489_v12   ;;  %v877_v22 = vmul.f32 0.0051020407, %v778_v8  ;;  %vm1352_vm7 = vweird.f32 %v4314_v2 }
 0x17d   :  { %v4456_v11 = vadd.f32 1e-05, %v878_v48  ;;  %v1314_v53 = vsel %vm1313_vm6, %v4266_v23, %v1310_v26  ;;  %v1330_v30 = vmul.f32 %v4257_v21, %v1329_v61  ;;  %v4460_v45 = vpop.eup %2413  ;;  %v1339_v49 = vsub.f32 1.5, %v1338_v41  ;;  %v914_v23 = vld [vmem:[%s5411_s1 + $0x118] sm:$0xff]  ;;  %vm1353_vm9 = vmor %vm1351_vm5, %vm1352_vm7 }
 0x17e   :  { %2417 = vrsqrt.f32 %v4439_v60  ;;  %v1488_v38 = vmul.f32 %v1314_v53, %v912_v10  ;;  %v4471_v55 = vadd.f32 1e-05, %v877_v22  ;;  %v4476_v61 = vpop.eup %2415  ;;  %v1396_v34 = vmul.f32 %v4445_v44, %v4360_v9 }
 0x17f   :  { %v1406_v28 = vmul.f32 %v4460_v45, %v4406_v43  ;;  %v1334_v48 = vsel %vm4466_vm8, %v4257_v21, %v1330_v30  ;;  %v1350_v8 = vmul.f32 %v4314_v2, %v1349_v51  ;;  %v1388_v41 = vmul.f32 0.5, %v1387_v58 }
 0x180   :  { %v4453_v52 = vpop.permute.xlu2 %1520  ;;  %v1368_v12 = vmul.f32 0.5, %v1367_v20  ;;  %v1379_v10 = vsub.f32 1.5, %v1378_v37  ;;  %1670 = vperm.xlu1 %2325, %v1488_v38   ;;  %2419 = vrsqrt.f32 %v4471_v55  ;;  %v1490_v21 = vmul.f32 %v1334_v48, %v914_v23  ;;  %v915_v37 = vld [vmem:[%s5411_s1 + $0x120] sm:$0xff] }
 0x181   :  { %v1407_v26 = vmul.f32 %v4460_v45, %v1406_v28  ;;  %2421 = vrsqrt.f32 %v4456_v11  ;;  %v1354_v22 = vsel %vm1353_vm9, %v4314_v2, %v1350_v8  ;;  %vm1362_vm10 = vweird.f32 %v4287_v32  ;;  %v919_v28 = vld [vmem:[%s5411_s1 + $0x140] sm:$0xff] }
 0x182   :  { %vm1382_vm11 = vweird.f32 %v4363_v35  ;;  %v1416_v16 = vmul.f32 %v4476_v61, %v4390_v1  ;;  %v1492_v51 = vmul.f32 %v1354_v22, %v916_v63  ;;  %v1397_v58 = vmul.f32 %v4445_v44, %v1396_v34  ;;  %1680 = vperm.xlu2 %2326, %v1490_v21   ;;  %vm4525_vm15 = vmor %vm1361_vm3, %vm1362_vm10 }
 0x183   :  { %v1408_v20 = vmul.f32 0.5, %v1407_v26  ;;  %v1340_v53 = vmul.f32 %v4339_v54, %v1339_v49  ;;  %v1360_v2 = vmul.f32 %v4287_v32, %v1359_v33  ;;  %v1369_v38 = vsub.f32 1.5, %v1368_v12 }
 0x184   :  { %v4507_v30 = vpop.eup %2417  ;;  %vm1371_vm13 = vweird.f32 %v4306_v14  ;;  %1690 = vperm.xlu0 %2324, %v1492_v51   ;;  %v1380_v23 = vmul.f32 %v4363_v35, %v1379_v10  ;;  %v1389_v31 = vsub.f32 1.5, %v1388_v41  ;;  %vm1372_vm14 = vweird.f32 %v4385_v62  ;;  %v918_v14 = vld [vmem:[%s5411_s1 + $0x138] sm:$0xff] }
 0x185   :  { %vm1381_vm1 = vweird.f32 %v4311_v7  ;;  %v1344_v49 = vsel %vm4513_vm12, %v4339_v54, %v1340_v53  ;;  %v1417_v50 = vmul.f32 %v4476_v61, %v1416_v16  ;;  %v1409_v63 = vsub.f32 1.5, %v1408_v20  ;;  %v917_v7 = vld [vmem:[%s5411_s1 + $0x130] sm:$0xff]  ;;  %vm4565_vm7 = vmor %vm1371_vm13, %vm1372_vm14 }
 0x186   :  { %v4537_v48 = vpop.eup %2419  ;;  %vm1383_vm2 = vmor %vm1381_vm1, %vm1382_vm11  ;;  %v1491_v8 = vmul.f32 %v1344_v49, %v915_v37  ;;  %v1364_v54 = vsel %vm4525_vm15, %v4287_v32, %v1360_v2  ;;  %v1398_v12 = vmul.f32 0.5, %v1397_v58  ;;  %v1426_v10 = vmul.f32 %v4507_v30, %v4439_v60 }
 0x187   :  { %v4548_v41 = vpop.eup %2421  ;;  %v1436_v26 = vmul.f32 %v4537_v48, %v4471_v55  ;;  %v1384_v21 = vsel %vm1383_vm2, %v4363_v35, %v1380_v23  ;;  %vm1391_vm3 = vweird.f32 %v4299_v47  ;;  %vm1392_vm4 = vweird.f32 %v4372_v25  ;;  %v920_v47 = vld [vmem:[%s5411_s1 + $0x148] sm:$0xff]  ;;  %v925_v35 = vld [vmem:[%s5411_s1 + $0x170] sm:$0xff] }
 0x188   :  { %v4519_v34 = vpop.permute.xlu2 %1530  ;;  %1685 = vperm.xlu1 %2325, %v1491_v8   ;;  %v1495_v22 = vmul.f32 %v1384_v21, %v919_v28  ;;  %v1370_v16 = vmul.f32 %v4385_v62, %v1369_v38  ;;  %vm1411_vm5 = vweird.f32 %v4406_v43  ;;  %vm1412_vm6 = vweird.f32 %v4460_v45  ;;  %vm4592_vm9 = vmor %vm1391_vm3, %vm1392_vm4 }
 0x189   :  { %v1437_v32 = vmul.f32 %v4537_v48, %v1436_v26  ;;  %v1493_v51 = vmul.f32 %v1364_v54, %v917_v7  ;;  %v1418_v58 = vmul.f32 0.5, %v1417_v50  ;;  %v1446_v20 = vmul.f32 %v4548_v41, %v4456_v11  ;;  %vm4582_vm8 = vmor %vm1411_vm5, %vm1412_vm6 }
 0x18a   :  { %v1390_v37 = vmul.f32 %v4372_v25, %v1389_v31  ;;  %v1410_v53 = vmul.f32 %v4460_v45, %v1409_v63  ;;  %v1399_v2 = vsub.f32 1.5, %v1398_v12  ;;  %v1427_v29 = vmul.f32 %v4507_v30, %v1426_v10 }
 0x18b   :  { %v1438_v38 = vmul.f32 0.5, %v1437_v32  ;;  %1695 = vperm.xlu2 %2326, %v1493_v51   ;;  %v1374_v23 = vsel %vm4565_vm7, %v4385_v62, %v1370_v16  ;;  %v922_v62 = vld [vmem:[%s5411_s1 + $0x158] sm:$0xff]  ;;  %v1419_v50 = vsub.f32 1.5, %v1418_v58  ;;  %v1447_v63 = vmul.f32 %v4548_v41, %v1446_v20  ;;  %v921_v32 = vld [vmem:[%s5411_s1 + $0x150] sm:$0xff]  ;;  %v4630_v51 = vpop.permute.xlu0 %1505 }
 0x18c   :  { %1705 = vperm.xlu0 %2324, %v1495_v22   ;;  %v1414_v43 = vsel %vm4582_vm8, %v4460_v45, %v1410_v53  ;;  %v1494_v8 = vmul.f32 %v1374_v23, %v918_v14  ;;  %v1394_v7 = vsel %vm4592_vm9, %v4372_v25, %v1390_v37  ;;  %vm1401_vm10 = vweird.f32 %v4360_v9  ;;  %v923_v53 = vld [vmem:[%s5411_s1 + $0x160] sm:$0xff] }
 0x18d   :  { %v1439_v28 = vsub.f32 1.5, %v1438_v38  ;;  %vm1402_vm11 = vweird.f32 %v4445_v44  ;;  %v1428_v54 = vmul.f32 0.5, %v1427_v29  ;;  %v1400_v12 = vmul.f32 %v4445_v44, %v1399_v2 }
 0x18e   :  { %v1498_v45 = vmul.f32 %v1414_v43, %v922_v62  ;;  %v4612_v10 = vpop.permute.xlu1 %1510  ;;  %vm1442_vm12 = vweird.f32 %v4537_v48  ;;  %v1496_v26 = vmul.f32 %v1394_v7, %v920_v47  ;;  %vm1421_vm13 = vweird.f32 %v4390_v1  ;;  %vm4618_vm14 = vmor %vm1401_vm10, %vm1402_vm11  ;;  %v1840_v43 = vld [vmem:[%s5412_s2 + $0x8] sm:$0xff]  ;;  %v1843_v47 = vld [vmem:[%s5412_s2 + $0x20] sm:$0xff] }
 0x18f   :  { %v1440_v21 = vmul.f32 %v4537_v48, %v1439_v28  ;;  %vm1422_vm15 = vweird.f32 %v4476_v61  ;;  %v1448_v25 = vmul.f32 0.5, %v1447_v63  ;;  %v1420_v22 = vmul.f32 %v4476_v61, %v1419_v50  ;;  %v1839_v50 = vld [vmem:[%s5412_s2] sm:$0xff] }
 0x190   :  { %v4586_v31 = vpop.permute.xlu2 %1545  ;;  %1700 = vperm.xlu1 %2325, %v1494_v8   ;;  %v1429_v16 = vsub.f32 1.5, %v1428_v54  ;;  %vm1441_vm1 = vweird.f32 %v4471_v55  ;;  %v1404_v1 = vsel %vm4618_vm14, %v4445_v44, %v1400_v12  ;;  %vm1423_vm3 = vmor %vm1421_vm13, %vm1422_vm15  ;;  %vm1431_vm4 = vweird.f32 %v4439_v60  ;;  %v924_v60 = vld [vmem:[%s5411_s1 + $0x168] sm:$0xff]  ;;  %v1842_v54 = vld [vmem:[%s5412_s2 + $0x18] sm:$0xff] }
 0x191   :  { %vm1443_vm2 = vmor %vm1441_vm1, %vm1442_vm12  ;;  %v1449_v20 = vsub.f32 1.5, %v1448_v25  ;;  %v1497_v37 = vmul.f32 %v1404_v1, %v921_v32  ;;  %v1424_v44 = vsel %vm1423_vm3, %v4476_v61, %v1420_v22  ;;  %vm1432_vm5 = vweird.f32 %v4507_v30  ;;  %v1845_v25 = vld [vmem:[%s5412_s2 + $0x30] sm:$0xff]  ;;  %v1847_v22 = vld [vmem:[%s5412_s2 + $0x40] sm:$0xff] }
 0x192   :  { %v1444_v55 = vsel %vm1443_vm2, %v4537_v48, %v1440_v21  ;;  %v1430_v2 = vmul.f32 %v4507_v30, %v1429_v16  ;;  %v1499_v48 = vmul.f32 %v1424_v44, %v923_v53  ;;  %vm1451_vm6 = vweird.f32 %v4456_v11  ;;  %vm1433_vm8 = vmor %vm1431_vm4, %vm1432_vm5  ;;  %v926_v11 = vld [vmem:[%s5411_s1 + $0x178] sm:$0xff]  ;;  %v1849_v32 = vld [vmem:[%s5412_s2 + $0x50] sm:$0xff] }
 0x193   :  { %1710 = vperm.xlu2 %2326, %v1496_v26   ;;  %v1501_v29 = vmul.f32 %v1444_v55, %v925_v35  ;;  %vm1452_vm7 = vweird.f32 %v4548_v41  ;;  %v1450_v14 = vmul.f32 %v4548_v41, %v1449_v20  ;;  %v1846_v21 = vld [vmem:[%s5412_s2 + $0x38] sm:$0xff]  ;;  %v1848_v55 = vld [vmem:[%s5412_s2 + $0x48] sm:$0xff] }
 0x194   :  { %1720 = vperm.xlu0 %2324, %v1498_v45   ;;  %v1434_v61 = vsel %vm1433_vm8, %v4507_v30, %v1430_v2  ;;  %vm1453_vm9 = vmor %vm1451_vm6, %vm1452_vm7  ;;  %v1844_v45 = vld [vmem:[%s5412_s2 + $0x28] sm:$0xff]  ;;  %v1850_v20 = vld [vmem:[%s5412_s2 + $0x58] sm:$0xff] }
 0x195   :  { %v1500_v33 = vmul.f32 %v1434_v61, %v924_v60  ;;  %v1454_v49 = vsel %vm1453_vm9, %v4548_v41, %v1450_v14  ;;  %v1841_v41 = vld [vmem:[%s5412_s2 + $0x10] sm:$0xff]  ;;  %v1852_v53 = vld [vmem:[%s5412_s2 + $0x68] sm:$0xff]  ;;  %v1851_v2 = vld [vmem:[%s5412_s2 + $0x60] sm:$0xff] }
 0x196   :  { %v4645_v38 = vpop.permute.xlu1 %1525  ;;  %v1502_v62 = vmul.f32 %v1454_v49, %v926_v11  ;;  %v1855_v14 = vld [vmem:[%s5412_s2 + $0x80] sm:$0xff]  ;;  %v1856_v49 = vld [vmem:[%s5412_s2 + $0x88] sm:$0xff] }
 0x198   :  { %v4636_v58 = vpop.permute.xlu2 %1560  ;;  %1715 = vperm.xlu1 %2325, %v1497_v37  }
 0x19b   :  { %1725 = vperm.xlu2 %2326, %v1499_v48   ;;  %v1853_v48 = vld [vmem:[%s5412_s2 + $0x70] sm:$0xff] }
 0x19c   :  { %1735 = vperm.xlu0 %2324, %v1501_v29   ;;  %v4654_v23 = vpop.permute.xlu0 %1540 }
 0x1a0   :  { %v4660_v28 = vpop.permute.xlu2 %1575  ;;  %1730 = vperm.xlu1 %2325, %v1500_v33   ;;  %v4665_v30 = vpop.permute.xlu1 %1535  ;;  %v1854_v33 = vld [vmem:[%s5412_s2 + $0x78] sm:$0xff] }
 0x1a3   :  { %1740 = vperm.xlu2 %2326, %v1502_v62   ;;  %v1858_v62 = vld [vmem:[%s5412_s2 + $0x98] sm:$0xff] }
 0x1a4   :  { %1894 = vperm.xlu0 %2324, %v1840_v43  }
 0x1a5   :  { %v4670_v63 = vpop.permute.xlu0 %1555 }
 0x1a8   :  { %1889 = vperm.xlu1 %2325, %v1839_v50   ;;  %v4675_v8 = vpop.permute.xlu2 %1590  ;;  %v4680_v7 = vpop.permute.xlu1 %1550 }
 0x1ab   :  { %1899 = vperm.xlu2 %2326, %v1841_v41   ;;  %v1857_v41 = vld [vmem:[%s5412_s2 + $0x90] sm:$0xff] }
 0x1ac   :  { %1909 = vperm.xlu0 %2324, %v1843_v47   ;;  %v1859_v47 = vld [vmem:[%s5412_s2 + $0xa0] sm:$0xff] }
 0x1ad   :  { %v4685_v12 = vpop.permute.xlu0 %1570 }
 0x1b0   :  { %1904 = vperm.xlu1 %2325, %v1842_v54   ;;  %v4690_v26 = vpop.permute.xlu2 %1605  ;;  %v4695_v9 = vpop.permute.xlu1 %1565 }
 0x1b3   :  { %1914 = vperm.xlu2 %2326, %v1844_v45   ;;  %v1861_v45 = vld [vmem:[%s5412_s2 + $0xb0] sm:$0xff] }
 0x1b4   :  { %1924 = vperm.xlu0 %2324, %v1846_v21  }
 0x1b6   :  { %v4703_v16 = vpop.permute.xlu0 %1585 }
 0x1b8   :  { %1919 = vperm.xlu1 %2325, %v1845_v25   ;;  %v4708_v1 = vpop.permute.xlu2 %1620  ;;  %v4710_v35 = vpop.permute.xlu1 %1580  ;;  %v1860_v25 = vld [vmem:[%s5412_s2 + $0xa8] sm:$0xff] }
 0x1bb   :  { %1929 = vperm.xlu2 %2326, %v1847_v22  }
 0x1bc   :  { %1939 = vperm.xlu0 %2324, %v1849_v32   ;;  %v1862_v32 = vld [vmem:[%s5412_s2 + $0xb8] sm:$0xff] }
 0x1be   :  { %v4718_v37 = vpop.permute.xlu0 %1600 }
 0x1c0   :  { %1934 = vperm.xlu1 %2325, %v1848_v55   ;;  %v4723_v44 = vpop.permute.xlu2 %1635 }
 0x1c3   :  { %1944 = vperm.xlu2 %2326, %v1850_v20   ;;  %v4728_v29 = vpop.permute.xlu1 %1595  ;;  %v1864_v20 = vld [vmem:[%s5412_s2 + $0xc8] sm:$0xff] }
 0x1c4   :  { %1954 = vperm.xlu0 %2324, %v1852_v53  }
 0x1c7   :  { %v4736_v60 = vpop.permute.xlu0 %1615 }
 0x1c8   :  { %1949 = vperm.xlu1 %2325, %v1851_v2   ;;  %v1863_v2 = vld [vmem:[%s5412_s2 + $0xc0] sm:$0xff] }
 0x1ca   :  { %v4738_v61 = vpop.permute.xlu2 %1650 }
 0x1cb   :  { %1959 = vperm.xlu2 %2326, %v1853_v48   ;;  %v4743_v11 = vpop.permute.xlu1 %1610 }
 0x1cc   :  { %1969 = vperm.xlu0 %2324, %v1855_v14   ;;  %v1865_v14 = vld [vmem:[%s5412_s2 + $0xd0] sm:$0xff] }
 0x1d0   :  { %1964 = vperm.xlu1 %2325, %v1854_v33   ;;  %v1867_v33 = vld [vmem:[%s5412_s2 + $0xe0] sm:$0xff] }
 0x1d1   :  { %v4751_v43 = vpop.permute.xlu0 %1630 }
 0x1d3   :  { %1974 = vperm.xlu2 %2326, %v1856_v49  }
 0x1d4   :  { %1984 = vperm.xlu0 %2324, %v1858_v62   ;;  %v4753_v50 = vpop.permute.xlu2 %1665  ;;  %v1866_v62 = vld [vmem:[%s5412_s2 + $0xd8] sm:$0xff] }
 0x1d6   :  { %v4761_v54 = vpop.permute.xlu1 %1625 }
 0x1d8   :  { %1979 = vperm.xlu1 %2325, %v1857_v41  }
 0x1db   :  { %1989 = vperm.xlu2 %2326, %v1859_v47   ;;  %v4766_v21 = vpop.permute.xlu0 %1645 }
 0x1dc   :  { %1999 = vperm.xlu0 %2324, %v1861_v45   ;;  %v4771_v22 = vpop.permute.xlu2 %1680  ;;  %v1868_v45 = vld [vmem:[%s5412_s2 + $0xe8] sm:$0xff] }
 0x1e0   :  { %1994 = vperm.xlu1 %2325, %v1860_v25   ;;  %v4776_v55 = vpop.permute.xlu1 %1640  ;;  %v1870_v25 = vld [vmem:[%s5412_s2 + $0xf8] sm:$0xff] }
 0x1e3   :  { %2004 = vperm.xlu2 %2326, %v1862_v32  }
 0x1e4   :  { %2014 = vperm.xlu0 %2324, %v1864_v20   ;;  %v4781_v53 = vpop.permute.xlu0 %1660  ;;  %v1869_v20 = vld [vmem:[%s5412_s2 + $0xf0] sm:$0xff] }
 0x1e5   :  { %5767 = vst [vmem:[#allocation79_spill] sm:$0xff] %v4781_v53  ;;  %v4786_v48 = vpop.permute.xlu2 %1695 }
 0x1e8   :  { %2009 = vperm.xlu1 %2325, %v1863_v2  }
 0x1ea   :  { %v4794_v49 = vpop.permute.xlu1 %1655 }
 0x1eb   :  { %5768 = vst [vmem:[#allocation80_spill] sm:$0xff] %v4794_v49  ;;  %2019 = vperm.xlu2 %2326, %v1865_v14  }
 0x1ec   :  { %2029 = vperm.xlu0 %2324, %v1867_v33   ;;  %v1871_v33 = vld [vmem:[%s5412_s2 + $0x100] sm:$0xff] }
 0x1ed   :  { %v4799_v41 = vpop.permute.xlu2 %1710 }
 0x1ee   :  { %5769 = vst [vmem:[#allocation81_spill] sm:$0xff] %v4799_v41  ;;  %v4801_v47 = vpop.permute.xlu0 %1675 }
 0x1ef   :  { %5770 = vst [vmem:[#allocation82_spill] sm:$0xff] %v4801_v47  ;;  %v5778_v47 = vld [vmem:[#allocation52_spill] sm:$0xff] }
 0x1f0   :  { %2024 = vperm.xlu1 %2325, %v1866_v62   ;;  %v1873_v62 = vld [vmem:[%s5412_s2 + $0x110] sm:$0xff] }
 0x1f2   :  { %v4809_v32 = vpop.permute.xlu1 %1670 }
 0x1f3   :  { %5771 = vst [vmem:[#allocation83_spill] sm:$0xff] %v4809_v32  ;;  %2034 = vperm.xlu2 %2326, %v1868_v45   ;;  %v1872_v45 = vld [vmem:[%s5412_s2 + $0x108] sm:$0xff] }
 0x1f4   :  { %2044 = vperm.xlu0 %2324, %v1870_v25  }
 0x1f5   :  { %v4814_v2 = vpop.permute.xlu2 %1725 }
 0x1f6   :  { %5772 = vst [vmem:[#allocation84_spill] sm:$0xff] %v4814_v2  ;;  %v4816_v14 = vpop.permute.xlu0 %1690  ;;  %v1876_v2 = vld [vmem:[%s5412_s2 + $0x128] sm:$0xff] }
 0x1f7   :  { %5773 = vst [vmem:[#allocation85_spill] sm:$0xff] %v4816_v14 }
 0x1f8   :  { %2039 = vperm.xlu1 %2325, %v1869_v20   ;;  %v1874_v20 = vld [vmem:[%s5412_s2 + $0x118] sm:$0xff] }
 0x1fa   :  { %v4824_v32 = vpop.permute.xlu1 %1685 }
 0x1fb   :  { %5774 = vst [vmem:[#allocation86_spill] sm:$0xff] %v4824_v32  ;;  %2049 = vperm.xlu2 %2326, %v1871_v33   ;;  %v5777_v33 = vld [vmem:[#allocation51_spill] sm:$0xff] }
 0x1fc   :  { %2059 = vperm.xlu0 %2324, %v1873_v62   ;;  %v1747_v62 = vmul.f32 %v4383_v13, %v5777_v33 }
 0x1fd   :  { %v4829_v25 = vpop.permute.xlu2 %1740 }
 0x1fe   :  { %5775 = vst [vmem:[#allocation87_spill] sm:$0xff] %v4829_v25  ;;  %v4831_v14 = vpop.permute.xlu0 %1705  ;;  %v1748_v25 = vmul.f32 %v4383_v13, %v5778_v47  ;;  %v1879_v13 = vld [vmem:[%s5412_s2 + $0x140] sm:$0xff] }
 0x1ff   :  { %5776 = vst [vmem:[#allocation88_spill] sm:$0xff] %v4831_v14 }
 0x200   :  { %2054 = vperm.xlu1 %2325, %v1872_v45   ;;  %v1875_v45 = vld [vmem:[%s5412_s2 + $0x120] sm:$0xff] }
 0x202   :  { %v4839_v32 = vpop.permute.xlu1 %1700 }
 0x203   :  { %2064 = vperm.xlu2 %2326, %v1874_v20   ;;  %v1877_v20 = vld [vmem:[%s5412_s2 + $0x130] sm:$0xff] }
 0x204   :  { %2074 = vperm.xlu0 %2324, %v1876_v2   ;;  %v1753_v2 = vmul.f32 %v4519_v34, %v3091_v3 }
 0x205   :  { %v1900_v14 = vpop.permute.xlu2 %1899 }
 0x206   :  { %v4848_v41 = vpop.permute.xlu0 %1720  ;;  %v2131_v49 = vadd.f32 %v1900_v14, %v1747_v62  ;;  %v2132_v53 = vadd.f32 %v1900_v14, %v1748_v25  ;;  %v1754_v14 = vmul.f32 %v4519_v34, %v3094_v59  ;;  %v1882_v59 = vld [vmem:[%s5412_s2 + $0x158] sm:$0xff]  ;;  %v1759_v34 = vmul.f32 %v4586_v31, %v3132_v15 }
 0x208   :  { %2069 = vperm.xlu1 %2325, %v1875_v45   ;;  %2227 = vst [vmem:[%s5413_s3 + $0x20] sm:$0xff] %v2131_v49  ;;  %v1878_v49 = vld [vmem:[%s5412_s2 + $0x138] sm:$0xff] }
 0x209   :  { %2228 = vst.msk [vmem:[%s5413_s3 + $0x28] sm:$0xff] %vm110_vm0, %v2132_v53  ;;  %v1880_v53 = vld [vmem:[%s5412_s2 + $0x148] sm:$0xff] }
 0x20a   :  { %v4863_v47 = vpop.permute.xlu1 %1715 }
 0x20b   :  { %2079 = vperm.xlu2 %2326, %v1877_v20   ;;  %v1745_v20 = vmul.f32 %v4612_v10, %v3097_v57  ;;  %v1883_v57 = vld [vmem:[%s5412_s2 + $0x160] sm:$0xff] }
 0x20c   :  { %2089 = vperm.xlu0 %2324, %v1879_v13   ;;  %v1746_v13 = vmul.f32 %v4612_v10, %v3100_v56  ;;  %v5779_v56 = vld [vmem:[#allocation49_spill] sm:$0xff] }
 0x20d   :  { %v1915_v25 = vpop.permute.xlu2 %1914 }
 0x20e   :  { %v4872_v33 = vpop.permute.xlu0 %1735  ;;  %v2137_v62 = vadd.f32 %v1915_v25, %v1753_v2  ;;  %v2138_v45 = vadd.f32 %v1915_v25, %v1754_v14  ;;  %v1760_v2 = vmul.f32 %v4586_v31, %v3135_v17  ;;  %v1881_v14 = vld [vmem:[%s5412_s2 + $0x150] sm:$0xff]  ;;  %v1743_v17 = vmul.f32 %v4630_v51, %v5779_v56  ;;  %v5780_v31 = vld [vmem:[#allocation50_spill] sm:$0xff] }
 0x20f   :  { %v1744_v10 = vmul.f32 %v4630_v51, %v5780_v31  ;;  %v1765_v51 = vmul.f32 %v4636_v58, %v3165_v40 }
 0x210   :  { %2084 = vperm.xlu1 %2325, %v1878_v49   ;;  %2233 = vst [vmem:[%s5413_s3 + $0x50] sm:$0xff] %v2137_v62 }
 0x211   :  { %2234 = vst.msk [vmem:[%s5413_s3 + $0x58] sm:$0xff] %vm110_vm0, %v2138_v45 }
 0x212   :  { %v4887_v3 = vpop.permute.xlu1 %1730 }
 0x213   :  { %2094 = vperm.xlu2 %2326, %v1880_v53  }
 0x214   :  { %2104 = vperm.xlu0 %2324, %v1882_v59   ;;  %v1885_v59 = vld [vmem:[%s5412_s2 + $0x170] sm:$0xff] }
 0x215   :  { %v1930_v49 = vpop.permute.xlu2 %1929 }
 0x216   :  { %v1895_v25 = vpop.permute.xlu0 %1894  ;;  %v2143_v62 = vadd.f32 %v1930_v49, %v1759_v34  ;;  %v2144_v15 = vadd.f32 %v1930_v49, %v1760_v2  ;;  %v1751_v2 = vmul.f32 %v4645_v38, %v3127_v46  ;;  %v1766_v49 = vmul.f32 %v4636_v58, %v3168_v27  ;;  %v1886_v27 = vld [vmem:[%s5412_s2 + $0x178] sm:$0xff] }
 0x217   :  { %v2129_v45 = vadd.f32 %v1895_v25, %v1745_v20  ;;  %v2130_v53 = vadd.f32 %v1895_v25, %v1746_v13  ;;  %v1884_v25 = vld [vmem:[%s5412_s2 + $0x168] sm:$0xff]  ;;  %v5781_v58 = vld [vmem:[#allocation53_spill] sm:$0xff] }
 0x218   :  { %2099 = vperm.xlu1 %2325, %v1881_v14   ;;  %2239 = vst [vmem:[%s5413_s3 + $0x80] sm:$0xff] %v2143_v62  ;;  %v1752_v14 = vmul.f32 %v4645_v38, %v3109_v4 }
 0x219   :  { %2225 = vst [vmem:[%s5413_s3 + $0x10] sm:$0xff] %v2129_v45 }
 0x21a   :  { %2226 = vst.msk [vmem:[%s5413_s3 + $0x18] sm:$0xff] %vm110_vm0, %v2130_v53  ;;  %v1890_v34 = vpop.permute.xlu1 %1889  ;;  %v1749_v53 = vmul.f32 %v4453_v52, %v5781_v58 }
 0x21b   :  { %2109 = vperm.xlu2 %2326, %v1883_v57   ;;  %v2127_v20 = vadd.f32 %v1890_v34, %v1743_v17  ;;  %v2128_v13 = vadd.f32 %v1890_v34, %v1744_v10  ;;  %2240 = vst.msk [vmem:[%s5413_s3 + $0x88] sm:$0xff] %vm110_vm0, %v2144_v15  ;;  %v5782_v15 = vld [vmem:[#allocation54_spill] sm:$0xff]  ;;  %v1757_v10 = vmul.f32 %v4654_v23, %v3160_v5 }
 0x21c   :  { %2119 = vperm.xlu0 %2324, %v1885_v59   ;;  %v1750_v57 = vmul.f32 %v4453_v52, %v5782_v15  ;;  %v1771_v52 = vmul.f32 %v4660_v28, %v3198_v42  ;;  %v1758_v59 = vmul.f32 %v4654_v23, %v3150_v24  ;;  %v1772_v34 = vmul.f32 %v4660_v28, %v3201_v39  ;;  %v5787_v15 = vld [vmem:[#allocation60_spill] sm:$0xff] }
 0x21d   :  { %2223 = vst [vmem:[%s5413_s3] sm:$0xff] %v2127_v20  ;;  %v1945_v62 = vpop.permute.xlu2 %1944  ;;  %v1755_v24 = vmul.f32 %v4665_v30, %v3138_v0  ;;  %v1756_v39 = vmul.f32 %v4665_v30, %v3141_v6  ;;  %v1777_v0 = vmul.f32 %v4675_v8, %v3231_v18  ;;  %v1763_v6 = vmul.f32 %v4670_v63, %v3193_v19 }
 0x21e   :  { %2224 = vst.msk [vmem:[%s5413_s3 + $0x8] sm:$0xff] %vm110_vm0, %v2128_v13  ;;  %v1910_v46 = vpop.permute.xlu0 %1909  ;;  %v2149_v40 = vadd.f32 %v1945_v62, %v1765_v51  ;;  %v2150_v45 = vadd.f32 %v1945_v62, %v1766_v49  ;;  %v1764_v30 = vmul.f32 %v4670_v63, %v3183_v36  ;;  %v5783_v49 = vld [vmem:[#allocation61_spill] sm:$0xff]  ;;  %v5784_v36 = vld [vmem:[#allocation55_spill] sm:$0xff] }
 0x21f   :  { %v2135_v4 = vadd.f32 %v1910_v46, %v1751_v2  ;;  %v2136_v38 = vadd.f32 %v1910_v46, %v1752_v14  ;;  %v1761_v63 = vmul.f32 %v4680_v7, %v5784_v36 }
 0x220   :  { %2114 = vperm.xlu1 %2325, %v1884_v25   ;;  %2245 = vst [vmem:[%s5413_s3 + $0xb0] sm:$0xff] %v2149_v40  ;;  %v1778_v25 = vmul.f32 %v4675_v8, %v5783_v49  ;;  %v5785_v8 = vld [vmem:[#allocation56_spill] sm:$0xff] }
 0x221   :  { %2231 = vst [vmem:[%s5413_s3 + $0x40] sm:$0xff] %v2135_v4 }
 0x222   :  { %2232 = vst.msk [vmem:[%s5413_s3 + $0x48] sm:$0xff] %vm110_vm0, %v2136_v38  ;;  %v1905_v56 = vpop.permute.xlu1 %1904  ;;  %v1762_v38 = vmul.f32 %v4680_v7, %v5785_v8 }
 0x223   :  { %2124 = vperm.xlu2 %2326, %v1886_v27   ;;  %v2133_v17 = vadd.f32 %v1905_v56, %v1749_v53  ;;  %v2134_v31 = vadd.f32 %v1905_v56, %v1750_v57  ;;  %2246 = vst.msk [vmem:[%s5413_s3 + $0xb8] sm:$0xff] %vm110_vm0, %v2150_v45  ;;  %v5786_v53 = vld [vmem:[#allocation66_spill] sm:$0xff]  ;;  %v1769_v57 = vmul.f32 %v4685_v12, %v5787_v15  ;;  %v5788_v56 = vld [vmem:[#allocation59_spill] sm:$0xff]  ;;  %v5801_v15 = vld [vmem:[#allocation4_spill] sm:$0xff] }
 0x224   :  { %v1783_v7 = vmul.f32 %v4690_v26, %v5786_v53  ;;  %v5800_v53 = vld [vmem:[#allocation70_spill] sm:$0xff] }
 0x225   :  { %2229 = vst [vmem:[%s5413_s3 + $0x30] sm:$0xff] %v2133_v17  ;;  %v1960_v20 = vpop.permute.xlu2 %1959  ;;  %v1770_v17 = vmul.f32 %v4685_v12, %v5788_v56  ;;  %v5790_v12 = vld [vmem:[#allocation57_spill] sm:$0xff] }
 0x226   :  { %2230 = vst.msk [vmem:[%s5413_s3 + $0x38] sm:$0xff] %vm110_vm0, %v2134_v31  ;;  %v1925_v42 = vpop.permute.xlu0 %1924  ;;  %v2155_v13 = vadd.f32 %v1960_v20, %v1771_v52  ;;  %v2156_v2 = vadd.f32 %v1960_v20, %v1772_v34  ;;  %v5789_v31 = vld [vmem:[#allocation67_spill] sm:$0xff] }
 0x227   :  { %v2141_v51 = vadd.f32 %v1925_v42, %v1757_v10  ;;  %v2142_v5 = vadd.f32 %v1925_v42, %v1758_v59  ;;  %v1784_v52 = vmul.f32 %v4690_v26, %v5789_v31  ;;  %v1767_v26 = vmul.f32 %v4695_v9, %v5790_v12 }
 0x228   :  { %2251 = vst [vmem:[%s5413_s3 + $0xe0] sm:$0xff] %v2155_v13 }
 0x229   :  { %2237 = vst [vmem:[%s5413_s3 + $0x70] sm:$0xff] %v2141_v51  ;;  %v5791_v51 = vld [vmem:[#allocation58_spill] sm:$0xff] }
 0x22a   :  { %2238 = vst.msk [vmem:[%s5413_s3 + $0x78] sm:$0xff] %vm110_vm0, %v2142_v5  ;;  %v1920_v23 = vpop.permute.xlu1 %1919  ;;  %v1768_v5 = vmul.f32 %v4695_v9, %v5791_v51  ;;  %v5805_v51 = vld [vmem:[#allocation3_spill] sm:$0xff] }
 0x22b   :  { %v2139_v28 = vadd.f32 %v1920_v23, %v1755_v24  ;;  %v2140_v14 = vadd.f32 %v1920_v23, %v1756_v39  ;;  %2252 = vst.msk [vmem:[%s5413_s3 + $0xe8] sm:$0xff] %vm110_vm0, %v2156_v2  ;;  %v5792_v23 = vld [vmem:[#allocation72_spill] sm:$0xff] }
 0x22c   :  { %v1789_v9 = vmul.f32 %v4708_v1, %v5792_v23 }
 0x22d   :  { %2235 = vst [vmem:[%s5413_s3 + $0x60] sm:$0xff] %v2139_v28  ;;  %v1975_v62 = vpop.permute.xlu2 %1974  ;;  %v5793_v28 = vld [vmem:[#allocation65_spill] sm:$0xff] }
 0x22e   :  { %2236 = vst.msk [vmem:[%s5413_s3 + $0x68] sm:$0xff] %vm110_vm0, %v2140_v14  ;;  %v1940_v18 = vpop.permute.xlu0 %1939  ;;  %v2161_v46 = vadd.f32 %v1975_v62, %v1777_v0  ;;  %v2162_v4 = vadd.f32 %v1975_v62, %v1778_v25  ;;  %v1775_v14 = vmul.f32 %v4703_v16, %v5793_v28  ;;  %v5794_v0 = vld [vmem:[#allocation64_spill] sm:$0xff] }
 0x22f   :  { %v2147_v40 = vadd.f32 %v1940_v18, %v1763_v6  ;;  %v2148_v19 = vadd.f32 %v1940_v18, %v1764_v30  ;;  %v1776_v6 = vmul.f32 %v4703_v16, %v5794_v0  ;;  %v5795_v30 = vld [vmem:[#allocation73_spill] sm:$0xff]  ;;  %v5796_v16 = vld [vmem:[#allocation62_spill] sm:$0xff] }
 0x230   :  { %2257 = vst [vmem:[%s5413_s3 + $0x110] sm:$0xff] %v2161_v46  ;;  %v1790_v49 = vmul.f32 %v4708_v1, %v5795_v30  ;;  %v1773_v1 = vmul.f32 %v4710_v35, %v5796_v16 }
 0x231   :  { %2243 = vst [vmem:[%s5413_s3 + $0xa0] sm:$0xff] %v2147_v40 }
 0x232   :  { %2244 = vst.msk [vmem:[%s5413_s3 + $0xa8] sm:$0xff] %vm110_vm0, %v2148_v19  ;;  %v1935_v45 = vpop.permute.xlu1 %1934 }
 0x233   :  { %v2145_v27 = vadd.f32 %v1935_v45, %v1761_v63  ;;  %v2146_v58 = vadd.f32 %v1935_v45, %v1762_v38  ;;  %2258 = vst.msk [vmem:[%s5413_s3 + $0x118] sm:$0xff] %vm110_vm0, %v2162_v4  ;;  %v5797_v4 = vld [vmem:[#allocation63_spill] sm:$0xff] }
 0x234   :  { %v1774_v36 = vmul.f32 %v4710_v35, %v5797_v4  ;;  %v5798_v45 = vld [vmem:[#allocation7_spill] sm:$0xff] }
 0x235   :  { %2241 = vst [vmem:[%s5413_s3 + $0x90] sm:$0xff] %v2145_v27  ;;  %v1990_v10 = vpop.permute.xlu2 %1989  ;;  %v1795_v35 = vmul.f32 %v4723_v44, %v5798_v45  ;;  %v5799_v27 = vld [vmem:[#allocation71_spill] sm:$0xff] }
 0x236   :  { %2242 = vst.msk [vmem:[%s5413_s3 + $0x98] sm:$0xff] %vm110_vm0, %v2146_v58  ;;  %v1955_v59 = vpop.permute.xlu0 %1954  ;;  %v2167_v34 = vadd.f32 %v1990_v10, %v1783_v7  ;;  %v2168_v13 = vadd.f32 %v1990_v10, %v1784_v52  ;;  %v1781_v58 = vmul.f32 %v4718_v37, %v5799_v27  ;;  %v1782_v7 = vmul.f32 %v4718_v37, %v5800_v53  ;;  %v5802_v37 = vld [vmem:[#allocation68_spill] sm:$0xff]  ;;  %v5815_v53 = vld [vmem:[#allocation5_spill] sm:$0xff] }
 0x237   :  { %v2153_v20 = vadd.f32 %v1955_v59, %v1769_v57  ;;  %v2154_v42 = vadd.f32 %v1955_v59, %v1770_v17  ;;  %v1796_v57 = vmul.f32 %v4723_v44, %v5801_v15  ;;  %v1779_v44 = vmul.f32 %v4728_v29, %v5802_v37  ;;  %v5819_v37 = vld [vmem:[#allocation22_spill] sm:$0xff] }
 0x238   :  { %2263 = vst [vmem:[%s5413_s3 + $0x140] sm:$0xff] %v2167_v34  ;;  %v5803_v34 = vld [vmem:[#allocation69_spill] sm:$0xff] }
 0x239   :  { %2249 = vst [vmem:[%s5413_s3 + $0xd0] sm:$0xff] %v2153_v20  ;;  %v1780_v20 = vmul.f32 %v4728_v29, %v5803_v34 }
 0x23a   :  { %2250 = vst.msk [vmem:[%s5413_s3 + $0xd8] sm:$0xff] %vm110_vm0, %v2154_v42  ;;  %v1950_v2 = vpop.permute.xlu1 %1949 }
 0x23b   :  { %v2151_v24 = vadd.f32 %v1950_v2, %v1767_v26  ;;  %v2152_v39 = vadd.f32 %v1950_v2, %v1768_v5  ;;  %2264 = vst.msk [vmem:[%s5413_s3 + $0x148] sm:$0xff] %vm110_vm0, %v2168_v13  ;;  %v5804_v26 = vld [vmem:[#allocation13_spill] sm:$0xff]  ;;  %v1787_v5 = vmul.f32 %v4736_v60, %v5805_v51  ;;  %v5806_v2 = vld [vmem:[#allocation2_spill] sm:$0xff] }
 0x23c   :  { %v1801_v29 = vmul.f32 %v4738_v61, %v5804_v26 }
 0x23d   :  { %2247 = vst [vmem:[%s5413_s3 + $0xc0] sm:$0xff] %v2151_v24  ;;  %v2005_v25 = vpop.permute.xlu2 %2004  ;;  %v1788_v24 = vmul.f32 %v4736_v60, %v5806_v2  ;;  %v5808_v60 = vld [vmem:[#allocation74_spill] sm:$0xff] }
 0x23e   :  { %2248 = vst.msk [vmem:[%s5413_s3 + $0xc8] sm:$0xff] %vm110_vm0, %v2152_v39  ;;  %v1970_v62 = vpop.permute.xlu0 %1969  ;;  %v2173_v18 = vadd.f32 %v2005_v25, %v1789_v9  ;;  %v2174_v19 = vadd.f32 %v2005_v25, %v1790_v49  ;;  %v5807_v39 = vld [vmem:[#allocation10_spill] sm:$0xff]  ;;  %v5809_v49 = vld [vmem:[#allocation75_spill] sm:$0xff] }
 0x23f   :  { %v2159_v46 = vadd.f32 %v1970_v62, %v1775_v14  ;;  %v2160_v40 = vadd.f32 %v1970_v62, %v1776_v6  ;;  %v1802_v23 = vmul.f32 %v4738_v61, %v5807_v39  ;;  %v1785_v61 = vmul.f32 %v4743_v11, %v5808_v60  ;;  %v5822_v39 = vld [vmem:[#allocation31_spill] sm:$0xff] }
 0x240   :  { %2269 = vst [vmem:[%s5413_s3 + $0x170] sm:$0xff] %v2173_v18  ;;  %v1786_v25 = vmul.f32 %v4743_v11, %v5809_v49 }
 0x241   :  { %2255 = vst [vmem:[%s5413_s3 + $0x100] sm:$0xff] %v2159_v46 }
 0x242   :  { %2256 = vst.msk [vmem:[%s5413_s3 + $0x108] sm:$0xff] %vm110_vm0, %v2160_v40  ;;  %v1965_v63 = vpop.permute.xlu1 %1964  ;;  %v5810_v40 = vld [vmem:[#allocation19_spill] sm:$0xff] }
 0x243   :  { %v2157_v8 = vadd.f32 %v1965_v63, %v1773_v1  ;;  %v2158_v38 = vadd.f32 %v1965_v63, %v1774_v36  ;;  %2270 = vst.msk [vmem:[%s5413_s3 + $0x178] sm:$0xff] %vm110_vm0, %v2174_v19  ;;  %v1807_v11 = vmul.f32 %v4753_v50, %v5810_v40  ;;  %v5811_v19 = vld [vmem:[#allocation9_spill] sm:$0xff]  ;;  %v5812_v1 = vld [vmem:[#allocation6_spill] sm:$0xff]  ;;  %v5813_v36 = vld [vmem:[#allocation16_spill] sm:$0xff] }
 0x244   :  { %v1793_v16 = vmul.f32 %v4751_v43, %v5811_v19  ;;  %v1794_v4 = vmul.f32 %v4751_v43, %v5812_v1  ;;  %v1808_v63 = vmul.f32 %v4753_v50, %v5813_v36  ;;  %v5814_v43 = vld [vmem:[#allocation8_spill] sm:$0xff]  ;;  %v5830_v36 = vld [vmem:[#allocation37_spill] sm:$0xff] }
 0x245   :  { %2253 = vst [vmem:[%s5413_s3 + $0xf0] sm:$0xff] %v2157_v8  ;;  %v2020_v56 = vpop.permute.xlu2 %2019  ;;  %v1791_v50 = vmul.f32 %v4761_v54, %v5814_v43  ;;  %v5835_v43 = vld [vmem:[#allocation34_spill] sm:$0xff] }
 0x246   :  { %2254 = vst.msk [vmem:[%s5413_s3 + $0xf8] sm:$0xff] %vm110_vm0, %v2158_v38  ;;  %v1985_v17 = vpop.permute.xlu0 %1984  ;;  %v2179_v31 = vadd.f32 %v2020_v56, %v1795_v35  ;;  %v2180_v59 = vadd.f32 %v2020_v56, %v1796_v57 }
 0x247   :  { %v2165_v52 = vadd.f32 %v1985_v17, %v1781_v58  ;;  %v2166_v10 = vadd.f32 %v1985_v17, %v1782_v7  ;;  %v1792_v7 = vmul.f32 %v4761_v54, %v5815_v53  ;;  %v5816_v17 = vld [vmem:[#allocation25_spill] sm:$0xff] }
 0x248   :  { %2275 = vst [vmem:[%s5413_s3 + $0x1a0] sm:$0xff] %v2179_v31  ;;  %v1813_v54 = vmul.f32 %v4771_v22, %v5816_v17  ;;  %v5817_v31 = vld [vmem:[#allocation15_spill] sm:$0xff] }
 0x249   :  { %2261 = vst [vmem:[%s5413_s3 + $0x130] sm:$0xff] %v2165_v52  ;;  %v1799_v52 = vmul.f32 %v4766_v21, %v5817_v31  ;;  %v5837_v31 = vld [vmem:[#allocation83_spill] sm:$0xff] }
 0x24a   :  { %2262 = vst.msk [vmem:[%s5413_s3 + $0x138] sm:$0xff] %vm110_vm0, %v2166_v10  ;;  %v1980_v42 = vpop.permute.xlu1 %1979  ;;  %v5818_v10 = vld [vmem:[#allocation12_spill] sm:$0xff] }
 0x24b   :  { %v2163_v13 = vadd.f32 %v1980_v42, %v1779_v44  ;;  %v2164_v12 = vadd.f32 %v1980_v42, %v1780_v20  ;;  %2276 = vst.msk [vmem:[%s5413_s3 + $0x1a8] sm:$0xff] %vm110_vm0, %v2180_v59  ;;  %v1800_v59 = vmul.f32 %v4766_v21, %v5818_v10  ;;  %v1814_v44 = vmul.f32 %v4771_v22, %v5819_v37  ;;  %v5820_v21 = vld [vmem:[#allocation14_spill] sm:$0xff]  ;;  %v5838_v10 = vld [vmem:[#allocation23_spill] sm:$0xff] }
 0x24c   :  { %v1797_v22 = vmul.f32 %v4776_v55, %v5820_v21 }
 0x24d   :  { %2259 = vst [vmem:[%s5413_s3 + $0x120] sm:$0xff] %v2163_v13  ;;  %v2035_v9 = vpop.permute.xlu2 %2034 }
 0x24e   :  { %2260 = vst.msk [vmem:[%s5413_s3 + $0x128] sm:$0xff] %vm110_vm0, %v2164_v12  ;;  %v2000_v28 = vpop.permute.xlu0 %1999  ;;  %v2185_v14 = vadd.f32 %v2035_v9, %v1801_v29  ;;  %v2186_v30 = vadd.f32 %v2035_v9, %v1802_v23  ;;  %v5821_v29 = vld [vmem:[#allocation11_spill] sm:$0xff]  ;;  %v5823_v23 = vld [vmem:[#allocation21_spill] sm:$0xff] }
 0x24f   :  { %v2171_v0 = vadd.f32 %v2000_v28, %v1787_v5  ;;  %v2172_v6 = vadd.f32 %v2000_v28, %v1788_v24  ;;  %v1798_v51 = vmul.f32 %v4776_v55, %v5821_v29  ;;  %v1819_v55 = vmul.f32 %v4786_v48, %v5822_v39  ;;  %v5824_v9 = vld [vmem:[#allocation79_spill] sm:$0xff] }
 0x250   :  { %2281 = vst [vmem:[%s5413_s3 + $0x1d0] sm:$0xff] %v2185_v14  ;;  %v1805_v28 = vmul.f32 %v5824_v9, %v5823_v23  ;;  %v5825_v14 = vld [vmem:[#allocation18_spill] sm:$0xff] }
 0x251   :  { %2267 = vst [vmem:[%s5413_s3 + $0x160] sm:$0xff] %v2171_v0  ;;  %v1806_v0 = vmul.f32 %v5824_v9, %v5825_v14  ;;  %v5846_v14 = vld [vmem:[#allocation86_spill] sm:$0xff] }
 0x252   :  { %2268 = vst.msk [vmem:[%s5413_s3 + $0x168] sm:$0xff] %vm110_vm0, %v2172_v6  ;;  %v1995_v62 = vpop.permute.xlu1 %1994  ;;  %v5826_v6 = vld [vmem:[#allocation28_spill] sm:$0xff] }
 0x253   :  { %v2169_v18 = vadd.f32 %v1995_v62, %v1785_v61  ;;  %v2170_v46 = vadd.f32 %v1995_v62, %v1786_v25  ;;  %2282 = vst.msk [vmem:[%s5413_s3 + $0x1d8] sm:$0xff] %vm110_vm0, %v2186_v30  ;;  %v1820_v30 = vmul.f32 %v4786_v48, %v5826_v6  ;;  %v5827_v48 = vld [vmem:[#allocation20_spill] sm:$0xff]  ;;  %v5847_v6 = vld [vmem:[#allocation29_spill] sm:$0xff] }
 0x255   :  { %2265 = vst [vmem:[%s5413_s3 + $0x150] sm:$0xff] %v2169_v18  ;;  %v2050_v8 = vpop.permute.xlu2 %2049 }
 0x256   :  { %2266 = vst.msk [vmem:[%s5413_s3 + $0x158] sm:$0xff] %vm110_vm0, %v2170_v46  ;;  %v2015_v38 = vpop.permute.xlu0 %2014  ;;  %v2191_v45 = vadd.f32 %v2050_v8, %v1807_v11  ;;  %v2192_v58 = vadd.f32 %v2050_v8, %v1808_v63  ;;  %v5828_v46 = vld [vmem:[#allocation80_spill] sm:$0xff]  ;;  %v5829_v11 = vld [vmem:[#allocation17_spill] sm:$0xff] }
 0x257   :  { %v2177_v35 = vadd.f32 %v2015_v38, %v1793_v16  ;;  %v2178_v27 = vadd.f32 %v2015_v38, %v1794_v4  ;;  %v1803_v40 = vmul.f32 %v5828_v46, %v5827_v48  ;;  %v1804_v19 = vmul.f32 %v5828_v46, %v5829_v11  ;;  %v5831_v63 = vld [vmem:[#allocation81_spill] sm:$0xff]  ;;  %v5832_v38 = vld [vmem:[#allocation27_spill] sm:$0xff]  ;;  %v5851_v46 = vld [vmem:[#allocation88_spill] sm:$0xff] }
 0x258   :  { %2287 = vst [vmem:[%s5413_s3 + $0x200] sm:$0xff] %v2191_v45  ;;  %v1825_v8 = vmul.f32 %v5831_v63, %v5830_v36  ;;  %v5833_v45 = vld [vmem:[#allocation82_spill] sm:$0xff]  ;;  %v5850_v48 = vld [vmem:[#allocation39_spill] sm:$0xff]  ;;  %v5852_v11 = vld [vmem:[#allocation36_spill] sm:$0xff] }
 0x259   :  { %2273 = vst [vmem:[%s5413_s3 + $0x190] sm:$0xff] %v2177_v35  ;;  %v1811_v35 = vmul.f32 %v5833_v45, %v5832_v38 }
 0x25a   :  { %2274 = vst.msk [vmem:[%s5413_s3 + $0x198] sm:$0xff] %vm110_vm0, %v2178_v27  ;;  %v2010_v15 = vpop.permute.xlu1 %2009  ;;  %v5834_v27 = vld [vmem:[#allocation24_spill] sm:$0xff] }
 0x25b   :  { %v2175_v57 = vadd.f32 %v2010_v15, %v1791_v50  ;;  %v2176_v56 = vadd.f32 %v2010_v15, %v1792_v7  ;;  %2288 = vst.msk [vmem:[%s5413_s3 + $0x208] sm:$0xff] %vm110_vm0, %v2192_v58  ;;  %v1812_v58 = vmul.f32 %v5833_v45, %v5834_v27  ;;  %v1826_v50 = vmul.f32 %v5831_v63, %v5835_v43 }
 0x25d   :  { %2271 = vst [vmem:[%s5413_s3 + $0x180] sm:$0xff] %v2175_v57  ;;  %v2065_v34 = vpop.permute.xlu2 %2064 }
 0x25e   :  { %2272 = vst.msk [vmem:[%s5413_s3 + $0x188] sm:$0xff] %vm110_vm0, %v2176_v56  ;;  %v2030_v20 = vpop.permute.xlu0 %2029  ;;  %v2197_v42 = vadd.f32 %v2065_v34, %v1813_v54  ;;  %v2198_v26 = vadd.f32 %v2065_v34, %v1814_v44  ;;  %v5836_v54 = vld [vmem:[#allocation26_spill] sm:$0xff] }
 0x25f   :  { %v2183_v13 = vadd.f32 %v2030_v20, %v1799_v52  ;;  %v2184_v12 = vadd.f32 %v2030_v20, %v1800_v59  ;;  %v1809_v52 = vmul.f32 %v5837_v31, %v5836_v54  ;;  %v1810_v59 = vmul.f32 %v5837_v31, %v5838_v10  ;;  %v5839_v20 = vld [vmem:[#allocation43_spill] sm:$0xff] }
 0x260   :  { %2293 = vst [vmem:[%s5413_s3 + $0x230] sm:$0xff] %v2197_v42  ;;  %v5840_v42 = vld [vmem:[#allocation84_spill] sm:$0xff] }
 0x261   :  { %2279 = vst [vmem:[%s5413_s3 + $0x1c0] sm:$0xff] %v2183_v13  ;;  %v1831_v13 = vmul.f32 %v5840_v42, %v5839_v20  ;;  %v5860_v20 = vld [vmem:[#allocation78_spill] sm:$0xff] }
 0x262   :  { %2280 = vst.msk [vmem:[%s5413_s3 + $0x1c8] sm:$0xff] %vm110_vm0, %v2184_v12  ;;  %v2025_v5 = vpop.permute.xlu1 %2024  ;;  %v5841_v12 = vld [vmem:[#allocation33_spill] sm:$0xff] }
 0x263   :  { %v2181_v2 = vadd.f32 %v2025_v5, %v1797_v22  ;;  %v2182_v24 = vadd.f32 %v2025_v5, %v1798_v51  ;;  %2294 = vst.msk [vmem:[%s5413_s3 + $0x238] sm:$0xff] %vm110_vm0, %v2198_v26  ;;  %v5842_v26 = vld [vmem:[#allocation85_spill] sm:$0xff]  ;;  %v5843_v22 = vld [vmem:[#allocation30_spill] sm:$0xff]  ;;  %v5844_v51 = vld [vmem:[#allocation40_spill] sm:$0xff] }
 0x264   :  { %v1817_v21 = vmul.f32 %v5842_v26, %v5841_v12  ;;  %v1818_v29 = vmul.f32 %v5842_v26, %v5843_v22  ;;  %v1832_v5 = vmul.f32 %v5840_v42, %v5844_v51  ;;  %v1835_v42 = vmul.f32 %v4872_v33, %v5860_v20  ;;  %v5862_v22 = vld [vmem:[#allocation77_spill] sm:$0xff]  ;;  %v5863_v51 = vld [vmem:[#allocation47_spill] sm:$0xff] }
 0x265   :  { %2277 = vst [vmem:[%s5413_s3 + $0x1b0] sm:$0xff] %v2181_v2  ;;  %v2080_v60 = vpop.permute.xlu2 %2079 }
 0x266   :  { %2278 = vst.msk [vmem:[%s5413_s3 + $0x1b8] sm:$0xff] %vm110_vm0, %v2182_v24  ;;  %v2045_v61 = vpop.permute.xlu0 %2044  ;;  %v2203_v49 = vadd.f32 %v2080_v60, %v1819_v55  ;;  %v2204_v18 = vadd.f32 %v2080_v60, %v1820_v30  ;;  %v1816_v30 = vmul.f32 %v5846_v14, %v5847_v6 }
 0x267   :  { %v2189_v25 = vadd.f32 %v2045_v61, %v1805_v28  ;;  %v2190_v62 = vadd.f32 %v2045_v61, %v1806_v0  ;;  %v5845_v28 = vld [vmem:[#allocation32_spill] sm:$0xff] }
 0x268   :  { %2299 = vst [vmem:[%s5413_s3 + $0x260] sm:$0xff] %v2203_v49  ;;  %v1815_v0 = vmul.f32 %v5846_v14, %v5845_v28 }
 0x269   :  { %2285 = vst [vmem:[%s5413_s3 + $0x1f0] sm:$0xff] %v2189_v25  ;;  %v5848_v25 = vld [vmem:[#allocation76_spill] sm:$0xff] }
 0x26a   :  { %2286 = vst.msk [vmem:[%s5413_s3 + $0x1f8] sm:$0xff] %vm110_vm0, %v2190_v62  ;;  %v2040_v16 = vpop.permute.xlu1 %2039  ;;  %v5849_v62 = vld [vmem:[#allocation87_spill] sm:$0xff] }
 0x26b   :  { %v2187_v1 = vadd.f32 %v2040_v16, %v1803_v40  ;;  %v2188_v4 = vadd.f32 %v2040_v16, %v1804_v19  ;;  %2300 = vst.msk [vmem:[%s5413_s3 + $0x268] sm:$0xff] %vm110_vm0, %v2204_v18  ;;  %v1837_v18 = vmul.f32 %v5849_v62, %v5848_v25  ;;  %v1823_v40 = vmul.f32 %v5851_v46, %v5850_v48  ;;  %v5853_v16 = vld [vmem:[#allocation46_spill] sm:$0xff] }
 0x26c   :  { %v1824_v19 = vmul.f32 %v5851_v46, %v5852_v11 }
 0x26d   :  { %2283 = vst [vmem:[%s5413_s3 + $0x1e0] sm:$0xff] %v2187_v1  ;;  %v2095_v53 = vpop.permute.xlu2 %2094  ;;  %v1838_v1 = vmul.f32 %v5849_v62, %v5853_v16 }
 0x26e   :  { %2284 = vst.msk [vmem:[%s5413_s3 + $0x1e8] sm:$0xff] %vm110_vm0, %v2188_v4  ;;  %v2060_v7 = vpop.permute.xlu0 %2059  ;;  %v2209_v15 = vadd.f32 %v2095_v53, %v1825_v8  ;;  %v2210_v17 = vadd.f32 %v2095_v53, %v1826_v50 }
 0x26f   :  { %v2195_v57 = vadd.f32 %v2060_v7, %v1811_v35  ;;  %v2196_v56 = vadd.f32 %v2060_v7, %v1812_v58  ;;  %v5854_v35 = vld [vmem:[#allocation38_spill] sm:$0xff]  ;;  %v5855_v58 = vld [vmem:[#allocation35_spill] sm:$0xff] }
 0x270   :  { %2305 = vst [vmem:[%s5413_s3 + $0x290] sm:$0xff] %v2209_v15  ;;  %v1821_v27 = vmul.f32 %v4839_v32, %v5854_v35  ;;  %v1822_v43 = vmul.f32 %v4839_v32, %v5855_v58  ;;  %v5856_v15 = vld [vmem:[#allocation45_spill] sm:$0xff] }
 0x271   :  { %2291 = vst [vmem:[%s5413_s3 + $0x220] sm:$0xff] %v2195_v57  ;;  %v1829_v32 = vmul.f32 %v4848_v41, %v5856_v15  ;;  %v5857_v57 = vld [vmem:[#allocation42_spill] sm:$0xff] }
 0x272   :  { %2292 = vst.msk [vmem:[%s5413_s3 + $0x228] sm:$0xff] %vm110_vm0, %v2196_v56  ;;  %v2055_v37 = vpop.permute.xlu1 %2054  ;;  %v1830_v56 = vmul.f32 %v4848_v41, %v5857_v57 }
 0x273   :  { %v2193_v44 = vadd.f32 %v2055_v37, %v1809_v52  ;;  %v2194_v34 = vadd.f32 %v2055_v37, %v1810_v59  ;;  %2306 = vst.msk [vmem:[%s5413_s3 + $0x298] sm:$0xff] %vm110_vm0, %v2210_v17  ;;  %v5858_v52 = vld [vmem:[#allocation44_spill] sm:$0xff]  ;;  %v5859_v59 = vld [vmem:[#allocation41_spill] sm:$0xff] }
 0x274   :  { %v1827_v10 = vmul.f32 %v4863_v47, %v5858_v52  ;;  %v1828_v37 = vmul.f32 %v4863_v47, %v5859_v59 }
 0x275   :  { %2289 = vst [vmem:[%s5413_s3 + $0x210] sm:$0xff] %v2193_v44  ;;  %v2110_v2 = vpop.permute.xlu2 %2109 }
 0x276   :  { %2290 = vst.msk [vmem:[%s5413_s3 + $0x218] sm:$0xff] %vm110_vm0, %v2194_v34  ;;  %v2075_v24 = vpop.permute.xlu0 %2074  ;;  %v2215_v39 = vadd.f32 %v2110_v2, %v1831_v13  ;;  %v2216_v9 = vadd.f32 %v2110_v2, %v1832_v5  ;;  %v5861_v13 = vld [vmem:[#allocation48_spill] sm:$0xff]  ;;  %v1834_v5 = vmul.f32 %v4887_v3, %v5863_v51 }
 0x277   :  { %v2201_v55 = vadd.f32 %v2075_v24, %v1817_v21  ;;  %v2202_v23 = vadd.f32 %v2075_v24, %v1818_v29  ;;  %v1836_v12 = vmul.f32 %v4872_v33, %v5861_v13  ;;  %v1833_v29 = vmul.f32 %v4887_v3, %v5862_v22 }
 0x278   :  { %2311 = vst [vmem:[%s5413_s3 + $0x2c0] sm:$0xff] %v2215_v39 }
 0x279   :  { %2297 = vst [vmem:[%s5413_s3 + $0x250] sm:$0xff] %v2201_v55 }
 0x27a   :  { %2298 = vst.msk [vmem:[%s5413_s3 + $0x258] sm:$0xff] %vm110_vm0, %v2202_v23  ;;  %v2070_v60 = vpop.permute.xlu1 %2069 }
 0x27b   :  { %v2199_v61 = vadd.f32 %v2070_v60, %v1815_v0  ;;  %v2200_v49 = vadd.f32 %v2070_v60, %v1816_v30  ;;  %2312 = vst.msk [vmem:[%s5413_s3 + $0x2c8] sm:$0xff] %vm110_vm0, %v2216_v9 }
 0x27d   :  { %2295 = vst [vmem:[%s5413_s3 + $0x240] sm:$0xff] %v2199_v61  ;;  %v2125_v4 = vpop.permute.xlu2 %2124 }
 0x27e   :  { %2296 = vst.msk [vmem:[%s5413_s3 + $0x248] sm:$0xff] %vm110_vm0, %v2200_v49  ;;  %v2090_v36 = vpop.permute.xlu0 %2089  ;;  %v2221_v63 = vadd.f32 %v2125_v4, %v1837_v18  ;;  %v2222_v45 = vadd.f32 %v2125_v4, %v1838_v1 }
 0x27f   :  { %v2207_v8 = vadd.f32 %v2090_v36, %v1823_v40  ;;  %v2208_v38 = vadd.f32 %v2090_v36, %v1824_v19 }
 0x280   :  { %2317 = vst [vmem:[%s5413_s3 + $0x2f0] sm:$0xff] %v2221_v63 }
 0x281   :  { %2303 = vst [vmem:[%s5413_s3 + $0x280] sm:$0xff] %v2207_v8 }
 0x282   :  { %2304 = vst.msk [vmem:[%s5413_s3 + $0x288] sm:$0xff] %vm110_vm0, %v2208_v38  ;;  %v2085_v50 = vpop.permute.xlu1 %2084 }
 0x283   :  { %v2205_v53 = vadd.f32 %v2085_v50, %v1821_v27  ;;  %v2206_v7 = vadd.f32 %v2085_v50, %v1822_v43  ;;  %2318 = vst.msk [vmem:[%s5413_s3 + $0x2f8] sm:$0xff] %vm110_vm0, %v2222_v45 }
 0x285   :  { %2301 = vst [vmem:[%s5413_s3 + $0x270] sm:$0xff] %v2205_v53 }
 0x286   :  { %2302 = vst.msk [vmem:[%s5413_s3 + $0x278] sm:$0xff] %vm110_vm0, %v2206_v7  ;;  %v2105_v17 = vpop.permute.xlu0 %2104 }
 0x287   :  { %v2213_v54 = vadd.f32 %v2105_v17, %v1829_v32  ;;  %v2214_v31 = vadd.f32 %v2105_v17, %v1830_v56 }
 0x289   :  { %2309 = vst [vmem:[%s5413_s3 + $0x2b0] sm:$0xff] %v2213_v54 }
 0x28a   :  { %2310 = vst.msk [vmem:[%s5413_s3 + $0x2b8] sm:$0xff] %vm110_vm0, %v2214_v31  ;;  %v2100_v41 = vpop.permute.xlu1 %2099 }
 0x28b   :  { %v2211_v44 = vadd.f32 %v2100_v41, %v1827_v10  ;;  %v2212_v34 = vadd.f32 %v2100_v41, %v1828_v37 }
 0x28d   :  { %2307 = vst [vmem:[%s5413_s3 + $0x2a0] sm:$0xff] %v2211_v44 }
 0x28e   :  { %2308 = vst.msk [vmem:[%s5413_s3 + $0x2a8] sm:$0xff] %vm110_vm0, %v2212_v34  ;;  %v2120_v47 = vpop.permute.xlu0 %2119 }
 0x28f   :  { %v2219_v26 = vadd.f32 %v2120_v47, %v1835_v42  ;;  %v2220_v21 = vadd.f32 %v2120_v47, %v1836_v12 }
 0x291   :  { %2315 = vst [vmem:[%s5413_s3 + $0x2e0] sm:$0xff] %v2219_v26 }
 0x292   :  { %2316 = vst.msk [vmem:[%s5413_s3 + $0x2e8] sm:$0xff] %vm110_vm0, %v2220_v21  ;;  %v2115_v33 = vpop.permute.xlu1 %2114 }
 0x293   :  { %v2217_v2 = vadd.f32 %v2115_v33, %v1833_v29  ;;  %v2218_v24 = vadd.f32 %v2115_v33, %v1834_v5 }
 0x295   :  { %2313 = vst [vmem:[%s5413_s3 + $0x2d0] sm:$0xff] %v2217_v2 }
 0x296   :  { %2314 = vst.msk [vmem:[%s5413_s3 + $0x2d8] sm:$0xff] %vm110_vm0, %v2218_v24 }

</bundles_post_ra>
